<compile_context>
chip_gen: v7x
topology: tpu7x:2x2x1
jax: 0.10.0
libtpu: 0.0.40
codegen_flags: <defaults>
</compile_context>

<pallas_src>
import jax
import jax.numpy as jnp
from jax import lax
from jax.experimental import pallas as pl
from jax.experimental.pallas import tpu as pltpu


P_PAD = 8  # rel_pos channels zero-padded 3 -> 8 (exact math, nicer layout; K*8 = 128)


# ------------------------- Pallas kernel -------------------------

def point_transformer_kernel(
    feat_ref,     # (tn, D)      f32   query-point features (residual input)
    vkval_ref,    # (tn, K*D)    bf16  gathered v-projected neighbor rows, packed per point
    negk_ref,     # (tn, K)      f32   gathered -(k-projection channel sum)  (logit bias)
    relpos_ref,   # (tn, K*P)    bf16  xyz_i - xyz_j, packed per point, padded 3 -> P
    w1_ref,       # (K*P, K*D)   bf16  blockdiag(fc_pos[0].W)
    b1_ref,       # (1, K*D)     f32   tile(fc_pos[0].b, K)
    w2_ref,       # (K*D, K*D)   bf16  blockdiag(fc_pos[2].W)
    b2_ref,       # (1, K*D)     f32   tile(fc_pos[2].b, K)
    w2s_ref,      # (K*D, K)     bf16  blockdiag(fc_pos[2].W.sum(out))   -> pos logits
    spread_ref,   # (K, K*D)     bf16  blockdiag(ones(1, D))             -> attn spread
    wproj_ref,    # (D, D)       bf16  gamma * proj.W
    bproj_ref,    # (1, D)       f32   gamma * proj.b
    out_ref,      # (tn, D)      f32
):
    tn, d = feat_ref.shape
    kd = vkval_ref.shape[1]            # K * D

    # positional MLP, neighbor-packed (block-diagonal weights):
    #   h[:, k*D + c] = ReLU( sum_p relpos[:, k*P + p] * wp1[p, c] + bp1[c] )
    h = jnp.dot(relpos_ref[...], w1_ref[...], preferred_element_type=jnp.float32)
    h = jnp.maximum(h + b1_ref[...], 0.0)
    hb = h.astype(jnp.bfloat16)

    # pos_enc (value part) and its channel sum (logit part) — two packed matmuls
    ps_val = jnp.dot(hb, w2_ref[...], preferred_element_type=jnp.float32) + b2_ref[...]
    pos_logit = jnp.dot(hb, w2s_ref[...], preferred_element_type=jnp.float32)   # (tn, K)

    # softmax over the K neighbors (torch dim=-2).  fc_q, bq, bk, sum(bp2) are
    # constant over K and cancel (shift invariance), so the logits are just
    # -(k channel-sum) + (pos_enc channel-sum), lane-dense (tn, K).
    logits = pos_logit + negk_ref[...]
    m = jnp.max(logits, axis=1, keepdims=True)
    e = jnp.exp(logits - m)
    attn = e * pl.reciprocal(jnp.sum(e, axis=1, keepdims=True), approx=True)     # (tn, K)

    # value = gathered v + pos_enc, still neighbor-packed (tn, K*D)
    vps = ps_val + vkval_ref[...].astype(jnp.float32)

    # spread attn[:, k] across the D lanes of neighbor block k via a tiny 0/1 matmul,
    # weight, then fold the K blocks back down to (tn, D):
    #   - sum lane-tile-aligned 128-column chunks (exact, cheap vreg adds)
    #   - then roll-add within a 128-lane tile (columns are congruent mod D)
    attn_spread = jnp.dot(attn.astype(jnp.bfloat16), spread_ref[...],
                          preferred_element_type=jnp.float32)                    # (tn, K*D)
    weighted = attn_spread * vps

    z = weighted[:, 0:128]
    for c in range(128, kd, 128):
        z = z + weighted[:, c:c + 128]
    s = d
    while s < 128:
        z = z + pltpu.roll(z, shift=s, axis=1)
        s *= 2
    agg = z[:, 0:d]                                                              # (tn, D)

    # (gamma-folded) output projection + residual
    out = jnp.dot(agg.astype(jnp.bfloat16), wproj_ref[...],
                  preferred_element_type=jnp.float32) + bproj_ref[...]
    out_ref[...] = feat_ref[...] + out


# ------------------------- JAX glue (kNN + gather) -------------------------

def square_distance(src, dst):
    # src: (B, N, C), dst: (B, M, C) -> (B, N, M)
    return (jnp.sum(src ** 2, -1)[:, :, None]
            + jnp.sum(dst ** 2, -1)[:, None, :]
            - 2.0 * jnp.einsum('bnc,bmc->bnm', src, dst))


def index_points(points, idx):
    # points: (B, N, ...), idx: (B, S, K) -> (B, S, K, ...)
    # TODO(synk): gather done in plain JAX; no clean Pallas equivalent for generic gather.
    return jax.vmap(lambda p, i: p[i])(points, idx)


# ------------------------- wrapper -------------------------

def point_transformer_forward(xyz, feat, params, *, k=16, tn=256):
    """Full PointTransformerLayer forward.

    xyz:  (B, N, 3) f32
    feat: (B, N, D) f32
    params = (wq, bq, wk, bk, wv, bv, wp1, bp1, wp2, bp2, wproj, bproj, gamma)
             in PyTorch-equivalent (in, out) layout.
    """
    (wq, bq, wk, bk, wv, bv, wp1, bp1, wp2, bp2, wproj, bproj, gamma) = params
    del wq, bq, bk   # cancel exactly under the softmax over K (shift invariance)

    B, N, _ = xyz.shape
    D = feat.shape[-1]
    M = B * N
    K = k
    KD = K * D
    KP = K * P_PAD

    tn = min(tn, M)
    assert M % tn == 0, "number of points must be divisible by the tile size"
    assert tn % 16 == 0, "tile size must be a multiple of 16 (bf16 sublane packing)"
    assert KD % 128 == 0 and KD >= 128, "K*d_model must be a multiple of 128"
    assert 128 % D == 0 and (128 // D) & (128 // D - 1) == 0, \
        "d_model must divide 128 with a power-of-two quotient"

    hp = lax.Precision.HIGHEST  # cheap: these are (M,D)@(D,·) over unique points only

    # ---- kNN + gathers (plain JAX; TODO(synk): no Pallas top-k / generic gather) ----
    dist = square_distance(xyz, xyz)                       # (B, N, N)
    knn_idx = lax.top_k(-dist, K)[1]                       # (B, N, K)
    neighbor_xyz = index_points(xyz, knn_idx)              # (B, N, K, 3)
    rel_pos = xyz[:, :, None, :] - neighbor_xyz            # (B, N, K, 3)

    # ---- rec 1: project BEFORE the gather (over M unique points), gather projections ----
    vproj = jnp.einsum('bnd,de->bne', feat, wv, precision=hp) + bv          # (B, N, D)
    ksum = jnp.einsum('bnd,d->bn', feat, jnp.sum(wk, axis=1), precision=hp)  # (B, N)
    vkval_g = index_points(vproj, knn_idx)                                   # (B, N, K, D)
    negk_g = -jax.vmap(lambda s, i: s[i])(ksum, knn_idx)                     # (B, N, K)

    # ---- flatten + neighbor-pack (free row-major reshapes) ----
    feat2d = feat.reshape(M, D)
    vkval2d = vkval_g.reshape(M, KD).astype(jnp.bfloat16)
    negk2d = negk_g.reshape(M, K).astype(jnp.float32)
    relpos_pad = jnp.pad(rel_pos, ((0, 0), (0, 0), (0, 0), (0, P_PAD - rel_pos.shape[-1])))
    relpos2d = relpos_pad.reshape(M, KP).astype(jnp.bfloat16)

    # ---- block-diagonal weight packing (tiny, built once) ----
    eye_k = jnp.eye(K, dtype=jnp.float32)
    wp1_pad = jnp.pad(wp1, ((0, P_PAD - wp1.shape[0]), (0, 0)))              # (P_PAD, D)
    w1_blk = jnp.kron(eye_k, wp1_pad).astype(jnp.bfloat16)                   # (KP, KD)
    b1_tile = jnp.tile(bp1, (1, K)).astype(jnp.float32)                      # (1, KD)
    w2_blk = jnp.kron(eye_k, wp2).astype(jnp.bfloat16)                       # (KD, KD)
    b2_tile = jnp.tile(bp2, (1, K)).astype(jnp.float32)                      # (1, KD)
    w2s_blk = jnp.kron(eye_k, jnp.sum(wp2, axis=1, keepdims=True)).astype(jnp.bfloat16)  # (KD, K)
    spread = jnp.kron(eye_k, jnp.ones((1, D), jnp.float32)).astype(jnp.bfloat16)         # (K, KD)
    wproj_g = (gamma[0, 0] * wproj).astype(jnp.bfloat16)                     # (D, D)
    bproj_g = (gamma[0, 0] * bproj).astype(jnp.float32)                      # (1, D)

    def full(shape):
        return pl.BlockSpec(shape, lambda i: (0,) * len(shape))

    in_specs = [
        pl.BlockSpec((tn, D), lambda i: (i, 0)),      # feat tile
        pl.BlockSpec((tn, KD), lambda i: (i, 0)),     # gathered v (packed)
        pl.BlockSpec((tn, K), lambda i: (i, 0)),      # -k channel-sum (logit bias)
        pl.BlockSpec((tn, KP), lambda i: (i, 0)),     # relative positions (packed)
        full((KP, KD)), full((1, KD)),                # fc_pos[0] (blockdiag)
        full((KD, KD)), full((1, KD)),                # fc_pos[2] (blockdiag)
        full((KD, K)),                                # fc_pos[2] channel-sum columns
        full((K, KD)),                                # attn spread (0/1)
        full((D, D)), full((1, D)),                   # gamma * proj
    ]
    out_spec = pl.BlockSpec((tn, D), lambda i: (i, 0))

    # NOTE: keep grid = M // tn an even multiple of 2 where possible so v7x's two
    # TensorCores both get work (dimension_semantics=('parallel',) shards this axis).
    out2d = pl.pallas_call(
        point_transformer_kernel,
        out_shape=jax.ShapeDtypeStruct((M, D), feat.dtype),
        grid_spec=pltpu.PrefetchScalarGridSpec(
            num_scalar_prefetch=0,
            grid=(M // tn,),
            in_specs=in_specs,
            out_specs=out_spec,
        ),
        compiler_params=pltpu.CompilerParams(
            dimension_semantics=("parallel",),
        ),
    )(feat2d, vkval2d, negk2d, relpos2d,
      w1_blk, b1_tile, w2_blk, b2_tile, w2s_blk, spread, wproj_g, bproj_g)

    return out2d.reshape(B, N, D)


# ------------------------- demo / test -------------------------

if __name__ == "__main__":
    B, N, D, K = 2, 256, 32, 16    # d_model=32, k=16 neighbors
    TN = 256                       # points per kernel tile -> grid = (B*N)//TN = 2 (even)

    key = jax.random.PRNGKey(0)
    keys = jax.random.split(key, 16)

    xyz = jax.random.normal(keys[0], (B, N, 3), jnp.float32)
    feat = jax.random.normal(keys[1], (B, N, D), jnp.float32)

    def init_linear(kw, kb, fan_in, fan_out):
        w = jax.random.normal(kw, (fan_in, fan_out), jnp.float32) / jnp.sqrt(float(fan_in))
        b = jax.random.normal(kb, (1, fan_out), jnp.float32) * 0.01
        return w, b

    wq, bq = init_linear(keys[2], keys[3], D, D)
    wk, bk = init_linear(keys[4], keys[5], D, D)
    wv, bv = init_linear(keys[6], keys[7], D, D)
    wp1, bp1 = init_linear(keys[8], keys[9], 3, D)
    wp2, bp2 = init_linear(keys[10], keys[11], D, D)
    wproj, bproj = init_linear(keys[12], keys[13], D, D)
    # PyTorch inits gamma = 0; use a nonzero value so the attention branch is exercised.
    gamma = jnp.full((1, 1), 0.5, jnp.float32)

    params = (wq, bq, wk, bk, wv, bv, wp1, bp1, wp2, bp2, wproj, bproj, gamma)

    out = point_transformer_forward(xyz, feat, params, k=K, tn=TN)
    jax.block_until_ready(out)

    # ---- pure-JAX reference of the full module math (q/k NOT collapsed here) ----
    with jax.default_matmul_precision("float32"):
        dist = square_distance(xyz, xyz)
        knn_idx = lax.top_k(-dist, K)[1]
        neighbor_xyz = index_points(xyz, knn_idx)
        neighbor_feat = index_points(feat, knn_idx)
        rel_pos = xyz[:, :, None, :] - neighbor_xyz

        q_r = feat @ wq + bq                                              # (B, N, D)
        k_r = neighbor_feat @ wk + bk                                     # (B, N, K, D)
        v_r = neighbor_feat @ wv + bv                                     # (B, N, K, D)
        pos_r = jnp.maximum(rel_pos @ wp1 + bp1, 0.0) @ wp2 + bp2         # (B, N, K, D)
        logits_r = jnp.sum(q_r[:, :, None, :] - k_r + pos_r, axis=-1, keepdims=True)
        attn_r = jax.nn.softmax(logits_r, axis=-2)                        # softmax over K
        agg_r = jnp.sum(attn_r * (v_r + pos_r), axis=2)                   # (B, N, D)
        ref = feat + gamma[0, 0] * (agg_r @ wproj + bproj)

    # bf16 MXU operands inside the kernel (f32 accumulation) -> relaxed tolerance
    err = float(jnp.max(jnp.abs(out - ref)))
    assert jnp.allclose(out, ref, atol=3e-2, rtol=3e-2), f"max abs err = {err}"
    print("KERNEL_OK")
</pallas_src>

<mosaic_0001>
module attributes {stable_mosaic.version = 11 : i64} {
  func.func @point_transformer_kernel(%arg0: i32, %arg1: memref<256x32xf32, #tpu.memory_space<vmem>>, %arg2: memref<256x512xbf16, #tpu.memory_space<vmem>>, %arg3: memref<256x16xf32, #tpu.memory_space<vmem>>, %arg4: memref<256x128xbf16, #tpu.memory_space<vmem>>, %arg5: memref<128x512xbf16, #tpu.memory_space<vmem>>, %arg6: memref<1x512xf32, #tpu.memory_space<vmem>>, %arg7: memref<512x512xbf16, #tpu.memory_space<vmem>>, %arg8: memref<1x512xf32, #tpu.memory_space<vmem>>, %arg9: memref<512x16xbf16, #tpu.memory_space<vmem>>, %arg10: memref<16x512xbf16, #tpu.memory_space<vmem>>, %arg11: memref<32x32xbf16, #tpu.memory_space<vmem>>, %arg12: memref<1x32xf32, #tpu.memory_space<vmem>>, %arg13: memref<256x32xf32, #tpu.memory_space<vmem>>) attributes {dimension_semantics = [#tpu.dimension_semantics<parallel>], iteration_bounds = array<i64: 2>, scalar_prefetch = 0 : i64, scratch_operands = 0 : i64, tpu.core_type = #tpu.core_type<tc>, window_params = [{transform_indices = @transform_0, window_bounds = array<i64: 256, 32>}, {transform_indices = @transform_1, window_bounds = array<i64: 256, 512>}, {transform_indices = @transform_2, window_bounds = array<i64: 256, 16>}, {transform_indices = @transform_3, window_bounds = array<i64: 256, 128>}, {pipeline_mode = #tpu.pipeline_mode<synchronous>, transform_indices = @transform_4, window_bounds = array<i64: 128, 512>}, {pipeline_mode = #tpu.pipeline_mode<synchronous>, transform_indices = @transform_5, window_bounds = array<i64: 1, 512>}, {pipeline_mode = #tpu.pipeline_mode<synchronous>, transform_indices = @transform_6, window_bounds = array<i64: 512, 512>}, {pipeline_mode = #tpu.pipeline_mode<synchronous>, transform_indices = @transform_7, window_bounds = array<i64: 1, 512>}, {pipeline_mode = #tpu.pipeline_mode<synchronous>, transform_indices = @transform_8, window_bounds = array<i64: 512, 16>}, {pipeline_mode = #tpu.pipeline_mode<synchronous>, transform_indices = @transform_9, window_bounds = array<i64: 16, 512>}, {pipeline_mode = #tpu.pipeline_mode<synchronous>, transform_indices = @transform_10, window_bounds = array<i64: 32, 32>}, {pipeline_mode = #tpu.pipeline_mode<synchronous>, transform_indices = @transform_11, window_bounds = array<i64: 1, 32>}, {transform_indices = @transform_12, window_bounds = array<i64: 256, 32>}]} {
    %c0 = arith.constant 0 : index
    %c0_0 = arith.constant 0 : index
    %0 = vector.load %arg4[%c0, %c0_0] : memref<256x128xbf16, #tpu.memory_space<vmem>>, vector<256x128xbf16>
    %c0_1 = arith.constant 0 : index
    %c0_2 = arith.constant 0 : index
    %1 = vector.load %arg5[%c0_1, %c0_2] : memref<128x512xbf16, #tpu.memory_space<vmem>>, vector<128x512xbf16>
    %cst = arith.constant dense<0.000000e+00> : vector<256x512xf32>
    %2 = tpu.matmul %0, %1, %cst {dimension_numbers = #tpu.dot_dimension_numbers<[1], [0], [0], [1], [0, 0, 1, 1], [], []>} : vector<256x128xbf16>, vector<128x512xbf16>, vector<256x512xf32> -> vector<256x512xf32>
    %c0_3 = arith.constant 0 : index
    %c0_4 = arith.constant 0 : index
    %3 = vector.load %arg6[%c0_3, %c0_4] : memref<1x512xf32, #tpu.memory_space<vmem>>, vector<1x512xf32>
    %4 = vector.broadcast %3 : vector<1x512xf32> to vector<256x512xf32>
    %5 = arith.addf %2, %4 : vector<256x512xf32>
    %cst_5 = arith.constant 0.000000e+00 : f32
    %6 = vector.broadcast %cst_5 : f32 to vector<256x512xf32>
    %7 = arith.maximumf %5, %6 : vector<256x512xf32>
    %8 = arith.truncf %7 : vector<256x512xf32> to vector<256x512xbf16>
    %c0_6 = arith.constant 0 : index
    %c0_7 = arith.constant 0 : index
    %9 = vector.load %arg7[%c0_6, %c0_7] : memref<512x512xbf16, #tpu.memory_space<vmem>>, vector<512x512xbf16>
    %cst_8 = arith.constant dense<0.000000e+00> : vector<256x512xf32>
    %10 = tpu.matmul %8, %9, %cst_8 {dimension_numbers = #tpu.dot_dimension_numbers<[1], [0], [0], [1], [0, 0, 1, 1], [], []>} : vector<256x512xbf16>, vector<512x512xbf16>, vector<256x512xf32> -> vector<256x512xf32>
    %c0_9 = arith.constant 0 : index
    %c0_10 = arith.constant 0 : index
    %11 = vector.load %arg8[%c0_9, %c0_10] : memref<1x512xf32, #tpu.memory_space<vmem>>, vector<1x512xf32>
    %12 = vector.broadcast %11 : vector<1x512xf32> to vector<256x512xf32>
    %13 = arith.addf %10, %12 : vector<256x512xf32>
    %c0_11 = arith.constant 0 : index
    %c0_12 = arith.constant 0 : index
    %14 = vector.load %arg9[%c0_11, %c0_12] : memref<512x16xbf16, #tpu.memory_space<vmem>>, vector<512x16xbf16>
    %cst_13 = arith.constant dense<0.000000e+00> : vector<256x16xf32>
    %15 = tpu.matmul %8, %14, %cst_13 {dimension_numbers = #tpu.dot_dimension_numbers<[1], [0], [0], [1], [0, 0, 1, 1], [], []>} : vector<256x512xbf16>, vector<512x16xbf16>, vector<256x16xf32> -> vector<256x16xf32>
    %c0_14 = arith.constant 0 : index
    %c0_15 = arith.constant 0 : index
    %16 = vector.load %arg3[%c0_14, %c0_15] : memref<256x16xf32, #tpu.memory_space<vmem>>, vector<256x16xf32>
    %17 = arith.addf %15, %16 : vector<256x16xf32>
    %cst_16 = arith.constant dense<0xFF800000> : vector<256xf32>
    %18 = vector.multi_reduction <maximumf>, %17, %cst_16 [1] : vector<256x16xf32> to vector<256xf32>
    %19 = vector.shape_cast %18 : vector<256xf32> to vector<256x1xf32>
    %20 = vector.broadcast %19 : vector<256x1xf32> to vector<256x16xf32>
    %21 = arith.subf %17, %20 : vector<256x16xf32>
    %22 = math.exp %21 : vector<256x16xf32>
    %cst_17 = arith.constant dense<0.000000e+00> : vector<256xf32>
    %23 = vector.multi_reduction <add>, %22, %cst_17 [1] : vector<256x16xf32> to vector<256xf32>
    %24 = vector.shape_cast %23 : vector<256xf32> to vector<256x1xf32>
    %25 = tpu.reciprocal %24 {approx = true} : vector<256x1xf32> -> vector<256x1xf32>
    %26 = vector.broadcast %25 : vector<256x1xf32> to vector<256x16xf32>
    %27 = arith.mulf %22, %26 : vector<256x16xf32>
    %c0_18 = arith.constant 0 : index
    %c0_19 = arith.constant 0 : index
    %28 = vector.load %arg2[%c0_18, %c0_19] : memref<256x512xbf16, #tpu.memory_space<vmem>>, vector<256x512xbf16>
    %29 = arith.extf %28 : vector<256x512xbf16> to vector<256x512xf32>
    %30 = arith.addf %13, %29 : vector<256x512xf32>
    %31 = arith.truncf %27 : vector<256x16xf32> to vector<256x16xbf16>
    %c0_20 = arith.constant 0 : index
    %c0_21 = arith.constant 0 : index
    %32 = vector.load %arg10[%c0_20, %c0_21] : memref<16x512xbf16, #tpu.memory_space<vmem>>, vector<16x512xbf16>
    %cst_22 = arith.constant dense<0.000000e+00> : vector<256x512xf32>
    %33 = tpu.matmul %31, %32, %cst_22 {dimension_numbers = #tpu.dot_dimension_numbers<[1], [0], [0], [1], [0, 0, 1, 1], [], []>} : vector<256x16xbf16>, vector<16x512xbf16>, vector<256x512xf32> -> vector<256x512xf32>
    %34 = arith.mulf %33, %30 : vector<256x512xf32>
    %35 = vector.extract_strided_slice %34 {offsets = [0, 0], sizes = [256, 128], strides = [1, 1]} : vector<256x512xf32> to vector<256x128xf32>
    %36 = vector.extract_strided_slice %34 {offsets = [0, 128], sizes = [256, 128], strides = [1, 1]} : vector<256x512xf32> to vector<256x128xf32>
    %37 = arith.addf %35, %36 : vector<256x128xf32>
    %38 = vector.extract_strided_slice %34 {offsets = [0, 256], sizes = [256, 128], strides = [1, 1]} : vector<256x512xf32> to vector<256x128xf32>
    %39 = arith.addf %37, %38 : vector<256x128xf32>
    %40 = vector.extract_strided_slice %34 {offsets = [0, 384], sizes = [256, 128], strides = [1, 1]} : vector<256x512xf32> to vector<256x128xf32>
    %41 = arith.addf %39, %40 : vector<256x128xf32>
    %c32_i32 = arith.constant 32 : i32
    %42 = tpu.dynamic_rotate %41 by %c32_i32 dim 1 : vector<256x128xf32>, i32 -> vector<256x128xf32>
    %43 = arith.addf %41, %42 : vector<256x128xf32>
    %c64_i32 = arith.constant 64 : i32
    %44 = tpu.dynamic_rotate %43 by %c64_i32 dim 1 : vector<256x128xf32>, i32 -> vector<256x128xf32>
    %45 = arith.addf %43, %44 : vector<256x128xf32>
    %46 = vector.extract_strided_slice %45 {offsets = [0, 0], sizes = [256, 32], strides = [1, 1]} : vector<256x128xf32> to vector<256x32xf32>
    %47 = arith.truncf %46 : vector<256x32xf32> to vector<256x32xbf16>
    %c0_23 = arith.constant 0 : index
    %c0_24 = arith.constant 0 : index
    %48 = vector.load %arg11[%c0_23, %c0_24] : memref<32x32xbf16, #tpu.memory_space<vmem>>, vector<32x32xbf16>
    %cst_25 = arith.constant dense<0.000000e+00> : vector<256x32xf32>
    %49 = tpu.matmul %47, %48, %cst_25 {dimension_numbers = #tpu.dot_dimension_numbers<[1], [0], [0], [1], [0, 0, 1, 1], [], []>} : vector<256x32xbf16>, vector<32x32xbf16>, vector<256x32xf32> -> vector<256x32xf32>
    %c0_26 = arith.constant 0 : index
    %c0_27 = arith.constant 0 : index
    %50 = vector.load %arg12[%c0_26, %c0_27] : memref<1x32xf32, #tpu.memory_space<vmem>>, vector<1x32xf32>
    %51 = vector.broadcast %50 : vector<1x32xf32> to vector<256x32xf32>
    %52 = arith.addf %49, %51 : vector<256x32xf32>
    %c0_28 = arith.constant 0 : index
    %c0_29 = arith.constant 0 : index
    %53 = vector.load %arg1[%c0_28, %c0_29] : memref<256x32xf32, #tpu.memory_space<vmem>>, vector<256x32xf32>
    %54 = arith.addf %53, %52 : vector<256x32xf32>
    %c0_30 = arith.constant 0 : index
    %c0_31 = arith.constant 0 : index
    %55 = vector.load %arg13[%c0_30, %c0_31] : memref<256x32xf32, #tpu.memory_space<vmem>>, vector<256x32xf32>
    tpu.vector_store %arg13[%c0_30, %c0_31], %54 {strides = array<i32>} : memref<256x32xf32, #tpu.memory_space<vmem>>, vector<256x32xf32>,
    return
  }
  func.func @transform_0(%arg0: i32) -> (i32, i32) {
    %c0_i32 = arith.constant 0 : i32
    %c0_i32_0 = arith.constant 0 : i32
    return %arg0, %c0_i32 : i32, i32
  }
  func.func @transform_1(%arg0: i32) -> (i32, i32) {
    %c0_i32 = arith.constant 0 : i32
    %c0_i32_0 = arith.constant 0 : i32
    return %arg0, %c0_i32 : i32, i32
  }
  func.func @transform_2(%arg0: i32) -> (i32, i32) {
    %c0_i32 = arith.constant 0 : i32
    %c0_i32_0 = arith.constant 0 : i32
    return %arg0, %c0_i32 : i32, i32
  }
  func.func @transform_3(%arg0: i32) -> (i32, i32) {
    %c0_i32 = arith.constant 0 : i32
    %c0_i32_0 = arith.constant 0 : i32
    return %arg0, %c0_i32 : i32, i32
  }
  func.func @transform_4(%arg0: i32) -> (i32, i32) {
    %c0_i32 = arith.constant 0 : i32
    %c0_i32_0 = arith.constant 0 : i32
    %c0_i32_1 = arith.constant 0 : i32
    return %c0_i32, %c0_i32_0 : i32, i32
  }
  func.func @transform_5(%arg0: i32) -> (i32, i32) {
    %c0_i32 = arith.constant 0 : i32
    %c0_i32_0 = arith.constant 0 : i32
    %c0_i32_1 = arith.constant 0 : i32
    return %c0_i32, %c0_i32_0 : i32, i32
  }
  func.func @transform_6(%arg0: i32) -> (i32, i32) {
    %c0_i32 = arith.constant 0 : i32
    %c0_i32_0 = arith.constant 0 : i32
    %c0_i32_1 = arith.constant 0 : i32
    return %c0_i32, %c0_i32_0 : i32, i32
  }
  func.func @transform_7(%arg0: i32) -> (i32, i32) {
    %c0_i32 = arith.constant 0 : i32
    %c0_i32_0 = arith.constant 0 : i32
    %c0_i32_1 = arith.constant 0 : i32
    return %c0_i32, %c0_i32_0 : i32, i32
  }
  func.func @transform_8(%arg0: i32) -> (i32, i32) {
    %c0_i32 = arith.constant 0 : i32
    %c0_i32_0 = arith.constant 0 : i32
    %c0_i32_1 = arith.constant 0 : i32
    return %c0_i32, %c0_i32_0 : i32, i32
  }
  func.func @transform_9(%arg0: i32) -> (i32, i32) {
    %c0_i32 = arith.constant 0 : i32
    %c0_i32_0 = arith.constant 0 : i32
    %c0_i32_1 = arith.constant 0 : i32
    return %c0_i32, %c0_i32_0 : i32, i32
  }
  func.func @transform_10(%arg0: i32) -> (i32, i32) {
    %c0_i32 = arith.constant 0 : i32
    %c0_i32_0 = arith.constant 0 : i32
    %c0_i32_1 = arith.constant 0 : i32
    return %c0_i32, %c0_i32_0 : i32, i32
  }
  func.func @transform_11(%arg0: i32) -> (i32, i32) {
    %c0_i32 = arith.constant 0 : i32
    %c0_i32_0 = arith.constant 0 : i32
    %c0_i32_1 = arith.constant 0 : i32
    return %c0_i32, %c0_i32_0 : i32, i32
  }
  func.func @transform_12(%arg0: i32) -> (i32, i32) {
    %c0_i32 = arith.constant 0 : i32
    %c0_i32_0 = arith.constant 0 : i32
    return %arg0, %c0_i32 : i32, i32
  }
}

</mosaic_0001>

<bundles_post_ra>
// kernel: tpu_custom_call.1
= control target key start
LH: loop header
LB: loop body
LE: loop exit
PB: predicated region body
PF: predicated region fallthrough
CT: control target
= control target key end

     0   :  { %17 = vsyncpa [#allocation3], 0  ;;  %s9817_s0 = inlined_call_operand.vmem [shape: f32[512,32], index: 0, kind: input, shape index: {}]   ;;  %s9818_s1 = inlined_call_operand.vmem [shape: bf16[512,512], index: 1, kind: input, shape index: {}]   ;;  %s9819_s2 = inlined_call_operand.vmem [shape: f32[512,16], index: 2, kind: input, shape index: {}]   ;;  %s9820_s3 = inlined_call_operand.vmem [shape: bf16[512,128], index: 3, kind: input, shape index: {}]   ;;  %s9821_s4 = inlined_call_operand.hbm [shape: bf16[128,512], index: 4, kind: input, shape index: {}]   ;;  %s9822_s5 = inlined_call_operand.vmem [shape: f32[1,512], index: 5, kind: input, shape index: {}]   ;;  %s9823_s6 = inlined_call_operand.hbm [shape: bf16[512,512], index: 6, kind: input, shape index: {}]   ;;  %s9824_s7 = inlined_call_operand.vmem [shape: f32[1,512], index: 7, kind: input, shape index: {}]   ;;  %s9825_s8 = inlined_call_operand.vmem [shape: bf16[512,16], index: 8, kind: input, shape index: {}]   ;;  %s9826_s9 = inlined_call_operand.vmem [shape: bf16[16,512], index: 9, kind: input, shape index: {}]   ;;  %s9827_s10 = inlined_call_operand.vmem [shape: bf16[32,32], index: 10, kind: input, shape index: {}]   ;;  %s9828_s11 = inlined_call_operand.vmem [shape: f32[1,32], index: 11, kind: input, shape index: {}]   ;;  %s9829_s12 = inlined_call_operand.vmem [shape: f32[512,32], index: 12, kind: output, shape index: {}]  }
   0x1   :  { %18 = vsyncpa [#allocation5], 0  ;;  %s7069_s21 = smov 0  }
   0x2 LB: > { %s5631_s22 = sadd.s32 4294967295, %s6995_s21   ;;  %p5633_p0 = scmp.ge.s32.totalorder %s6995_s21, 1  ;;  %s6995_s21 = sphi %s7069_s21, %s24_s21  }
   0x3   : > { %p327_p1 = scmp.lt.s32.totalorder %s6995_s21, 3  ;;  %s6997_s23 = smov [#allocation2]  }
   0x4   : > { %s339_s24 = sshll.u32 %s6997_s23, 4  ;;  %p7083_p3 = scmp.eq.s32.totalorder %s5631_s22, 0  ;;  %s340_s24 = int_to_ptr.vmem [resolvable:$true] %s339_s24 }
   0x5   : > { %p7077_p2 = pnand %p5633_p0, %p327_p1  ;;  %s6998_s27 = smov [#allocation4]  }
   0x6   : > { %s9868_s26 = scalar_select %p7083_p3, 1, 0 }
   0x7   : > { %s9867_s25 = scalar_select %p7077_p2, 1, 0 }
   0x8   : > { %p6475_p4 = pneg %p7077_p2  ;;  %s355_s28 = sshll.u32 %s6998_s27, 4  ;;  %s7095_s28 = int_to_ptr.vmem [resolvable:$true] %s355_s28 }
   0x9   : > { %s6925_s14 = scalar_lea.hbm %s9821_s4, 4096 }
   0xa   : > { %p7091_p5 = pnand %p7083_p3, %p6475_p4  ;;  %p6926_p6 = scmp.ne.s32.totalorder %s9821_s4, %s6925_s14 }
   0xb   : > { %p6932_p10 = scmp.lt.u32.totalorder %s6925_s14, %s9821_s4 }
   0xc   : > { %p6927_p7 = pneg %p7091_p5 }
   0xe   : > { %p6928_p8 = pnand %p6927_p7, %p6926_p6 }
  0x10   : > { %p6929_p9 = pneg %p6928_p8 }
  0x12   : > { %p6934_p11 = pnand %p6932_p10, %p6929_p9 }
  0x14   : > { %6937 = shalt.err (!%p6934_p11)
}
  0x15   : > { %s6938_s19 = scalar_lea.vmem %s340_s24, 4096  ;;  %p6946_p1 = scmp.lt.s32.totalorder %s340_s24, %s340_s24 }
  0x16   : > { %p6939_p12 = scmp.ne.s32.totalorder %s340_s24, %s6938_s19  ;;  %p6947_p4 = scmp.lt.s32.totalorder %s6938_s19, %s6938_s19 }
  0x18   : > { %p6941_p13 = pnand %p6939_p12, %p6927_p7  ;;  %p6948_p3 = por %p6947_p4, %p6946_p1 }
  0x1a   : > { %p6942_p0 = pneg %p6941_p13 }
  0x1c   : > { %p6949_p2 = pnand %p6948_p3, %p6942_p0 }
  0x1e   : > { %6952 = shalt.err (!%p6949_p2)
}
  0x1f   : > { %s6999_s20 = smov 256   ;;  %s7000_s23 = smov 16  }
  0x20   : > { %6478 = dma.hbm_to_vmem [thread:$0]  (!%p7091_p5), %s9821_s4, 4096, %s340_s24, [#allocation3], %s6999_s20, %s6999_s20, %s7000_s23  }
  0x21   : > { %s6953_s15 = scalar_lea.hbm %s9823_s6, 16384 }
  0x22   : > { %p6954_p6 = scmp.ne.s32.totalorder %s9823_s6, %s6953_s15  ;;  %p6960_p8 = scmp.lt.u32.totalorder %s6953_s15, %s9823_s6 }
  0x24   : > { %p6956_p2 = pnand %p6954_p6, %p6927_p7 }
  0x26   : > { %p6957_p3 = pneg %p6956_p2 }
  0x28   : > { %p6962_p9 = pnand %p6960_p8, %p6957_p3 }
  0x2a   : > { %6965 = shalt.err (!%p6962_p9)
}
  0x2b   : > { %s6966_s24 = scalar_lea.vmem %s7095_s28, 16384  ;;  %p6974_p13 = scmp.lt.s32.totalorder %s7095_s28, %s7095_s28 }
  0x2c   : > { %p6967_p10 = scmp.ne.s32.totalorder %s7095_s28, %s6966_s24  ;;  %p6975_p0 = scmp.lt.s32.totalorder %s6966_s24, %s6966_s24 }
  0x2e   : > { %p6969_p11 = pnand %p6967_p10, %p6927_p7  ;;  %p6976_p1 = por %p6975_p0, %p6974_p13 }
  0x30   : > { %p6970_p12 = pneg %p6969_p11 }
  0x32   : > { %p6977_p4 = pnand %p6976_p1, %p6970_p12 }
  0x34   : > { %6980 = shalt.err (!%p6977_p4)
}
  0x35   : > { %6481 = dma.hbm_to_vmem [thread:$0]  (!%p7091_p5), %s9823_s6, 16384, %s7095_s28, [#allocation5], %s6999_s20, %s6999_s20, %s7000_s23  }
  0x36   : > { %p9870_p6 = scmp.ne.s32.totalorder %s9867_s25, 0 }
  0x38   : > { %423 = sbr.rel (%p9870_p6) target bundleno = 1987 (0x7c3), region = 68 }
  0x3f   : > { %p9871_p2 = scmp.ne.s32.totalorder %s9868_s26, 0 }
  0x41   : > { %6986 = dma.done.wait (%p9871_p2), [#allocation3], 4096  }
  0x42   : > { %6988 = vsyncadd (%p9871_p2), [#allocation3], 4294963200 }
  0x43   : > { %6990 = dma.done.wait (%p9871_p2), [#allocation5], 16384  }
  0x44   : > { %6992 = vsyncadd (%p9871_p2), [#allocation5], 4294950912  ;;  %v9837_v0 = vmov 0   ;;  %s5640_s25 = sshll.u32 %s5631_s22, 5  ;;  %v6501_v1 = vld [vmem:[#allocation2 + $0x4] ss:$16 sps:$4 sm:$0xff]  }
  0x45   : > { %891 = vmatprep.mubr.bf16.mxu0 %v9837_v0  ;;  %1011 = vmatprep.mubr.bf16.mxu1 %v9837_v0  ;;  %p486_p5 = scmp.lt.s32.totalorder %s5640_s25, 63  ;;  %v6503_v2 = vld [vmem:[#allocation2] ss:$16 sps:$4 sm:$0xff]   ;;  %v6504_v3 = vld [vmem:[#allocation2 + $0x24] ss:$16 sps:$4 sm:$0xff]   ;;  %vm3609_vm0 = vcmask 130048  }
  0x46   : > { %859 = vmatprep.subr.bf16.mxu0 %v6501_v1  ;;  %6195 = vmatprep.subr.bf16.mxu1 %v6501_v1  ;;  %v6506_v4 = vld [vmem:[#allocation2 + $0x20] ss:$16 sps:$4 sm:$0xff]   ;;  %v6507_v5 = vld [vmem:[#allocation2 + $0x44] ss:$16 sps:$4 sm:$0xff]   ;;  %v6536_v17 = vld [vmem:[#allocation2 + $0xc] ss:$16 sps:$4 sm:$0xff]  }
  0x47   : > { %s10257_s25 = smov (!%p486_p5, %s5640_s25), 63  ;;  %860 = vmatpush1.bf16.msra.mxu0 %v6503_v2  ;;  %6203 = vmatpush1.bf16.msra.mxu1 %v6503_v2  ;;  %v6509_v6 = vld [vmem:[#allocation2 + $0x40] ss:$16 sps:$4 sm:$0xff]   ;;  %v6510_v7 = vld [vmem:[#allocation2 + $0x64] ss:$16 sps:$4 sm:$0xff]   ;;  %s7002_s15 = smov 32  }
  0x48   : > { %861 = vmatprep.subr.bf16.mxu0 %v6504_v3  ;;  %6196 = vmatprep.subr.bf16.mxu1 %v6504_v3  ;;  %s5648_s26 = sshll.u32 %s10257_s25, 2  ;;  %v6512_v8 = vld [vmem:[#allocation2 + $0x60] ss:$16 sps:$4 sm:$0xff]   ;;  %v6513_v9 = vld [vmem:[#allocation2 + $0x84] ss:$16 sps:$4 sm:$0xff]   ;;  %s8098_s13 = sshll.u32 %s10257_s25, 3 }
  0x49   : > { %s7164_s29 = scalar_lea.vmem %s9820_s3, %s5648_s26  ;;  %v6515_v10 = vld [vmem:[#allocation2 + $0x80] ss:$16 sps:$4 sm:$0xff]   ;;  %v6516_v11 = vld [vmem:[#allocation2 + $0xa4] ss:$16 sps:$4 sm:$0xff]   ;;  %v6534_v20 = vld [vmem:[#allocation2 + $0x8] ss:$16 sps:$4 sm:$0xff]   ;;  %s8104_s16 = scalar_lea.vmem %s9819_s2, %s8098_s13 }
  0x4a   : > { %v6518_v12 = vld [vmem:[#allocation2 + $0xa0] ss:$16 sps:$4 sm:$0xff]   ;;  %v6519_v13 = vld [vmem:[#allocation2 + $0xc4] ss:$16 sps:$4 sm:$0xff]   ;;  %v6540_v21 = vld [vmem:[#allocation2 + $0x2c] ss:$16 sps:$4 sm:$0xff]   ;;  %s9673_s26 = scalar_lea.vmem %s9817_s0, %s8098_s13 }
  0x4b   : > { %862 = vmatpush1.bf16.msra.mxu0 %v6506_v4  ;;  %6204 = vmatpush1.bf16.msra.mxu1 %v6506_v4  ;;  %v6521_v14 = vld [vmem:[#allocation2 + $0xc0] ss:$16 sps:$4 sm:$0xff]   ;;  %v6522_v15 = vld [vmem:[#allocation2 + $0xe4] ss:$16 sps:$4 sm:$0xff]   ;;  %v6538_v22 = vld [vmem:[#allocation2 + $0x28] ss:$16 sps:$4 sm:$0xff]  }
  0x4c   : > { %863 = vmatprep.subr.bf16.mxu0 %v6507_v5  ;;  %6197 = vmatprep.subr.bf16.mxu1 %v6507_v5  ;;  %v6524_v16 = vld [vmem:[#allocation2 + $0xe0] ss:$16 sps:$4 sm:$0xff]   ;;  %v6544_v23 = vld [vmem:[#allocation2 + $0x4c] ss:$16 sps:$4 sm:$0xff]   ;;  %v6542_v26 = vld [vmem:[#allocation2 + $0x48] ss:$16 sps:$4 sm:$0xff]  }
  0x4d   : > { %v7167_v18 = vld [vmem:[%s7164_s29] sm:$0xff]   ;;  %v7177_v24 = vld [vmem:[%s7164_s29 + $0x8] sm:$0xff]   ;;  %v7187_v32 = vld [vmem:[%s7164_s29 + $0x10] sm:$0xff]   ;;  %s5916_s28 = sshll.u32 %s10257_s25, 4  ;;  %s7003_s24 = smov 64   ;;  %vm5211_vm1 = vcmask 261120  }
  0x4e   : > { %v7170_v19 = vld [vmem:[%s7164_s29 + $0x60] sm:$0xff]   ;;  %v7180_v25 = vld [vmem:[%s7164_s29 + $0x68] sm:$0xff]   ;;  %v7190_v33 = vld [vmem:[%s7164_s29 + $0x70] sm:$0xff]   ;;  %s8534_s23 = scalar_lea.vmem %s9818_s1, %s5916_s28 }
  0x4f   : > { %864 = vmatpush1.bf16.msra.mxu0 %v6509_v6  ;;  %6205 = vmatpush1.bf16.msra.mxu1 %v6509_v6  ;;  %v6548_v27 = vld [vmem:[#allocation2 + $0x6c] ss:$16 sps:$4 sm:$0xff]   ;;  %v6546_v28 = vld [vmem:[#allocation2 + $0x68] ss:$16 sps:$4 sm:$0xff]   ;;  %v6577_v29 = vld [vmem:[#allocation4] ss:$16 sps:$4 sm:$0xff]  }
  0x50   : > { %865 = vmatprep.subr.bf16.mxu0 %v6510_v7  ;;  %6198 = vmatprep.subr.bf16.mxu1 %v6510_v7  ;;  %v6579_v30 = vld [vmem:[#allocation4 + $0x4] ss:$16 sps:$4 sm:$0xff]   ;;  %v6552_v31 = vld [vmem:[#allocation2 + $0x8c] ss:$16 sps:$4 sm:$0xff]   ;;  %v6550_v35 = vld [vmem:[#allocation2 + $0x88] ss:$16 sps:$4 sm:$0xff]  }
  0x51   : > { %v6585_v34 = vld [vmem:[#allocation4 + $0x24] ss:$16 sps:$4 sm:$0xff]   ;;  %v6556_v36 = vld [vmem:[#allocation2 + $0xac] ss:$16 sps:$4 sm:$0xff]   ;;  %v6583_v37 = vld [vmem:[#allocation4 + $0x20] ss:$16 sps:$4 sm:$0xff]  }
  0x52   : > { %v6591_v38 = vld [vmem:[#allocation4 + $0x44] ss:$16 sps:$4 sm:$0xff]   ;;  %v6554_v39 = vld [vmem:[#allocation2 + $0xa8] ss:$16 sps:$4 sm:$0xff]   ;;  %v6560_v40 = vld [vmem:[#allocation2 + $0xcc] ss:$16 sps:$4 sm:$0xff]  }
  0x53   : > { %866 = vmatpush1.bf16.msra.mxu0 %v6512_v8  ;;  %6206 = vmatpush1.bf16.msra.mxu1 %v6512_v8  ;;  %v6589_v41 = vld [vmem:[#allocation4 + $0x40] ss:$16 sps:$4 sm:$0xff]   ;;  %v7197_v42 = vld [vmem:[%s7164_s29 + $0x18] sm:$0xff]   ;;  %v6594_v46 = vld [vmem:[#allocation4 + $0x64] ss:$16 sps:$4 sm:$0xff]  }
  0x54   : > { %867 = vmatprep.subr.bf16.mxu0 %v6513_v9  ;;  %6199 = vmatprep.subr.bf16.mxu1 %v6513_v9  ;;  %v7200_v43 = vld [vmem:[%s7164_s29 + $0x78] sm:$0xff]   ;;  %v6592_v47 = vld [vmem:[#allocation4 + $0x60] ss:$16 sps:$4 sm:$0xff]   ;;  %v6600_v49 = vld [vmem:[#allocation4 + $0x84] ss:$16 sps:$4 sm:$0xff]  }
  0x55   : > { %v6558_v44 = vld [vmem:[#allocation2 + $0xc8] ss:$16 sps:$4 sm:$0xff]   ;;  %v6564_v45 = vld [vmem:[#allocation2 + $0xec] ss:$16 sps:$4 sm:$0xff]   ;;  %v7207_v51 = vld [vmem:[%s7164_s29 + $0x20] sm:$0xff]  }
  0x56   : > { %v6562_v48 = vld [vmem:[#allocation2 + $0xe8] ss:$16 sps:$4 sm:$0xff]   ;;  %v6567_v50 = vld [vmem:[#allocation4 + $0xc] ss:$16 sps:$4 sm:$0xff]   ;;  %v6598_v54 = vld [vmem:[#allocation4 + $0x80] ss:$16 sps:$4 sm:$0xff]  }
  0x57   : > { %868 = vmatpush1.bf16.msra.mxu0 %v6515_v10  ;;  %6207 = vmatpush1.bf16.msra.mxu1 %v6515_v10  ;;  %v6565_v52 = vld [vmem:[#allocation4 + $0x8] ss:$16 sps:$4 sm:$0xff]   ;;  %v6570_v53 = vld [vmem:[#allocation4 + $0x2c] ss:$16 sps:$4 sm:$0xff]   ;;  %v6606_v55 = vld [vmem:[#allocation4 + $0xa4] ss:$16 sps:$4 sm:$0xff]  }
  0x58   : > { %869 = vmatprep.subr.bf16.mxu0 %v6516_v11  ;;  %6200 = vmatprep.subr.bf16.mxu1 %v6516_v11  ;;  %v6568_v56 = vld [vmem:[#allocation4 + $0x28] ss:$16 sps:$4 sm:$0xff]   ;;  %v6573_v57 = vld [vmem:[#allocation4 + $0x4c] ss:$16 sps:$4 sm:$0xff]   ;;  %v6604_v58 = vld [vmem:[#allocation4 + $0xa0] ss:$16 sps:$4 sm:$0xff]  }
  0x59   : > { %v7214_v59 = vld [vmem:[%s7164_s29 + $0x28] sm:$0xff]   ;;  %v6612_v62 = vld [vmem:[#allocation4 + $0xc4] ss:$16 sps:$4 sm:$0xff]   ;;  %v6610_v63 = vld [vmem:[#allocation4 + $0xc0] ss:$16 sps:$4 sm:$0xff]  }
  0x5a   : > { %v6571_v60 = vld [vmem:[#allocation4 + $0x48] ss:$16 sps:$4 sm:$0xff]   ;;  %v6576_v61 = vld [vmem:[#allocation4 + $0x6c] ss:$16 sps:$4 sm:$0xff]   ;;  %v6615_v1 = vld [vmem:[#allocation4 + $0xe4] ss:$16 sps:$4 sm:$0xff]  }
  0x5b   : > { %870 = vmatpush1.bf16.msra.mxu0 %v6518_v12  ;;  %6208 = vmatpush1.bf16.msra.mxu1 %v6518_v12  ;;  %v7221_v2 = vld [vmem:[%s7164_s29 + $0x30] sm:$0xff]   ;;  %v6574_v3 = vld [vmem:[#allocation4 + $0x68] ss:$16 sps:$4 sm:$0xff]   ;;  %v6582_v4 = vld [vmem:[#allocation4 + $0x8c] ss:$16 sps:$4 sm:$0xff]  }
  0x5c   : > { %871 = vmatprep.subr.bf16.mxu0 %v6519_v13  ;;  %6201 = vmatprep.subr.bf16.mxu1 %v6519_v13  ;;  %v6613_v5 = vld [vmem:[#allocation4 + $0xe0] ss:$16 sps:$4 sm:$0xff]   ;;  %v6580_v6 = vld [vmem:[#allocation4 + $0x88] ss:$16 sps:$4 sm:$0xff]   ;;  %v6621_v7 = vld [vmem:[#allocation4 + $0x104] ss:$16 sps:$4 sm:$0xff]  }
  0x5d   : > { %v6588_v8 = vld [vmem:[#allocation4 + $0xac] ss:$16 sps:$4 sm:$0xff]   ;;  %v6619_v9 = vld [vmem:[#allocation4 + $0x100] ss:$16 sps:$4 sm:$0xff]   ;;  %v6627_v10 = vld [vmem:[#allocation4 + $0x124] ss:$16 sps:$4 sm:$0xff]  }
  0x5e   : > { %v6586_v11 = vld [vmem:[#allocation4 + $0xa8] ss:$16 sps:$4 sm:$0xff]   ;;  %v6597_v12 = vld [vmem:[#allocation4 + $0xcc] ss:$16 sps:$4 sm:$0xff]   ;;  %v6625_v13 = vld [vmem:[#allocation4 + $0x120] ss:$16 sps:$4 sm:$0xff]  }
  0x5f   : > { %872 = vmatpush1.bf16.msra.mxu0 %v6521_v14  ;;  %6209 = vmatpush1.bf16.msra.mxu1 %v6521_v14  ;;  %v7228_v14 = vld [vmem:[%s7164_s29 + $0x38] sm:$0xff]  }
  0x60   : > { %873 = vmatprep.subr.bf16.mxu0 %v6522_v15  ;;  %6202 = vmatprep.subr.bf16.mxu1 %v6522_v15  ;;  %v6595_v15 = vld [vmem:[#allocation4 + $0xc8] ss:$16 sps:$4 sm:$0xff]  }
  0x63   : > { %874 = vmatpush1.bf16.msra.mxu0 %v6524_v16  ;;  %6210 = vmatpush1.bf16.msra.mxu1 %v6524_v16  ;;  %v6633_v16 = vld [vmem:[#allocation4 + $0x144] ss:$16 sps:$4 sm:$0xff]  }
  0x64   : > { %1052 = vmatprep.subr.bf16.mxu1 %v6536_v17  ;;  %2227 = vmatprep.subr.bf16.mxu0 %v6579_v30  ;;  %v6603_v17 = vld [vmem:[#allocation4 + $0xec] ss:$16 sps:$4 sm:$0xff]   ;;  %v6648_v30 = vld [vmem:[#allocation4 + $0x1a4] ss:$16 sps:$4 sm:$0xff]  }
  0x66   : > { %892 = vmatmul.mubr.bf16.vlgmr.msra.gmra.mrb[0].mxu0 %v7167_v18  ;;  %1012 = vmatmul.mubr.bf16.vlgmr.msra.gmra.mrb[0].mxu1 %v7170_v19 }
  0x67   : > { %901 = vmatprep.mubr.bf16.mxu0 %v9837_v0  ;;  %1053 = vmatpush1.bf16.msra.mxu1 %v6534_v20  ;;  %v6636_v20 = vld [vmem:[#allocation4 + $0x164] ss:$16 sps:$4 sm:$0xff]  }
  0x68   : > { %1054 = vmatprep.subr.bf16.mxu1 %v6540_v21  ;;  %1021 = vmatprep.mubr.bf16.mxu1 %v9837_v0  ;;  %v6601_v21 = vld [vmem:[#allocation4 + $0xe8] ss:$16 sps:$4 sm:$0xff]  }
  0x69   : > { %2228 = vmatpush1.bf16.msra.mxu0 %v6577_v29  ;;  %v6640_v29 = vld [vmem:[#allocation4 + $0x180] ss:$16 sps:$4 sm:$0xff]  }
  0x6a   : > { %2229 = vmatprep.subr.bf16.mxu0 %v6585_v34  ;;  %v6646_v34 = vld [vmem:[#allocation4 + $0x1a0] ss:$16 sps:$4 sm:$0xff]  }
  0x6b   : > { %1055 = vmatpush1.bf16.msra.mxu1 %v6538_v22  ;;  %v6609_v22 = vld [vmem:[#allocation4 + $0x10c] ss:$16 sps:$4 sm:$0xff]  }
  0x6c   : > { %1056 = vmatprep.subr.bf16.mxu1 %v6544_v23  ;;  %v6634_v23 = vld [vmem:[#allocation4 + $0x160] ss:$16 sps:$4 sm:$0xff]  }
  0x6d   : > { %2230 = vmatpush1.bf16.msra.mxu0 %v6583_v37  ;;  %v6654_v37 = vld [vmem:[#allocation4 + $0x1c4] ss:$16 sps:$4 sm:$0xff]  }
  0x6e   : > { %902 = vmatmul.mubr.bf16.gmra.mrb[4].mxu0 %v7177_v24  ;;  %1022 = vmatmul.mubr.bf16.gmra.mrb[4].mxu1 %v7180_v25 }
  0x6f   : > { %911 = vmatprep.mubr.bf16.mxu0 %v9837_v0  ;;  %1057 = vmatpush1.bf16.msra.mxu1 %v6542_v26  ;;  %v6607_v26 = vld [vmem:[#allocation4 + $0x108] ss:$16 sps:$4 sm:$0xff]  }
  0x70   : > { %1058 = vmatprep.subr.bf16.mxu1 %v6548_v27  ;;  %1031 = vmatprep.mubr.bf16.mxu1 %v9837_v0  ;;  %v6642_v27 = vld [vmem:[#allocation4 + $0x184] ss:$16 sps:$4 sm:$0xff]  }
  0x71   : > { %2231 = vmatprep.subr.bf16.mxu0 %v6591_v38  ;;  %v6630_v38 = vld [vmem:[#allocation4 + $0x16c] ss:$16 sps:$4 sm:$0xff]  }
  0x72   : > { %2232 = vmatpush1.bf16.msra.mxu0 %v6589_v41  ;;  %v6639_v41 = vld [vmem:[#allocation4 + $0x18c] ss:$16 sps:$4 sm:$0xff]  }
  0x73   : > { %1059 = vmatpush1.bf16.msra.mxu1 %v6546_v28  ;;  %2233 = vmatprep.subr.bf16.mxu0 %v6594_v46  ;;  %v6618_v28 = vld [vmem:[#allocation4 + $0x12c] ss:$16 sps:$4 sm:$0xff]   ;;  %v6643_v46 = vld [vmem:[#allocation4 + $0x1a8] ss:$16 sps:$4 sm:$0xff]  }
  0x74   : > { %1060 = vmatprep.subr.bf16.mxu1 %v6552_v31  ;;  %v6616_v31 = vld [vmem:[#allocation4 + $0x128] ss:$16 sps:$4 sm:$0xff]  }
  0x76   : > { %912 = vmatmul.mubr.bf16.gmra.mrb[8].mxu0 %v7187_v32  ;;  %1032 = vmatmul.mubr.bf16.gmra.mrb[8].mxu1 %v7190_v33 }
  0x77   : > { %921 = vmatprep.mubr.bf16.mxu0 %v9837_v0  ;;  %1061 = vmatpush1.bf16.msra.mxu1 %v6550_v35  ;;  %v6545_v35 = vld [vmem:[%s7164_s29 + $0x48] sm:$0xff]  }
  0x78   : > { %1062 = vmatprep.subr.bf16.mxu1 %v6556_v36  ;;  %1041 = vmatprep.mubr.bf16.mxu1 %v9837_v0  ;;  %v6622_v36 = vld [vmem:[#allocation4 + $0x148] ss:$16 sps:$4 sm:$0xff]  }
  0x79   : > { %2234 = vmatpush1.bf16.msra.mxu0 %v6592_v47  ;;  %v6651_v47 = vld [vmem:[#allocation4 + $0x1cc] ss:$16 sps:$4 sm:$0xff]  }
  0x7a   : > { %2235 = vmatprep.subr.bf16.mxu0 %v6600_v49  ;;  %v6649_v49 = vld [vmem:[#allocation4 + $0x1c8] ss:$16 sps:$4 sm:$0xff]  }
  0x7b   : > { %1063 = vmatpush1.bf16.msra.mxu1 %v6554_v39  ;;  %v6652_v39 = vld [vmem:[#allocation4 + $0x1c0] ss:$16 sps:$4 sm:$0xff]  }
  0x7c   : > { %1064 = vmatprep.subr.bf16.mxu1 %v6560_v40  ;;  %v6628_v40 = vld [vmem:[#allocation4 + $0x168] ss:$16 sps:$4 sm:$0xff]  }
  0x7d   : > { %2236 = vmatpush1.bf16.msra.mxu0 %v6598_v54  ;;  %v6663_v54 = vld [vmem:[#allocation4 + $0x204] ss:$16 sps:$4 sm:$0xff]  }
  0x7e   : > { %922 = vmatmul.mubr.bf16.gmra.mrb[12].mxu0 %v7197_v42  ;;  %1042 = vmatmul.mubr.bf16.gmra.mrb[12].mxu1 %v7200_v43 }
  0x7f   : > { %931 = vmatprep.mubr.bf16.mxu0 %v9837_v0  ;;  %1065 = vmatpush1.bf16.msra.mxu1 %v6558_v44  ;;  %v6637_v44 = vld [vmem:[#allocation4 + $0x188] ss:$16 sps:$4 sm:$0xff]  }
  0x80   : > { %1066 = vmatprep.subr.bf16.mxu1 %v6564_v45  ;;  %1084 = vmatprep.mubr.bf16.mxu1 %v9837_v0  ;;  %v6645_v45 = vld [vmem:[#allocation4 + $0x1ac] ss:$16 sps:$4 sm:$0xff]  }
  0x81   : > { %2237 = vmatprep.subr.bf16.mxu0 %v6606_v55  ;;  %v6666_v55 = vld [vmem:[#allocation4 + $0x20c] ss:$16 sps:$4 sm:$0xff]  }
  0x82   : > { %2238 = vmatpush1.bf16.msra.mxu0 %v6604_v58 }
  0x83   : > { %1067 = vmatpush1.bf16.msra.mxu1 %v6562_v48  ;;  %2239 = vmatprep.subr.bf16.mxu0 %v6612_v62  ;;  %v6561_v48 = vld [vmem:[%s7164_s29 + $0x58] sm:$0xff]  }
  0x84   : > { %2613 = vmatprep.subr.bf16.mxu1 %v6567_v50  ;;  %v6657_v50 = vld [vmem:[#allocation4 + $0x1e4] ss:$16 sps:$4 sm:$0xff]  }
  0x86   : > { %932 = vmatmul.mubr.bf16.gmra.mrb[16].mxu0 %v7207_v51  ;;  %1085 = vmatmul.mubr.bf16.vlgmr.msra.gmra.mrb[16].mxu1 %v7167_v18  ;;  %v6631_v18 = vld [vmem:[#allocation4 + $0x140] ss:$16 sps:$4 sm:$0xff]  }
  0x87   : > { %941 = vmatprep.mubr.bf16.mxu0 %v9837_v0  ;;  %2614 = vmatpush1.bf16.msra.mxu1 %v6565_v52  ;;  %v6655_v52 = vld [vmem:[#allocation4 + $0x1e0] ss:$16 sps:$4 sm:$0xff]  }
  0x88   : > { %1094 = vmatprep.mubr.bf16.mxu1 %v9837_v0  ;;  %2615 = vmatprep.subr.bf16.mxu1 %v6570_v53  ;;  %v6658_v53 = vld [vmem:[#allocation4 + $0x1e8] ss:$16 sps:$4 sm:$0xff]  }
  0x89   : > { %2240 = vmatpush1.bf16.msra.mxu0 %v6610_v63 }
  0x8a   : > { %2241 = vmatprep.subr.bf16.mxu0 %v6615_v1 }
  0x8b   : > { %2616 = vmatpush1.bf16.msra.mxu1 %v6568_v56  ;;  %v583_v56 = vlaneseq }
  0x8c   : > { %2617 = vmatprep.subr.bf16.mxu1 %v6573_v57 }
  0x8d   : > { %2242 = vmatpush1.bf16.msra.mxu0 %v6613_v5  ;;  %v7264_v57 = vshrl.u32 %v583_v56, 7 }
  0x8e   : > { %942 = vmatmul.mubr.bf16.gmra.mrb[20].mxu0 %v7214_v59  ;;  %1095 = vmatmul.mubr.bf16.gmra.mrb[20].mxu1 %v7177_v24  ;;  %v7235_v24 = vld [vmem:[%s7164_s29 + $0x40] sm:$0xff]  }
  0x8f   : > { %951 = vmatprep.mubr.bf16.mxu0 %v9837_v0  ;;  %1104 = vmatprep.mubr.bf16.mxu1 %v9837_v0  ;;  %9872 = vst [vmem:[#allocation8_spill] sm:$0xff] %v7264_v57  ;;  %v9836_v58 = vsub.s32 0, %v7264_v57 }
  0x90   : > { %2618 = vmatpush1.bf16.msra.mxu1 %v6571_v60  ;;  %2243 = vmatprep.subr.bf16.mxu0 %v6621_v7 }
  0x91   : > { %2619 = vmatprep.subr.bf16.mxu1 %v6576_v61  ;;  %2244 = vmatpush1.bf16.msra.mxu0 %v6619_v9 }
  0x92   : > { %2245 = vmatprep.subr.bf16.mxu0 %v6627_v10 }
  0x94   : > { %2620 = vmatpush1.bf16.msra.mxu1 %v6574_v3 }
  0x95   : > { %2621 = vmatprep.subr.bf16.mxu1 %v6582_v4  ;;  %2246 = vmatpush1.bf16.msra.mxu0 %v6625_v13 }
  0x96   : > { %952 = vmatmul.mubr.bf16.gmra.mrb[24].mxu0 %v7221_v2  ;;  %1105 = vmatmul.mubr.bf16.gmra.mrb[24].mxu1 %v7187_v32  ;;  %v6624_v32 = vld [vmem:[#allocation4 + $0x14c] ss:$16 sps:$4 sm:$0xff]  }
  0x97   : > { %961 = vmatprep.mubr.bf16.mxu0 %v9837_v0  ;;  %1114 = vmatprep.mubr.bf16.mxu1 %v9837_v0 }
  0x98   : > { %2622 = vmatpush1.bf16.msra.mxu1 %v6580_v6  ;;  %2247 = vmatprep.subr.bf16.mxu0 %v6633_v16 }
  0x99   : > { %2623 = vmatprep.subr.bf16.mxu1 %v6588_v8  ;;  %2248 = vmatpush1.bf16.msra.mxu0 %v6631_v18 }
  0x9a   : > { %2249 = vmatprep.subr.bf16.mxu0 %v6636_v20 }
  0x9c   : > { %2624 = vmatpush1.bf16.msra.mxu1 %v6586_v11 }
  0x9d   : > { %2625 = vmatprep.subr.bf16.mxu1 %v6597_v12  ;;  %2250 = vmatpush1.bf16.msra.mxu0 %v6634_v23 }
  0x9e   : > { %962 = vmatmul.mubr.bf16.gmra.mrb[28].mxu0 %v7228_v14  ;;  %1115 = vmatmul.mubr.bf16.gmra.mrb[28].mxu1 %v7197_v42  ;;  %v6553_v42 = vld [vmem:[%s7164_s29 + $0x50] sm:$0xff]  }
  0x9f   : > { %971 = vmatprep.mubr.bf16.mxu0 %v9837_v0  ;;  %1124 = vmatprep.mubr.bf16.mxu1 %v9837_v0 }
  0xa0   : > { %2626 = vmatpush1.bf16.msra.mxu1 %v6595_v15  ;;  %2251 = vmatprep.subr.bf16.mxu0 %v6642_v27  ;;  %v6664_v27 = vld [vmem:[#allocation4 + $0x208] ss:$16 sps:$4 sm:$0xff]  }
  0xa1   : > { %2627 = vmatprep.subr.bf16.mxu1 %v6603_v17  ;;  %2252 = vmatpush1.bf16.msra.mxu0 %v6640_v29 }
  0xa2   : > { %2253 = vmatprep.subr.bf16.mxu0 %v6648_v30 }
  0xa4   : > { %2628 = vmatpush1.bf16.msra.mxu1 %v6601_v21 }
  0xa5   : > { %2629 = vmatprep.subr.bf16.mxu1 %v6609_v22  ;;  %2254 = vmatpush1.bf16.msra.mxu0 %v6646_v34  ;;  %v6672_v34 = vld [vmem:[#allocation4 + $0x22c] ss:$16 sps:$4 sm:$0xff]  }
  0xa6   : > { %972 = vmatmul.mubr.bf16.gmra.mrb[32].mxu0 %v7235_v24  ;;  %1125 = vmatmul.mubr.bf16.gmra.mrb[32].mxu1 %v7207_v51  ;;  %v6660_v51 = vld [vmem:[#allocation4 + $0x1ec] ss:$16 sps:$4 sm:$0xff]  }
  0xa7   : > { %981 = vmatprep.mubr.bf16.mxu0 %v9837_v0  ;;  %1134 = vmatprep.mubr.bf16.mxu1 %v9837_v0 }
  0xa8   : > { %2630 = vmatpush1.bf16.msra.mxu1 %v6607_v26  ;;  %2255 = vmatprep.subr.bf16.mxu0 %v6654_v37  ;;  %v6661_v26 = vld [vmem:[#allocation4 + $0x200] ss:$16 sps:$4 sm:$0xff]  }
  0xa9   : > { %2631 = vmatprep.subr.bf16.mxu1 %v6618_v28  ;;  %2256 = vmatpush1.bf16.msra.mxu0 %v6652_v39 }
  0xaa   : > { %2257 = vmatprep.subr.bf16.mxu0 %v6657_v50  ;;  %v6675_v50 = vld [vmem:[#allocation4 + $0x244] ss:$16 sps:$4 sm:$0xff]  }
  0xac   : > { %2632 = vmatpush1.bf16.msra.mxu1 %v6616_v31 }
  0xad   : > { %2633 = vmatprep.subr.bf16.mxu1 %v6624_v32  ;;  %2258 = vmatpush1.bf16.msra.mxu0 %v6655_v52  ;;  %v6669_v32 = vld [vmem:[#allocation4 + $0x224] ss:$16 sps:$4 sm:$0xff]  }
  0xae   : > { %982 = vmatmul.mubr.bf16.gmra.mrb[36].mxu0 %v6545_v35  ;;  %1135 = vmatmul.mubr.bf16.gmra.mrb[36].mxu1 %v7214_v59 }
  0xaf   : > { %991 = vmatprep.mubr.bf16.mxu0 %v9837_v0  ;;  %1144 = vmatprep.mubr.bf16.mxu1 %v9837_v0 }
  0xb0   : > { %2634 = vmatpush1.bf16.msra.mxu1 %v6622_v36  ;;  %2420 = vmatprep.subr.bf16.mxu0 %v6663_v54 }
  0xb1   : > { %2635 = vmatprep.subr.bf16.mxu1 %v6630_v38 }
  0xb4   : > { %2636 = vmatpush1.bf16.msra.mxu1 %v6628_v40 }
  0xb5   : > { %2637 = vmatprep.subr.bf16.mxu1 %v6639_v41 }
  0xb6   : > { %992 = vmatmul.mubr.bf16.gmra.mrb[40].mxu0 %v6553_v42  ;;  %1145 = vmatmul.mubr.bf16.gmra.mrb[40].mxu1 %v7221_v2 }
  0xb7   : > { %1001 = vmatprep.mubr.bf16.mxu0 %v9837_v0  ;;  %1154 = vmatprep.mubr.bf16.mxu1 %v9837_v0 }
  0xb8   : > { %2638 = vmatpush1.bf16.msra.mxu1 %v6637_v44  ;;  %v6667_v44 = vld [vmem:[#allocation4 + $0x220] ss:$16 sps:$4 sm:$0xff]  }
  0xb9   : > { %2639 = vmatprep.subr.bf16.mxu1 %v6645_v45 }
  0xbc   : > { %2640 = vmatpush1.bf16.msra.mxu1 %v6643_v46 }
  0xbd   : > { %2641 = vmatprep.subr.bf16.mxu1 %v6651_v47 }
  0xbe   : > { %1002 = vmatmul.mubr.bf16.gmra.mrb[44].mxu0 %v6561_v48  ;;  %1155 = vmatmul.mubr.bf16.gmra.mrb[44].mxu1 %v7228_v14 }
  0xbf   : > { %1164 = vmatprep.mubr.bf16.mxu1 %v9837_v0 }
  0xc0   : > { %2642 = vmatpush1.bf16.msra.mxu1 %v6649_v49  ;;  %v6670_v49 = vld [vmem:[#allocation4 + $0x228] ss:$16 sps:$4 sm:$0xff]  }
  0xc1   : > { %2643 = vmatprep.subr.bf16.mxu1 %v6660_v51 }
  0xc4   : > { %2644 = vmatpush1.bf16.msra.mxu1 %v6658_v53 }
  0xc5   : > { %2806 = vmatprep.subr.bf16.mxu1 %v6666_v55  ;;  %v6678_v55 = vld [vmem:[#allocation4 + $0x24c] ss:$16 sps:$4 sm:$0xff]  }
  0xc6   : > { %1165 = vmatmul.mubr.bf16.gmra.mrb[48].mxu1 %v7235_v24 }
  0xc7   : > { %1174 = vmatprep.mubr.bf16.mxu1 %v9837_v0 }
  0xce   : > { %1175 = vmatmul.mubr.bf16.gmra.mrb[52].mxu1 %v6545_v35 }
  0xcf   : > { %1184 = vmatprep.mubr.bf16.mxu1 %v9837_v0 }
  0xd6   : > { %1185 = vmatmul.mubr.bf16.gmra.mrb[56].mxu1 %v6553_v42 }
  0xd7   : > { %1194 = vmatprep.mubr.bf16.mxu1 %v9837_v0 }
  0xde   : > { %1195 = vmatmul.mubr.bf16.gmra.mrb[60].mxu1 %v6561_v48 }
  0xdf   : > { %1204 = vmatprep.mubr.bf16.mxu1 %v9837_v0 }
  0xe6   : > { %1205 = vmatmul.mubr.bf16.gmra.mrb[64].mxu1 %v7170_v19  ;;  %v7270_v19 = vld [vmem:[%s9822_s5] sm:$0xf] }
  0xe7   : > { %1214 = vmatprep.mubr.bf16.mxu1 %v9837_v0 }
  0xee   : > { %1215 = vmatmul.mubr.bf16.gmra.mrb[68].mxu1 %v7180_v25  ;;  %v9834_v25 = vsub.s32 1, %v7264_v57 }
  0xef   : > { %1224 = vmatprep.mubr.bf16.mxu1 %v9837_v0 }
  0xf6   : > { %1225 = vmatmul.mubr.bf16.gmra.mrb[72].mxu1 %v7190_v33  ;;  %v7276_v33 = vrot.slane %v7270_v19, %v9836_v58 }
  0xf7   : > { %1234 = vmatprep.mubr.bf16.mxu1 %v9837_v0 }
  0xfe   : > { %1235 = vmatmul.mubr.bf16.gmra.mrb[76].mxu1 %v7200_v43  ;;  %v7281_v43 = vrot.slane %v7270_v19, %v9834_v25 }
 0x139   : > { %v893_v59 = vpop.f32.mrb[0].mxu0  ;;  %v1013_v60 = vpop.f32.mrb[0].mxu1 }
 0x13a   : > { %v894_v61 = vadd.f32 %v893_v59, %v7276_v33  ;;  %v895_v62 = vpop.f32.mrb[1].mxu0  ;;  %v1014_v63 = vadd.f32 %v1013_v60, %v7276_v33  ;;  %v1015_v1 = vpop.f32.mrb[1].mxu1 }
 0x13b   : > { %v896_v2 = vadd.f32 %v895_v62, %v7281_v43  ;;  %v897_v3 = vpop.f32.mrb[2].mxu0  ;;  %v1016_v4 = vadd.f32 %v1015_v1, %v7281_v43  ;;  %v1017_v5 = vpop.f32.mrb[2].mxu1 }
 0x13c   : > { %v898_v6 = vadd.f32 %v897_v3, %v7276_v33  ;;  %v899_v7 = vpop.f32.mrb[3].mxu0  ;;  %v1341_v8 = vmax.f32 %v1014_v63, 0.0  ;;  %v1018_v9 = vadd.f32 %v1017_v5, %v7276_v33  ;;  %v1019_v10 = vpop.f32.mrb[3].mxu1  ;;  %v1245_v14 = vmax.f32 %v894_v61, 0.0  ;;  %v6673_v3 = vld [vmem:[#allocation4 + $0x240] ss:$16 sps:$4 sm:$0xff]  }
 0x13d   : > { %v900_v11 = vadd.f32 %v899_v7, %v7281_v43  ;;  %v1342_v12 = vmax.f32 %v1016_v4, 0.0  ;;  %v1020_v13 = vadd.f32 %v1019_v10, %v7281_v43  ;;  %v1246_v17 = vmax.f32 %v896_v2, 0.0  ;;  %v6676_v4 = vld [vmem:[#allocation4 + $0x248] ss:$16 sps:$4 sm:$0xff]   ;;  %v6684_v10 = vld [vmem:[#allocation4 + $0x26c] ss:$16 sps:$4 sm:$0xff]  }
 0x13e   : > { %v1249_v15 = vmax.f32 %v898_v6, 0.0  ;;  %v1345_v16 = vmax.f32 %v1018_v9, 0.0  ;;  %v6681_v9 = vld [vmem:[#allocation4 + $0x264] ss:$16 sps:$4 sm:$0xff]  }
 0x13f   : > { %v1250_v18 = vmax.f32 %v900_v11, 0.0  ;;  %v1346_v20 = vmax.f32 %v1020_v13, 0.0 }
 0x140   : > { %v7291_v21 = vpack.c.bf16 %v1249_v15, %v1245_v14  ;;  %v7293_v22 = vpack.c.bf16 %v1345_v16, %v1341_v8 }
 0x141   : > { %v903_v23 = vpop.f32.mrb[4].mxu0  ;;  %v7295_v24 = vpack.c.bf16 %v1250_v18, %v1246_v17  ;;  %v1023_v28 = vpop.f32.mrb[4].mxu1  ;;  %v7297_v29 = vpack.c.bf16 %v1346_v20, %v1342_v12  ;;  %v6679_v20 = vld [vmem:[#allocation4 + $0x260] ss:$16 sps:$4 sm:$0xff]  }
 0x142   : > { %9873 = vst [vmem:[#allocation9_spill] sm:$0xff] %v7293_v22  ;;  %v904_v30 = vadd.f32 %v903_v23, %v7276_v33  ;;  %v905_v31 = vpop.f32.mrb[5].mxu0  ;;  %v1024_v35 = vadd.f32 %v1023_v28, %v7276_v33  ;;  %v1025_v36 = vpop.f32.mrb[5].mxu1 }
 0x143   : > { %9874 = vst [vmem:[#allocation10_spill] sm:$0xff] %v7297_v29  ;;  %v906_v37 = vadd.f32 %v905_v31, %v7281_v43  ;;  %v907_v38 = vpop.f32.mrb[6].mxu0  ;;  %2259 = vmatprep.mubr.bf16.mxu0 %v7295_v24  ;;  %2645 = vmatprep.mubr.bf16.mxu1 %v7295_v24  ;;  %v1026_v39 = vadd.f32 %v1025_v36, %v7281_v43  ;;  %v1027_v40 = vpop.f32.mrb[6].mxu1  ;;  %v6687_v31 = vld [vmem:[#allocation4 + $0x284] ss:$16 sps:$4 sm:$0xff]  }
 0x144   : > { %v908_v41 = vadd.f32 %v907_v38, %v7276_v33  ;;  %v909_v42 = vpop.f32.mrb[7].mxu0  ;;  %2260 = vmatmul.mubr.bf16.vlgmr.msra.gmra.mrb[48].mxu0 %v7291_v21  ;;  %2646 = vmatmul.mubr.bf16.vlgmr.msra.gmra.mrb[80].mxu1 %v7291_v21  ;;  %v1349_v45 = vmax.f32 %v1024_v35, 0.0  ;;  %v1028_v46 = vadd.f32 %v1027_v40, %v7276_v33  ;;  %v1029_v47 = vpop.f32.mrb[7].mxu1  ;;  %v1253_v53 = vmax.f32 %v904_v30, 0.0  ;;  %v6682_v30 = vld [vmem:[#allocation4 + $0x268] ss:$16 sps:$4 sm:$0xff]  }
 0x145   : > { %v910_v48 = vadd.f32 %v909_v42, %v7281_v43  ;;  %2421 = vmatpush1.bf16.msra.mxu0 %v6661_v26  ;;  %2807 = vmatpush1.bf16.msra.mxu1 %v6664_v27  ;;  %v1350_v51 = vmax.f32 %v1026_v39, 0.0  ;;  %v1030_v52 = vadd.f32 %v1029_v47, %v7281_v43  ;;  %v1254_v59 = vmax.f32 %v906_v37, 0.0  ;;  %v6690_v37 = vld [vmem:[#allocation4 + $0x28c] ss:$16 sps:$4 sm:$0xff]  }
 0x146   : > { %v1257_v54 = vmax.f32 %v908_v41, 0.0  ;;  %2422 = vmatprep.subr.bf16.mxu0 %v6669_v32  ;;  %2808 = vmatprep.subr.bf16.mxu1 %v6672_v34  ;;  %v1353_v56 = vmax.f32 %v1028_v46, 0.0 }
 0x147   : > { %v1258_v60 = vmax.f32 %v910_v48, 0.0  ;;  %v1354_v61 = vmax.f32 %v1030_v52, 0.0  ;;  %v6688_v48 = vld [vmem:[#allocation4 + $0x288] ss:$16 sps:$4 sm:$0xff]  }
 0x148   : > { %v7311_v62 = vpack.c.bf16 %v1257_v54, %v1253_v53  ;;  %v7313_v63 = vpack.c.bf16 %v1353_v56, %v1349_v45  ;;  %v6696_v54 = vld [vmem:[#allocation4 + $0x2ac] ss:$16 sps:$4 sm:$0xff]  }
 0x149   : > { %v913_v1 = vpop.f32.mrb[8].mxu0  ;;  %v7315_v2 = vpack.c.bf16 %v1258_v60, %v1254_v59  ;;  %2423 = vmatpush1.bf16.msra.mxu0 %v6667_v44  ;;  %2809 = vmatpush1.bf16.msra.mxu1 %v6670_v49  ;;  %v1033_v5 = vpop.f32.mrb[8].mxu1  ;;  %v7317_v6 = vpack.c.bf16 %v1354_v61, %v1350_v51  ;;  %v6685_v44 = vld [vmem:[#allocation4 + $0x280] ss:$16 sps:$4 sm:$0xff]   ;;  %v6693_v49 = vld [vmem:[#allocation4 + $0x2a4] ss:$16 sps:$4 sm:$0xff]  }
 0x14a   : > { %9875 = vst [vmem:[#allocation11_spill] sm:$0xff] %v7313_v63  ;;  %v914_v7 = vadd.f32 %v913_v1, %v7276_v33  ;;  %v915_v8 = vpop.f32.mrb[9].mxu0  ;;  %2424 = vmatprep.subr.bf16.mxu0 %v6675_v50  ;;  %2810 = vmatprep.subr.bf16.mxu1 %v6678_v55  ;;  %v1034_v11 = vadd.f32 %v1033_v5, %v7276_v33  ;;  %v1035_v12 = vpop.f32.mrb[9].mxu1  ;;  %v9835_v59 = vsub.s32 2, %v7264_v57 }
 0x14b   : > { %9876 = vst [vmem:[#allocation12_spill] sm:$0xff] %v7317_v6  ;;  %v916_v13 = vadd.f32 %v915_v8, %v7281_v43  ;;  %v917_v14 = vpop.f32.mrb[10].mxu0  ;;  %2269 = vmatprep.mubr.bf16.mxu0 %v7315_v2  ;;  %2655 = vmatprep.mubr.bf16.mxu1 %v7315_v2  ;;  %v1036_v15 = vadd.f32 %v1035_v12, %v7281_v43  ;;  %v1037_v16 = vpop.f32.mrb[10].mxu1  ;;  %v6691_v8 = vld [vmem:[#allocation4 + $0x2a0] ss:$16 sps:$4 sm:$0xff]  }
 0x14c   : > { %v918_v17 = vadd.f32 %v917_v14, %v7276_v33  ;;  %v919_v18 = vpop.f32.mrb[11].mxu0  ;;  %2270 = vmatmul.mubr.bf16.gmra.mrb[52].mxu0 %v7311_v62  ;;  %2656 = vmatmul.mubr.bf16.gmra.mrb[84].mxu1 %v7311_v62  ;;  %v1357_v23 = vmax.f32 %v1034_v11, 0.0  ;;  %v1038_v26 = vadd.f32 %v1037_v16, %v7276_v33  ;;  %v1039_v27 = vpop.f32.mrb[11].mxu1  ;;  %v1261_v35 = vmax.f32 %v914_v7, 0.0  ;;  %v6699_v14 = vld [vmem:[#allocation4 + $0x2c4] ss:$16 sps:$4 sm:$0xff]  }
 0x14d   : > { %v920_v28 = vadd.f32 %v919_v18, %v7281_v43  ;;  %2425 = vmatpush1.bf16.msra.mxu0 %v6673_v3  ;;  %2811 = vmatpush1.bf16.msra.mxu1 %v6676_v4  ;;  %v1358_v32 = vmax.f32 %v1036_v15, 0.0  ;;  %v1040_v34 = vadd.f32 %v1039_v27, %v7281_v43  ;;  %v1262_v39 = vmax.f32 %v916_v13, 0.0  ;;  %v6694_v13 = vld [vmem:[#allocation4 + $0x2a8] ss:$16 sps:$4 sm:$0xff]  }
 0x14e   : > { %v1265_v36 = vmax.f32 %v918_v17, 0.0  ;;  %2426 = vmatprep.subr.bf16.mxu0 %v6681_v9  ;;  %2812 = vmatprep.subr.bf16.mxu1 %v6684_v10  ;;  %v1361_v38 = vmax.f32 %v1038_v26, 0.0  ;;  %v9833_v4 = vsub.s32 3, %v7264_v57  ;;  %v7356_v26 = vrot.slane %v7270_v19, %v9835_v59 }
 0x14f   : > { %v1266_v40 = vmax.f32 %v920_v28, 0.0  ;;  %v1362_v41 = vmax.f32 %v1040_v34, 0.0 }
 0x150   : > { %v7331_v42 = vpack.c.bf16 %v1265_v36, %v1261_v35  ;;  %v7333_v45 = vpack.c.bf16 %v1361_v38, %v1357_v23  ;;  %v6700_v38 = vld [vmem:[#allocation4 + $0x2c8] ss:$16 sps:$4 sm:$0xff]  }
 0x151   : > { %v923_v46 = vpop.f32.mrb[12].mxu0  ;;  %v7335_v47 = vpack.c.bf16 %v1266_v40, %v1262_v39  ;;  %2427 = vmatpush1.bf16.msra.mxu0 %v6679_v20  ;;  %2813 = vmatpush1.bf16.msra.mxu1 %v6682_v30  ;;  %v1043_v50 = vpop.f32.mrb[12].mxu1  ;;  %v7337_v51 = vpack.c.bf16 %v1362_v41, %v1358_v32  ;;  %v6702_v20 = vld [vmem:[#allocation4 + $0x2cc] ss:$16 sps:$4 sm:$0xff]  }
 0x152   : > { %9877 = vst [vmem:[#allocation13_spill] sm:$0xff] %v7333_v45  ;;  %v924_v52 = vadd.f32 %v923_v46, %v7276_v33  ;;  %v925_v53 = vpop.f32.mrb[13].mxu0  ;;  %2428 = vmatprep.subr.bf16.mxu0 %v6687_v31  ;;  %2814 = vmatprep.subr.bf16.mxu1 %v6690_v37  ;;  %v1044_v55 = vadd.f32 %v1043_v50, %v7276_v33  ;;  %v1045_v56 = vpop.f32.mrb[13].mxu1  ;;  %v6697_v37 = vld [vmem:[#allocation4 + $0x2c0] ss:$16 sps:$4 sm:$0xff]  }
 0x153   : > { %9878 = vst [vmem:[#allocation14_spill] sm:$0xff] %v7337_v51  ;;  %v926_v60 = vadd.f32 %v925_v53, %v7281_v43  ;;  %v927_v61 = vpop.f32.mrb[14].mxu0  ;;  %2279 = vmatprep.mubr.bf16.mxu0 %v7335_v47  ;;  %2665 = vmatprep.mubr.bf16.mxu1 %v7335_v47  ;;  %v1046_v1 = vadd.f32 %v1045_v56, %v7281_v43  ;;  %v1047_v3 = vpop.f32.mrb[14].mxu1  ;;  %v6708_v46 = vld [vmem:[#allocation4 + $0x2ec] ss:$16 sps:$4 sm:$0xff]  }
 0x154   : > { %v928_v5 = vadd.f32 %v927_v61, %v7276_v33  ;;  %v929_v7 = vpop.f32.mrb[15].mxu0  ;;  %2280 = vmatmul.mubr.bf16.gmra.mrb[56].mxu0 %v7331_v42  ;;  %2666 = vmatmul.mubr.bf16.gmra.mrb[88].mxu1 %v7331_v42  ;;  %v1365_v9 = vmax.f32 %v1044_v55, 0.0  ;;  %v1048_v10 = vadd.f32 %v1047_v3, %v7276_v33  ;;  %v1049_v11 = vpop.f32.mrb[15].mxu1  ;;  %v1269_v17 = vmax.f32 %v924_v52, 0.0 }
 0x155   : > { %v930_v12 = vadd.f32 %v929_v7, %v7281_v43  ;;  %2429 = vmatpush1.bf16.msra.mxu0 %v6685_v44  ;;  %2815 = vmatpush1.bf16.msra.mxu1 %v6688_v48  ;;  %v1366_v15 = vmax.f32 %v1046_v1, 0.0  ;;  %v1050_v16 = vadd.f32 %v1049_v11, %v7281_v43  ;;  %v1270_v27 = vmax.f32 %v926_v60, 0.0  ;;  %v6703_v60 = vld [vmem:[#allocation4 + $0x2e0] ss:$16 sps:$4 sm:$0xff]   ;;  %v6706_v7 = vld [vmem:[#allocation4 + $0x2e8] ss:$16 sps:$4 sm:$0xff]  }
 0x156   : > { %v1273_v18 = vmax.f32 %v928_v5, 0.0  ;;  %2430 = vmatprep.subr.bf16.mxu0 %v6693_v49  ;;  %2816 = vmatprep.subr.bf16.mxu1 %v6696_v54  ;;  %v1369_v23 = vmax.f32 %v1048_v10, 0.0  ;;  %v7361_v31 = vrot.slane %v7270_v19, %v9833_v4  ;;  %v6705_v19 = vld [vmem:[#allocation4 + $0x2e4] ss:$16 sps:$4 sm:$0xff]  }
 0x157   : > { %v1274_v28 = vmax.f32 %v930_v12, 0.0  ;;  %v1370_v30 = vmax.f32 %v1050_v16, 0.0 }
 0x158   : > { %v7363_v32 = vpack.c.bf16 %v1273_v18, %v1269_v17  ;;  %v7365_v34 = vpack.c.bf16 %v1369_v23, %v1365_v9 }
 0x159   : > { %v933_v35 = vpop.f32.mrb[16].mxu0  ;;  %v7367_v36 = vpack.c.bf16 %v1274_v28, %v1270_v27  ;;  %2431 = vmatpush1.bf16.msra.mxu0 %v6691_v8  ;;  %2817 = vmatpush1.bf16.msra.mxu1 %v6694_v13  ;;  %v1086_v39 = vpop.f32.mrb[16].mxu1  ;;  %v7369_v40 = vpack.c.bf16 %v1370_v30, %v1366_v15  ;;  %v6711_v8 = vld [vmem:[#allocation4 + $0x304] ss:$16 sps:$4 sm:$0xff]   ;;  %v6714_v13 = vld [vmem:[#allocation4 + $0x30c] ss:$16 sps:$4 sm:$0xff]  }
 0x15a   : > { %9879 = vst [vmem:[#allocation15_spill] sm:$0xff] %v7365_v34  ;;  %v934_v41 = vadd.f32 %v933_v35, %v7276_v33  ;;  %v935_v44 = vpop.f32.mrb[17].mxu0  ;;  %2432 = vmatprep.subr.bf16.mxu0 %v6699_v14  ;;  %2818 = vmatprep.subr.bf16.mxu1 %v6702_v20  ;;  %v1087_v48 = vadd.f32 %v1086_v39, %v7356_v26  ;;  %v1088_v49 = vpop.f32.mrb[17].mxu1  ;;  %v6709_v28 = vld [vmem:[#allocation4 + $0x300] ss:$16 sps:$4 sm:$0xff]  }
 0x15b   : > { %9880 = vst [vmem:[#allocation16_spill] sm:$0xff] %v7369_v40  ;;  %v936_v50 = vadd.f32 %v935_v44, %v7281_v43  ;;  %v937_v52 = vpop.f32.mrb[18].mxu0  ;;  %2289 = vmatprep.mubr.bf16.mxu0 %v7367_v36  ;;  %2675 = vmatprep.mubr.bf16.mxu1 %v7367_v36  ;;  %v1089_v53 = vadd.f32 %v1088_v49, %v7361_v31  ;;  %v1090_v54 = vpop.f32.mrb[18].mxu1  ;;  %v6712_v30 = vld [vmem:[#allocation4 + $0x308] ss:$16 sps:$4 sm:$0xff]  }
 0x15c   : > { %v938_v55 = vadd.f32 %v937_v52, %v7276_v33  ;;  %v939_v56 = vpop.f32.mrb[19].mxu0  ;;  %2290 = vmatmul.mubr.bf16.gmra.mrb[60].mxu0 %v7363_v32  ;;  %2676 = vmatmul.mubr.bf16.gmra.mrb[92].mxu1 %v7363_v32  ;;  %v1247_v61 = vmax.f32 %v1087_v48, 0.0  ;;  %v1091_v1 = vadd.f32 %v1090_v54, %v7356_v26  ;;  %v1092_v3 = vpop.f32.mrb[19].mxu1  ;;  %v1277_v11 = vmax.f32 %v934_v41, 0.0  ;;  %v6717_v41 = vld [vmem:[#allocation4 + $0x324] ss:$16 sps:$4 sm:$0xff]  }
 0x15d   : > { %v940_v5 = vadd.f32 %v939_v56, %v7281_v43  ;;  %2433 = vmatpush1.bf16.msra.mxu0 %v6697_v37  ;;  %2819 = vmatpush1.bf16.msra.mxu1 %v6700_v38  ;;  %v1248_v9 = vmax.f32 %v1089_v53, 0.0  ;;  %v1093_v10 = vadd.f32 %v1092_v3, %v7361_v31  ;;  %v1278_v15 = vmax.f32 %v936_v50, 0.0  ;;  %v6720_v44 = vld [vmem:[#allocation4 + $0x32c] ss:$16 sps:$4 sm:$0xff]   ;;  %v6718_v3 = vld [vmem:[#allocation4 + $0x328] ss:$16 sps:$4 sm:$0xff]  }
 0x15e   : > { %v1281_v12 = vmax.f32 %v938_v55, 0.0  ;;  %2434 = vmatprep.subr.bf16.mxu0 %v6705_v19  ;;  %2820 = vmatprep.subr.bf16.mxu1 %v6708_v46  ;;  %v1251_v14 = vmax.f32 %v1091_v1, 0.0  ;;  %v6715_v55 = vld [vmem:[#allocation4 + $0x320] ss:$16 sps:$4 sm:$0xff]  }
 0x15f   : > { %v1282_v16 = vmax.f32 %v940_v5, 0.0  ;;  %v1252_v17 = vmax.f32 %v1093_v10, 0.0  ;;  %v6723_v5 = vld [vmem:[#allocation4 + $0x344] ss:$16 sps:$4 sm:$0xff]  }
 0x160   : > { %v7383_v18 = vpack.c.bf16 %v1281_v12, %v1277_v11  ;;  %v7385_v20 = vpack.c.bf16 %v1251_v14, %v1247_v61  ;;  %v6726_v11 = vld [vmem:[#allocation4 + $0x34c] ss:$16 sps:$4 sm:$0xff]  }
 0x161   : > { %v7387_v23 = vpack.c.bf16 %v1282_v16, %v1278_v15  ;;  %v943_v27 = vpop.f32.mrb[20].mxu0  ;;  %2435 = vmatpush1.bf16.msra.mxu0 %v6703_v60  ;;  %2821 = vmatpush1.bf16.msra.mxu1 %v6706_v7  ;;  %v7389_v35 = vpack.c.bf16 %v1252_v17, %v1248_v9  ;;  %v1096_v37 = vpop.f32.mrb[20].mxu1 }
 0x162   : > { %v944_v38 = vadd.f32 %v943_v27, %v7276_v33  ;;  %v945_v39 = vpop.f32.mrb[21].mxu0  ;;  %2436 = vmatprep.subr.bf16.mxu0 %v6711_v8  ;;  %2822 = vmatprep.subr.bf16.mxu1 %v6714_v13  ;;  %v1097_v19 = vadd.f32 %v1096_v37, %v7356_v26  ;;  %v1098_v46 = vpop.f32.mrb[21].mxu1  ;;  %v6724_v37 = vld [vmem:[#allocation4 + $0x348] ss:$16 sps:$4 sm:$0xff]  }
 0x163   : > { %v946_v48 = vadd.f32 %v945_v39, %v7281_v43  ;;  %v947_v49 = vpop.f32.mrb[22].mxu0  ;;  %2299 = vmatprep.mubr.bf16.mxu0 %v7387_v23  ;;  %2685 = vmatprep.mubr.bf16.mxu1 %v7387_v23  ;;  %v1099_v50 = vadd.f32 %v1098_v46, %v7361_v31  ;;  %v1100_v52 = vpop.f32.mrb[22].mxu1  ;;  %v6732_v46 = vld [vmem:[#allocation4 + $0x36c] ss:$16 sps:$4 sm:$0xff]  }
 0x164   : > { %v948_v53 = vadd.f32 %v947_v49, %v7276_v33  ;;  %v949_v54 = vpop.f32.mrb[23].mxu0  ;;  %2300 = vmatmul.mubr.bf16.gmra.mrb[64].mxu0 %v7383_v18  ;;  %2686 = vmatmul.mubr.bf16.gmra.mrb[96].mxu1 %v7383_v18  ;;  %v1255_v56 = vmax.f32 %v1097_v19, 0.0  ;;  %v1101_v60 = vadd.f32 %v1100_v52, %v7356_v26  ;;  %v1102_v61 = vpop.f32.mrb[23].mxu1  ;;  %v1285_v9 = vmax.f32 %v944_v38, 0.0  ;;  %v6729_v19 = vld [vmem:[#allocation4 + $0x364] ss:$16 sps:$4 sm:$0xff]  }
 0x165   : > { %v950_v1 = vadd.f32 %v949_v54, %v7281_v43  ;;  %2437 = vmatpush1.bf16.msra.mxu0 %v6709_v28  ;;  %2823 = vmatpush1.bf16.msra.mxu1 %v6712_v30  ;;  %v1256_v7 = vmax.f32 %v1099_v50, 0.0  ;;  %v1103_v8 = vadd.f32 %v1102_v61, %v7361_v31  ;;  %v1286_v13 = vmax.f32 %v946_v48, 0.0  ;;  %v6721_v30 = vld [vmem:[#allocation4 + $0x340] ss:$16 sps:$4 sm:$0xff]  }
 0x166   : > { %v1289_v10 = vmax.f32 %v948_v53, 0.0  ;;  %2438 = vmatprep.subr.bf16.mxu0 %v6717_v41  ;;  %2824 = vmatprep.subr.bf16.mxu1 %v6720_v44  ;;  %v1259_v12 = vmax.f32 %v1101_v60, 0.0  ;;  %v6727_v60 = vld [vmem:[#allocation4 + $0x360] ss:$16 sps:$4 sm:$0xff]  }
 0x167   : > { %v1290_v14 = vmax.f32 %v950_v1, 0.0  ;;  %v1260_v15 = vmax.f32 %v1103_v8, 0.0  ;;  %v6735_v8 = vld [vmem:[#allocation4 + $0x384] ss:$16 sps:$4 sm:$0xff]  }
 0x168   : > { %v7403_v16 = vpack.c.bf16 %v1289_v10, %v1285_v9  ;;  %v7405_v17 = vpack.c.bf16 %v1259_v12, %v1255_v56 }
 0x169   : > { %v7407_v27 = vpack.c.bf16 %v1290_v14, %v1286_v13  ;;  %v953_v28 = vpop.f32.mrb[24].mxu0  ;;  %2439 = vmatpush1.bf16.msra.mxu0 %v6715_v55  ;;  %2825 = vmatpush1.bf16.msra.mxu1 %v6718_v3  ;;  %v7409_v38 = vpack.c.bf16 %v1260_v15, %v1256_v7  ;;  %v1106_v39 = vpop.f32.mrb[24].mxu1  ;;  %v6730_v7 = vld [vmem:[#allocation4 + $0x368] ss:$16 sps:$4 sm:$0xff]   ;;  %v6738_v13 = vld [vmem:[#allocation4 + $0x38c] ss:$16 sps:$4 sm:$0xff]  }
 0x16a   : > { %v954_v41 = vadd.f32 %v953_v28, %v7276_v33  ;;  %v955_v44 = vpop.f32.mrb[25].mxu0  ;;  %2440 = vmatprep.subr.bf16.mxu0 %v6723_v5  ;;  %2826 = vmatprep.subr.bf16.mxu1 %v6726_v11  ;;  %v1107_v48 = vadd.f32 %v1106_v39, %v7356_v26  ;;  %v1108_v49 = vpop.f32.mrb[25].mxu1 }
 0x16b   : > { %v956_v50 = vadd.f32 %v955_v44, %v7281_v43  ;;  %v957_v52 = vpop.f32.mrb[26].mxu0  ;;  %2309 = vmatprep.mubr.bf16.mxu0 %v7407_v27  ;;  %2695 = vmatprep.mubr.bf16.mxu1 %v7407_v27  ;;  %v1109_v53 = vadd.f32 %v1108_v49, %v7361_v31  ;;  %v1110_v54 = vpop.f32.mrb[26].mxu1  ;;  %v6733_v49 = vld [vmem:[#allocation4 + $0x380] ss:$16 sps:$4 sm:$0xff]  }
 0x16c   : > { %v958_v55 = vadd.f32 %v957_v52, %v7276_v33  ;;  %v959_v56 = vpop.f32.mrb[27].mxu0  ;;  %2310 = vmatmul.mubr.bf16.gmra.mrb[68].mxu0 %v7403_v16  ;;  %2696 = vmatmul.mubr.bf16.gmra.mrb[100].mxu1 %v7403_v16  ;;  %v1263_v61 = vmax.f32 %v1107_v48, 0.0  ;;  %v1111_v1 = vadd.f32 %v1110_v54, %v7356_v26  ;;  %v1112_v3 = vpop.f32.mrb[27].mxu1  ;;  %v1293_v11 = vmax.f32 %v954_v41, 0.0  ;;  %v6736_v52 = vld [vmem:[#allocation4 + $0x388] ss:$16 sps:$4 sm:$0xff]  }
 0x16d   : > { %v960_v5 = vadd.f32 %v959_v56, %v7281_v43  ;;  %2441 = vmatpush1.bf16.msra.mxu0 %v6721_v30  ;;  %2827 = vmatpush1.bf16.msra.mxu1 %v6724_v37  ;;  %v1264_v9 = vmax.f32 %v1109_v53, 0.0  ;;  %v1113_v10 = vadd.f32 %v1112_v3, %v7361_v31  ;;  %v1294_v15 = vmax.f32 %v956_v50, 0.0  ;;  %v6741_v50 = vld [vmem:[#allocation4 + $0x3a4] ss:$16 sps:$4 sm:$0xff]   ;;  %v6744_v54 = vld [vmem:[#allocation4 + $0x3ac] ss:$16 sps:$4 sm:$0xff]  }
 0x16e   : > { %v1297_v12 = vmax.f32 %v958_v55, 0.0  ;;  %2442 = vmatprep.subr.bf16.mxu0 %v6729_v19  ;;  %2828 = vmatprep.subr.bf16.mxu1 %v6732_v46  ;;  %v1267_v14 = vmax.f32 %v1111_v1, 0.0 }
 0x16f   : > { %v1298_v28 = vmax.f32 %v960_v5, 0.0  ;;  %v1268_v39 = vmax.f32 %v1113_v10, 0.0 }
 0x170   : > { %v7423_v44 = vpack.c.bf16 %v1297_v12, %v1293_v11  ;;  %v7425_v48 = vpack.c.bf16 %v1267_v14, %v1263_v61 }
 0x171   : > { %v7427_v30 = vpack.c.bf16 %v1298_v28, %v1294_v15  ;;  %v963_v37 = vpop.f32.mrb[28].mxu0  ;;  %2443 = vmatpush1.bf16.msra.mxu0 %v6727_v60  ;;  %2829 = vmatpush1.bf16.msra.mxu1 %v6730_v7  ;;  %v7429_v41 = vpack.c.bf16 %v1268_v39, %v1264_v9  ;;  %v1116_v19 = vpop.f32.mrb[28].mxu1  ;;  %v6747_v28 = vld [vmem:[#allocation4 + $0x3c4] ss:$16 sps:$4 sm:$0xff]  }
 0x172   : > { %v964_v46 = vadd.f32 %v963_v37, %v7276_v33  ;;  %v965_v53 = vpop.f32.mrb[29].mxu0  ;;  %2444 = vmatprep.subr.bf16.mxu0 %v6735_v8  ;;  %2830 = vmatprep.subr.bf16.mxu1 %v6738_v13  ;;  %v1117_v55 = vadd.f32 %v1116_v19, %v7356_v26  ;;  %v1118_v56 = vpop.f32.mrb[29].mxu1  ;;  %v6739_v8 = vld [vmem:[#allocation4 + $0x3a0] ss:$16 sps:$4 sm:$0xff]   ;;  %v6742_v13 = vld [vmem:[#allocation4 + $0x3a8] ss:$16 sps:$4 sm:$0xff]  }
 0x173   : > { %v966_v61 = vadd.f32 %v965_v53, %v7281_v43  ;;  %v967_v1 = vpop.f32.mrb[30].mxu0  ;;  %2319 = vmatprep.mubr.bf16.mxu0 %v7427_v30  ;;  %2705 = vmatprep.mubr.bf16.mxu1 %v7427_v30  ;;  %v1119_v60 = vadd.f32 %v1118_v56, %v7361_v31  ;;  %v1120_v3 = vpop.f32.mrb[30].mxu1  ;;  %v6750_v53 = vld [vmem:[#allocation4 + $0x3cc] ss:$16 sps:$4 sm:$0xff]  }
 0x174   : > { %v968_v5 = vadd.f32 %v967_v1, %v7276_v33  ;;  %v969_v7 = vpop.f32.mrb[31].mxu0  ;;  %2320 = vmatmul.mubr.bf16.gmra.mrb[72].mxu0 %v7423_v44  ;;  %2706 = vmatmul.mubr.bf16.gmra.mrb[104].mxu1 %v7423_v44  ;;  %v1271_v9 = vmax.f32 %v1117_v55, 0.0  ;;  %v1121_v10 = vadd.f32 %v1120_v3, %v7356_v26  ;;  %v1122_v11 = vpop.f32.mrb[31].mxu1  ;;  %v1301_v39 = vmax.f32 %v964_v46, 0.0  ;;  %v6745_v46 = vld [vmem:[#allocation4 + $0x3c0] ss:$16 sps:$4 sm:$0xff]  }
 0x175   : > { %v970_v12 = vadd.f32 %v969_v7, %v7281_v43  ;;  %2445 = vmatpush1.bf16.msra.mxu0 %v6733_v49  ;;  %2831 = vmatpush1.bf16.msra.mxu1 %v6736_v52  ;;  %v1272_v14 = vmax.f32 %v1119_v60, 0.0  ;;  %v1123_v15 = vadd.f32 %v1122_v11, %v7361_v31  ;;  %v1302_v56 = vmax.f32 %v966_v61, 0.0  ;;  %v6756_v11 = vld [vmem:[#allocation4 + $0x3ec] ss:$16 sps:$4 sm:$0xff]  }
 0x176   : > { %v1305_v37 = vmax.f32 %v968_v5, 0.0  ;;  %2446 = vmatprep.subr.bf16.mxu0 %v6741_v50  ;;  %2832 = vmatprep.subr.bf16.mxu1 %v6744_v54  ;;  %v1275_v19 = vmax.f32 %v1121_v10, 0.0  ;;  %v6748_v5 = vld [vmem:[#allocation4 + $0x3c8] ss:$16 sps:$4 sm:$0xff]  }
 0x177   : > { %v1306_v55 = vmax.f32 %v970_v12, 0.0  ;;  %v1276_v1 = vmax.f32 %v1123_v15, 0.0 }
 0x178   : > { %v7443_v3 = vpack.c.bf16 %v1305_v37, %v1301_v39  ;;  %v7445_v4 = vpack.c.bf16 %v1275_v19, %v1271_v9  ;;  %v6753_v9 = vld [vmem:[#allocation4 + $0x3e4] ss:$16 sps:$4 sm:$0xff]  }
 0x179   : > { %v7447_v49 = vpack.c.bf16 %v1306_v55, %v1302_v56  ;;  %v973_v52 = vpop.f32.mrb[32].mxu0  ;;  %2447 = vmatpush1.bf16.msra.mxu0 %v6739_v8  ;;  %2833 = vmatpush1.bf16.msra.mxu1 %v6742_v13  ;;  %v7449_v60 = vpack.c.bf16 %v1276_v1, %v1272_v14  ;;  %v1126_v50 = vpop.f32.mrb[32].mxu1  ;;  %v6751_v1 = vld [vmem:[#allocation4 + $0x3e0] ss:$16 sps:$4 sm:$0xff]  }
 0x17a   : > { %v974_v54 = vadd.f32 %v973_v52, %v7276_v33  ;;  %v975_v7 = vpop.f32.mrb[33].mxu0  ;;  %2448 = vmatprep.subr.bf16.mxu0 %v6747_v28  ;;  %2834 = vmatprep.subr.bf16.mxu1 %v6750_v53  ;;  %v1127_v61 = vadd.f32 %v1126_v50, %v7356_v26  ;;  %v1128_v10 = vpop.f32.mrb[33].mxu1  ;;  %v6754_v52 = vld [vmem:[#allocation4 + $0x3e8] ss:$16 sps:$4 sm:$0xff]  }
 0x17b   : > { %v976_v12 = vadd.f32 %v975_v7, %v7281_v43  ;;  %v977_v15 = vpop.f32.mrb[34].mxu0  ;;  %2329 = vmatprep.mubr.bf16.mxu0 %v7447_v49  ;;  %2715 = vmatprep.mubr.bf16.mxu1 %v7447_v49  ;;  %v1129_v8 = vadd.f32 %v1128_v10, %v7361_v31  ;;  %v1130_v13 = vpop.f32.mrb[34].mxu1 }
 0x17c   : > { %v978_v14 = vadd.f32 %v977_v15, %v7276_v33  ;;  %v979_v39 = vpop.f32.mrb[35].mxu0  ;;  %2330 = vmatmul.mubr.bf16.gmra.mrb[76].mxu0 %v7443_v3  ;;  %2716 = vmatmul.mubr.bf16.gmra.mrb[108].mxu1 %v7443_v3  ;;  %v1279_v28 = vmax.f32 %v1127_v61, 0.0  ;;  %v1131_v37 = vadd.f32 %v1130_v13, %v7356_v26  ;;  %v1132_v19 = vpop.f32.mrb[35].mxu1  ;;  %v1309_v50 = vmax.f32 %v974_v54, 0.0  ;;  %v6757_v61 = vld [vmem:[%s9825_s8 + $0x40] sm:$0xff]  }
 0x17d   : > { %v980_v53 = vadd.f32 %v979_v39, %v7281_v43  ;;  %2449 = vmatpush1.bf16.msra.mxu0 %v6745_v46  ;;  %2835 = vmatpush1.bf16.msra.mxu1 %v6748_v5  ;;  %v1280_v56 = vmax.f32 %v1129_v8, 0.0  ;;  %v1133_v55 = vadd.f32 %v1132_v19, %v7361_v31  ;;  %v6759_v15 = vld [vmem:[%s9825_s8 + $0xc0] sm:$0xff]   ;;  %v1310_v46 = vmax.f32 %v976_v12, 0.0 }
 0x17e   : > { %v1313_v7 = vmax.f32 %v978_v14, 0.0  ;;  %v1283_v10 = vmax.f32 %v1131_v37, 0.0  ;;  %2450 = vmatprep.subr.bf16.mxu0 %v6753_v9  ;;  %2836 = vmatprep.subr.bf16.mxu1 %v6756_v11 }
 0x17f   : > { %v1314_v5 = vmax.f32 %v980_v53, 0.0  ;;  %v1284_v8 = vmax.f32 %v1133_v55, 0.0 }
 0x180   : > { %v7469_v13 = vpack.c.bf16 %v1313_v7, %v1309_v50  ;;  %v7471_v39 = vpack.c.bf16 %v1283_v10, %v1279_v28 }
 0x181   : > { %v7473_v54 = vpack.c.bf16 %v1314_v5, %v1310_v46  ;;  %v983_v14 = vpop.f32.mrb[36].mxu0  ;;  %v7475_v9 = vpack.c.bf16 %v1284_v8, %v1280_v56  ;;  %2451 = vmatpush1.bf16.msra.mxu0 %v6751_v1  ;;  %v1136_v11 = vpop.f32.mrb[36].mxu1  ;;  %2837 = vmatpush1.bf16.msra.mxu1 %v6754_v52 }
 0x182   : > { %9881 = vst [vmem:[#allocation17_spill] sm:$0xff] %v7469_v13  ;;  %v984_v37 = vadd.f32 %v983_v14, %v7276_v33  ;;  %v985_v19 = vpop.f32.mrb[37].mxu0  ;;  %v1137_v25 = vadd.f32 %v1136_v11, %v7356_v26  ;;  %v1138_v12 = vpop.f32.mrb[37].mxu1  ;;  %5917 = vmatprep.subr.bf16.mxu0 %v6757_v61  ;;  %6029 = vmatprep.subr.bf16.mxu1 %v6759_v15 }
 0x183   : > { %v986_v53 = vadd.f32 %v985_v19, %v7281_v43  ;;  %v987_v28 = vpop.f32.mrb[38].mxu0  ;;  %2339 = vmatprep.mubr.bf16.mxu0 %v7473_v54  ;;  %2725 = vmatprep.mubr.bf16.mxu1 %v7473_v54  ;;  %v1139_v56 = vadd.f32 %v1138_v12, %v7361_v31  ;;  %v1140_v55 = vpop.f32.mrb[38].mxu1 }
 0x184   : > { %v988_v1 = vadd.f32 %v987_v28, %v7276_v33  ;;  %v989_v52 = vpop.f32.mrb[39].mxu0  ;;  %2340 = vmatmul.mubr.bf16.gmra.mrb[80].mxu0 %v7469_v13  ;;  %2726 = vmatmul.mubr.bf16.gmra.mrb[112].mxu1 %v7469_v13  ;;  %v1287_v50 = vmax.f32 %v1137_v25, 0.0  ;;  %v1141_v7 = vadd.f32 %v1140_v55, %v7356_v26  ;;  %v1142_v10 = vpop.f32.mrb[39].mxu1  ;;  %v1317_v5 = vmax.f32 %v984_v37, 0.0 }
 0x185   : > { %v990_v61 = vadd.f32 %v989_v52, %v7281_v43  ;;  %v1288_v15 = vmax.f32 %v1139_v56, 0.0  ;;  %v1143_v46 = vadd.f32 %v1142_v10, %v7361_v31  ;;  %v1318_v11 = vmax.f32 %v986_v53, 0.0 }
 0x186   : > { %v1321_v8 = vmax.f32 %v988_v1, 0.0  ;;  %v1291_v14 = vmax.f32 %v1141_v7, 0.0 }
 0x187   : > { %v1322_v19 = vmax.f32 %v990_v61, 0.0  ;;  %v1292_v12 = vmax.f32 %v1143_v46, 0.0 }
 0x188   : > { %v7489_v28 = vpack.c.bf16 %v1321_v8, %v1317_v5  ;;  %v7491_v59 = vpack.c.bf16 %v1291_v14, %v1287_v50 }
 0x189   : > { %v7493_v58 = vpack.c.bf16 %v1322_v19, %v1318_v11  ;;  %v993_v25 = vpop.f32.mrb[40].mxu0  ;;  %v7495_v55 = vpack.c.bf16 %v1292_v12, %v1288_v15  ;;  %v1146_v0 = vpop.f32.mrb[40].mxu1 }
 0x18a   : > { %9882 = vst [vmem:[#allocation18_spill] sm:$0xff] %v7489_v28  ;;  %v994_v56 = vadd.f32 %v993_v25, %v7276_v33  ;;  %v995_v52 = vpop.f32.mrb[41].mxu0  ;;  %v1147_v37 = vadd.f32 %v1146_v0, %v7356_v26  ;;  %v1148_v1 = vpop.f32.mrb[41].mxu1 }
 0x18b   : > { %9883 = vst [vmem:[#allocation19_spill] sm:$0xff] %v7493_v58  ;;  %v996_v53 = vadd.f32 %v995_v52, %v7281_v43  ;;  %v997_v7 = vpop.f32.mrb[42].mxu0  ;;  %2349 = vmatprep.mubr.bf16.mxu0 %v7493_v58  ;;  %2735 = vmatprep.mubr.bf16.mxu1 %v7493_v58  ;;  %v1149_v50 = vadd.f32 %v1148_v1, %v7361_v31  ;;  %v1150_v10 = vpop.f32.mrb[42].mxu1 }
 0x18c   : > { %v998_v61 = vadd.f32 %v997_v7, %v7276_v33  ;;  %v999_v15 = vpop.f32.mrb[43].mxu0  ;;  %2350 = vmatmul.mubr.bf16.gmra.mrb[84].mxu0 %v7489_v28  ;;  %2736 = vmatmul.mubr.bf16.gmra.mrb[116].mxu1 %v7489_v28  ;;  %v1295_v46 = vmax.f32 %v1147_v37, 0.0  ;;  %v1151_v0 = vadd.f32 %v1150_v10, %v7356_v26  ;;  %v1152_v5 = vpop.f32.mrb[43].mxu1  ;;  %v1325_v19 = vmax.f32 %v994_v56, 0.0 }
 0x18d   : > { %v1000_v8 = vadd.f32 %v999_v15, %v7281_v43  ;;  %v1296_v14 = vmax.f32 %v1149_v50, 0.0  ;;  %v1153_v11 = vadd.f32 %v1152_v5, %v7361_v31  ;;  %v1326_v52 = vmax.f32 %v996_v53, 0.0 }
 0x18e   : > { %v1329_v12 = vmax.f32 %v998_v61, 0.0  ;;  %v1299_v25 = vmax.f32 %v1151_v0, 0.0 }
 0x18f   : > { %v1330_v1 = vmax.f32 %v1000_v8, 0.0  ;;  %v1300_v7 = vmax.f32 %v1153_v11, 0.0 }
 0x190   : > { %v7509_v57 = vpack.c.bf16 %v1329_v12, %v1325_v19  ;;  %v7511_v58 = vpack.c.bf16 %v1299_v25, %v1295_v46 }
 0x191   : > { %v7513_v28 = vpack.c.bf16 %v1330_v1, %v1326_v52  ;;  %v1003_v37 = vpop.f32.mrb[44].mxu0  ;;  %v7515_v10 = vpack.c.bf16 %v1300_v7, %v1296_v14  ;;  %v1156_v13 = vpop.f32.mrb[44].mxu1 }
 0x192   : > { %9884 = vst [vmem:[#allocation20_spill] sm:$0xff] %v7509_v57  ;;  %v1004_v50 = vadd.f32 %v1003_v37, %v7276_v33  ;;  %v1005_v15 = vpop.f32.mrb[45].mxu0  ;;  %v1157_v56 = vadd.f32 %v1156_v13, %v7356_v26  ;;  %v1158_v61 = vpop.f32.mrb[45].mxu1 }
 0x193   : > { %9885 = vst [vmem:[#allocation21_spill] sm:$0xff] %v7513_v28  ;;  %v1006_v53 = vadd.f32 %v1005_v15, %v7281_v43  ;;  %v1007_v0 = vpop.f32.mrb[46].mxu0  ;;  %2359 = vmatprep.mubr.bf16.mxu0 %v7513_v28  ;;  %2745 = vmatprep.mubr.bf16.mxu1 %v7513_v28  ;;  %v1159_v46 = vadd.f32 %v1158_v61, %v7361_v31  ;;  %v1160_v5 = vpop.f32.mrb[46].mxu1 }
 0x194   : > { %v1008_v8 = vadd.f32 %v1007_v0, %v7276_v33  ;;  %v1009_v14 = vpop.f32.mrb[47].mxu0  ;;  %2360 = vmatmul.mubr.bf16.gmra.mrb[88].mxu0 %v7509_v57  ;;  %2746 = vmatmul.mubr.bf16.gmra.mrb[120].mxu1 %v7509_v57  ;;  %v1303_v11 = vmax.f32 %v1157_v56, 0.0  ;;  %v1161_v13 = vadd.f32 %v1160_v5, %v7356_v26  ;;  %v1162_v19 = vpop.f32.mrb[47].mxu1  ;;  %v1333_v1 = vmax.f32 %v1004_v50, 0.0 }
 0x195   : > { %v1010_v12 = vadd.f32 %v1009_v14, %v7281_v43  ;;  %v1304_v25 = vmax.f32 %v1159_v46, 0.0  ;;  %v1163_v52 = vadd.f32 %v1162_v19, %v7361_v31  ;;  %v1334_v15 = vmax.f32 %v1006_v53, 0.0 }
 0x196   : > { %v1337_v7 = vmax.f32 %v1008_v8, 0.0  ;;  %v1307_v37 = vmax.f32 %v1161_v13, 0.0 }
 0x197   : > { %v1338_v61 = vmax.f32 %v1010_v12, 0.0  ;;  %v1308_v33 = vmax.f32 %v1163_v52, 0.0 }
 0x198   : > { %v7529_v0 = vpack.c.bf16 %v1337_v7, %v1333_v1  ;;  %v7531_v28 = vpack.c.bf16 %v1307_v37, %v1303_v11 }
 0x199   : > { %v7533_v57 = vpack.c.bf16 %v1338_v61, %v1334_v15  ;;  %v7535_v56 = vpack.c.bf16 %v1308_v33, %v1304_v25  ;;  %v1166_v5 = vpop.f32.mrb[48].mxu1 }
 0x19a   : > { %9886 = vst [vmem:[#allocation22_spill] sm:$0xff] %v7529_v0  ;;  %v1167_v43 = vadd.f32 %v1166_v5, %v7356_v26  ;;  %v1168_v46 = vpop.f32.mrb[49].mxu1 }
 0x19b   : > { %2369 = vmatprep.mubr.bf16.mxu0 %v7533_v57  ;;  %2755 = vmatprep.mubr.bf16.mxu1 %v7533_v57  ;;  %v1169_v50 = vadd.f32 %v1168_v46, %v7361_v31  ;;  %v1170_v53 = vpop.f32.mrb[50].mxu1 }
 0x19c   : > { %2370 = vmatmul.mubr.bf16.gmra.mrb[92].mxu0 %v7529_v0  ;;  %2756 = vmatmul.mubr.bf16.gmra.mrb[124].mxu1 %v7529_v0  ;;  %v1311_v8 = vmax.f32 %v1167_v43, 0.0  ;;  %v1171_v14 = vadd.f32 %v1170_v53, %v7356_v26  ;;  %v1172_v11 = vpop.f32.mrb[51].mxu1 }
 0x19d   : > { %2379 = vmatprep.mubr.bf16.mxu0 %v7297_v29  ;;  %2765 = vmatprep.mubr.bf16.mxu1 %v7297_v29  ;;  %v1312_v13 = vmax.f32 %v1169_v50, 0.0  ;;  %v1173_v19 = vadd.f32 %v1172_v11, %v7361_v31 }
 0x19e   : > { %v1315_v12 = vmax.f32 %v1171_v14, 0.0 }
 0x19f   : > { %v1316_v25 = vmax.f32 %v1173_v19, 0.0 }
 0x1a0   : > { %v7547_v52 = vpack.c.bf16 %v1315_v12, %v1311_v8 }
 0x1a1   : > { %v7549_v1 = vpack.c.bf16 %v1316_v25, %v1312_v13  ;;  %v1176_v7 = vpop.f32.mrb[52].mxu1 }
 0x1a2   : > { %v1177_v37 = vadd.f32 %v1176_v7, %v7356_v26  ;;  %v1178_v15 = vpop.f32.mrb[53].mxu1 }
 0x1a3   : > { %v1179_v61 = vadd.f32 %v1178_v15, %v7361_v31  ;;  %v1180_v33 = vpop.f32.mrb[54].mxu1 }
 0x1a4   : > { %2380 = vmatmul.mubr.bf16.gmra.mrb[96].mxu0 %v7293_v22  ;;  %2766 = vmatmul.mubr.bf16.gmra.mrb[128].mxu1 %v7293_v22  ;;  %v1319_v5 = vmax.f32 %v1177_v37, 0.0  ;;  %v1181_v43 = vadd.f32 %v1180_v33, %v7356_v26  ;;  %v1182_v46 = vpop.f32.mrb[55].mxu1  ;;  %v6766_v22 = vld [vmem:[%s9825_s8 + $0x10] sm:$0xff]  }
 0x1a5   : > { %2389 = vmatprep.mubr.bf16.mxu0 %v7317_v6  ;;  %2775 = vmatprep.mubr.bf16.mxu1 %v7317_v6  ;;  %v1320_v50 = vmax.f32 %v1179_v61, 0.0  ;;  %v1183_v53 = vadd.f32 %v1182_v46, %v7361_v31 }
 0x1a6   : > { %v1323_v8 = vmax.f32 %v1181_v43, 0.0 }
 0x1a7   : > { %v1324_v14 = vmax.f32 %v1183_v53, 0.0 }
 0x1a8   : > { %v7559_v11 = vpack.c.bf16 %v1323_v8, %v1319_v5 }
 0x1a9   : > { %v7561_v13 = vpack.c.bf16 %v1324_v14, %v1320_v50  ;;  %v1186_v19 = vpop.f32.mrb[56].mxu1 }
 0x1aa   : > { %v1187_v12 = vadd.f32 %v1186_v19, %v7356_v26  ;;  %v1188_v25 = vpop.f32.mrb[57].mxu1 }
 0x1ab   : > { %v1189_v7 = vadd.f32 %v1188_v25, %v7361_v31  ;;  %v1190_v37 = vpop.f32.mrb[58].mxu1 }
 0x1ac   : > { %2390 = vmatmul.mubr.bf16.gmra.mrb[100].mxu0 %v7313_v63  ;;  %2776 = vmatmul.mubr.bf16.gmra.mrb[132].mxu1 %v7313_v63  ;;  %v1327_v15 = vmax.f32 %v1187_v12, 0.0  ;;  %v1191_v61 = vadd.f32 %v1190_v37, %v7356_v26  ;;  %v1192_v33 = vpop.f32.mrb[59].mxu1 }
 0x1ad   : > { %2399 = vmatprep.mubr.bf16.mxu0 %v7337_v51  ;;  %2785 = vmatprep.mubr.bf16.mxu1 %v7337_v51  ;;  %v1328_v5 = vmax.f32 %v1189_v7, 0.0  ;;  %v1193_v43 = vadd.f32 %v1192_v33, %v7361_v31 }
 0x1ae   : > { %v1331_v46 = vmax.f32 %v1191_v61, 0.0 }
 0x1af   : > { %v1332_v50 = vmax.f32 %v1193_v43, 0.0 }
 0x1b0   : > { %v7571_v53 = vpack.c.bf16 %v1331_v46, %v1327_v15 }
 0x1b1   : > { %v7573_v8 = vpack.c.bf16 %v1332_v50, %v1328_v5  ;;  %v1196_v14 = vpop.f32.mrb[60].mxu1 }
 0x1b2   : > { %v1197_v19 = vadd.f32 %v1196_v14, %v7356_v26  ;;  %v1198_v12 = vpop.f32.mrb[61].mxu1 }
 0x1b3   : > { %v1199_v25 = vadd.f32 %v1198_v12, %v7361_v31  ;;  %v1200_v37 = vpop.f32.mrb[62].mxu1 }
 0x1b4   : > { %2400 = vmatmul.mubr.bf16.gmra.mrb[104].mxu0 %v7333_v45  ;;  %2786 = vmatmul.mubr.bf16.gmra.mrb[136].mxu1 %v7333_v45  ;;  %v1335_v7 = vmax.f32 %v1197_v19, 0.0  ;;  %v1201_v33 = vadd.f32 %v1200_v37, %v7356_v26  ;;  %v1202_v61 = vpop.f32.mrb[63].mxu1 }
 0x1b5   : > { %2409 = vmatprep.mubr.bf16.mxu0 %v7369_v40  ;;  %2795 = vmatprep.mubr.bf16.mxu1 %v7369_v40  ;;  %v1336_v15 = vmax.f32 %v1199_v25, 0.0  ;;  %v1203_v5 = vadd.f32 %v1202_v61, %v7361_v31 }
 0x1b6   : > { %v1339_v43 = vmax.f32 %v1201_v33, 0.0 }
 0x1b7   : > { %v1340_v46 = vmax.f32 %v1203_v5, 0.0 }
 0x1b8   : > { %v7583_v50 = vpack.c.bf16 %v1339_v43, %v1335_v7 }
 0x1b9   : > { %v7585_v14 = vpack.c.bf16 %v1340_v46, %v1336_v15  ;;  %v1206_v12 = vpop.f32.mrb[64].mxu1 }
 0x1ba   : > { %v1207_v45 = vadd.f32 %v1206_v12, %v7356_v26  ;;  %v1208_v19 = vpop.f32.mrb[65].mxu1  ;;  %v6758_v12 = vld [vmem:[%s9825_s8] sm:$0xff]  }
 0x1bb   : > { %v1209_v37 = vadd.f32 %v1208_v19, %v7361_v31  ;;  %v1210_v51 = vpop.f32.mrb[66].mxu1 }
 0x1bc   : > { %2410 = vmatmul.mubr.bf16.gmra.mrb[108].mxu0 %v7365_v34  ;;  %2796 = vmatmul.mubr.bf16.gmra.mrb[140].mxu1 %v7365_v34  ;;  %v1343_v25 = vmax.f32 %v1207_v45, 0.0  ;;  %v1211_v61 = vadd.f32 %v1210_v51, %v7356_v26  ;;  %v1212_v33 = vpop.f32.mrb[67].mxu1  ;;  %v6760_v51 = vld [vmem:[%s9825_s8 + $0x80] sm:$0xff]  }
 0x1bd   : > { %2452 = vmatprep.mubr.bf16.mxu0 %v7389_v35  ;;  %2838 = vmatprep.mubr.bf16.mxu1 %v7389_v35  ;;  %v1344_v7 = vmax.f32 %v1209_v37, 0.0  ;;  %v1213_v15 = vadd.f32 %v1212_v33, %v7361_v31 }
 0x1be   : > { %v1347_v5 = vmax.f32 %v1211_v61, 0.0  ;;  %v6761_v61 = vld [vmem:[%s9825_s8 + $0x48] sm:$0xff]  }
 0x1bf   : > { %v1348_v43 = vmax.f32 %v1213_v15, 0.0 }
 0x1c0   : > { %v7595_v46 = vpack.c.bf16 %v1347_v5, %v1343_v25  ;;  %v6763_v25 = vld [vmem:[%s9825_s8 + $0xc8] sm:$0xff]  }
 0x1c1   : > { %v7600_v19 = vpack.c.bf16 %v1348_v43, %v1344_v7  ;;  %v1216_v45 = vpop.f32.mrb[68].mxu1 }
 0x1c2   : > { %v1217_v34 = vadd.f32 %v1216_v45, %v7356_v26  ;;  %v1218_v37 = vpop.f32.mrb[69].mxu1  ;;  %v6762_v45 = vld [vmem:[%s9825_s8 + $0x8] sm:$0xff]  }
 0x1c3   : > { %v1219_v33 = vadd.f32 %v1218_v37, %v7361_v31  ;;  %v1220_v7 = vpop.f32.mrb[70].mxu1 }
 0x1c4   : > { %2453 = vmatmul.mubr.bf16.vlgmr.msra.gmra.mrb[48].mxu0 %v7385_v20  ;;  %2839 = vmatmul.mubr.bf16.vlgmr.msra.gmra.mrb[80].mxu1 %v7385_v20  ;;  %v1351_v15 = vmax.f32 %v1217_v34, 0.0  ;;  %v1221_v5 = vadd.f32 %v1220_v7, %v7356_v26  ;;  %v1222_v43 = vpop.f32.mrb[71].mxu1  ;;  %v6764_v34 = vld [vmem:[%s9825_s8 + $0x88] sm:$0xff]  }
 0x1c5   : > { %5918 = vmatpush3.bf16.msra.mxu0 %v6758_v12  ;;  %2462 = vmatprep.mubr.bf16.mxu0 %v7409_v38  ;;  %v1352_v40 = vmax.f32 %v1219_v33, 0.0  ;;  %v1223_v63 = vadd.f32 %v1222_v43, %v7361_v31  ;;  %v6765_v12 = vld [vmem:[%s9825_s8 + $0x50] sm:$0xff]  }
 0x1c6   : > { %2848 = vmatprep.mubr.bf16.mxu1 %v7409_v38  ;;  %6030 = vmatpush3.bf16.msra.mxu1 %v6760_v51  ;;  %v1355_v37 = vmax.f32 %v1221_v5, 0.0  ;;  %v6767_v33 = vld [vmem:[%s9825_s8 + $0xd0] sm:$0xff]  }
 0x1c7   : > { %5919 = vmatprep.subr.bf16.mxu0 %v6761_v61  ;;  %6031 = vmatprep.subr.bf16.mxu1 %v6763_v25  ;;  %v1356_v7 = vmax.f32 %v1223_v63, 0.0  ;;  %v6768_v61 = vld [vmem:[%s9825_s8 + $0x90] sm:$0xff]   ;;  %v6769_v63 = vld [vmem:[%s9825_s8 + $0x58] sm:$0xff]  }
 0x1c8   : > { %v7631_v43 = vpack.c.bf16 %v1355_v37, %v1351_v15 }
 0x1c9   : > { %5920 = vmatpush3.bf16.msra.mxu0 %v6762_v45  ;;  %v7633_v51 = vpack.c.bf16 %v1356_v7, %v1352_v40  ;;  %v1226_v6 = vpop.f32.mrb[72].mxu1  ;;  %v6771_v40 = vld [vmem:[%s9825_s8 + $0xd8] sm:$0xff]  }
 0x1ca   : > { %6032 = vmatpush3.bf16.msra.mxu1 %v6764_v34  ;;  %5921 = vmatprep.subr.bf16.mxu0 %v6765_v12  ;;  %v1227_v25 = vadd.f32 %v1226_v6, %v7356_v26  ;;  %v1228_v5 = vpop.f32.mrb[73].mxu1  ;;  %v6770_v7 = vld [vmem:[%s9825_s8 + $0x18] sm:$0xff]  }
 0x1cb   : > { %6033 = vmatprep.subr.bf16.mxu1 %v6767_v33  ;;  %v1229_v15 = vadd.f32 %v1228_v5, %v7361_v31  ;;  %v1230_v45 = vpop.f32.mrb[74].mxu1 }
 0x1cc   : > { %2463 = vmatmul.mubr.bf16.gmra.mrb[52].mxu0 %v7405_v17  ;;  %2849 = vmatmul.mubr.bf16.gmra.mrb[84].mxu1 %v7405_v17  ;;  %v1359_v34 = vmax.f32 %v1227_v25, 0.0  ;;  %v1231_v6 = vadd.f32 %v1230_v45, %v7356_v26  ;;  %v1232_v12 = vpop.f32.mrb[75].mxu1  ;;  %v6772_v25 = vld [vmem:[%s9825_s8 + $0x98] sm:$0xff]   ;;  %v6773_v45 = vld [vmem:[%s9825_s8 + $0x60] sm:$0xff]  }
 0x1cd   : > { %2472 = vmatprep.mubr.bf16.mxu0 %v7429_v41  ;;  %2858 = vmatprep.mubr.bf16.mxu1 %v7429_v41  ;;  %v1360_v37 = vmax.f32 %v1229_v15, 0.0  ;;  %v1233_v33 = vadd.f32 %v1232_v12, %v7361_v31 }
 0x1ce   : > { %5922 = vmatpush3.bf16.msra.mxu0 %v6766_v22  ;;  %6034 = vmatpush3.bf16.msra.mxu1 %v6768_v61  ;;  %v1363_v5 = vmax.f32 %v1231_v6, 0.0  ;;  %v6775_v22 = vld [vmem:[%s9825_s8 + $0xe0] sm:$0xff]  }
 0x1cf   : > { %5923 = vmatprep.subr.bf16.mxu0 %v6769_v63  ;;  %6035 = vmatprep.subr.bf16.mxu1 %v6771_v40  ;;  %v1364_v61 = vmax.f32 %v1233_v33, 0.0  ;;  %v6774_v63 = vld [vmem:[%s9825_s8 + $0x20] sm:$0xff]   ;;  %v6777_v33 = vld [vmem:[%s9825_s8 + $0x68] sm:$0xff]  }
 0x1d0   : > { %v7667_v15 = vpack.c.bf16 %v1363_v5, %v1359_v34  ;;  %v6776_v40 = vld [vmem:[%s9825_s8 + $0xa0] sm:$0xff]  }
 0x1d1   : > { %v7669_v12 = vpack.c.bf16 %v1364_v61, %v1360_v37  ;;  %v1236_v29 = vpop.f32.mrb[76].mxu1  ;;  %v6778_v61 = vld [vmem:[%s9825_s8 + $0x28] sm:$0xff]  }
 0x1d2   : > { %5924 = vmatpush3.bf16.msra.mxu0 %v6770_v7  ;;  %6036 = vmatpush3.bf16.msra.mxu1 %v6772_v25  ;;  %v1237_v6 = vadd.f32 %v1236_v29, %v7356_v26  ;;  %v1238_v0 = vpop.f32.mrb[77].mxu1  ;;  %v6779_v7 = vld [vmem:[%s9825_s8 + $0xe8] sm:$0xff]  }
 0x1d3   : > { %5925 = vmatprep.subr.bf16.mxu0 %v6773_v45  ;;  %6037 = vmatprep.subr.bf16.mxu1 %v6775_v22  ;;  %v1239_v34 = vadd.f32 %v1238_v0, %v7361_v31  ;;  %v1240_v37 = vpop.f32.mrb[78].mxu1 }
 0x1d4   : > { %2473 = vmatmul.mubr.bf16.gmra.mrb[56].mxu0 %v7425_v48  ;;  %2859 = vmatmul.mubr.bf16.gmra.mrb[88].mxu1 %v7425_v48  ;;  %v1367_v25 = vmax.f32 %v1237_v6, 0.0  ;;  %v1241_v29 = vadd.f32 %v1240_v37, %v7356_v26  ;;  %v1242_v5 = vpop.f32.mrb[79].mxu1  ;;  %v6780_v6 = vld [vmem:[%s9825_s8 + $0xa8] sm:$0xff]   ;;  %v6782_v37 = vld [vmem:[%s9825_s8 + $0x30] sm:$0xff]  }
 0x1d5   : > { %2482 = vmatprep.mubr.bf16.mxu0 %v7449_v60  ;;  %2868 = vmatprep.mubr.bf16.mxu1 %v7449_v60  ;;  %v1368_v0 = vmax.f32 %v1239_v34, 0.0  ;;  %v1243_v45 = vadd.f32 %v1242_v5, %v7361_v31  ;;  %v6781_v34 = vld [vmem:[%s9825_s8 + $0x70] sm:$0xff]   ;;  %v6788_v5 = vld [vmem:[%s9825_s8 + $0xb8] sm:$0xff]  }
 0x1d6   : > { %5926 = vmatpush3.bf16.msra.mxu0 %v6774_v63  ;;  %6038 = vmatpush3.bf16.msra.mxu1 %v6776_v40  ;;  %v1371_v22 = vmax.f32 %v1241_v29, 0.0  ;;  %v6783_v31 = vld [vmem:[%s9825_s8 + $0xf0] sm:$0xff]   ;;  %v6786_v29 = vld [vmem:[%s9825_s8 + $0x38] sm:$0xff]  }
 0x1d7   : > { %v1372_v26 = vmax.f32 %v1243_v45, 0.0  ;;  %5927 = vmatprep.subr.bf16.mxu0 %v6777_v33  ;;  %6039 = vmatprep.subr.bf16.mxu1 %v6779_v7  ;;  %v6784_v33 = vld [vmem:[%s9825_s8 + $0xb0] sm:$0xff]   ;;  %v6785_v7 = vld [vmem:[%s9825_s8 + $0x78] sm:$0xff]  }
 0x1d8   : > { %v7703_v63 = vpack.c.bf16 %v1371_v22, %v1367_v25  ;;  %v6787_v25 = vld [vmem:[%s9825_s8 + $0xf8] sm:$0xff]  }
 0x1d9   : > { %v7705_v40 = vpack.c.bf16 %v1372_v26, %v1368_v0 }
 0x1da   : > { %5928 = vmatpush3.bf16.msra.mxu0 %v6778_v61  ;;  %6040 = vmatpush3.bf16.msra.mxu1 %v6780_v6 }
 0x1db   : > { %5929 = vmatprep.subr.bf16.mxu0 %v6781_v34  ;;  %6041 = vmatprep.subr.bf16.mxu1 %v6783_v31  ;;  %v9932_v34 = vmov 0  }
 0x1dc   : > { %2483 = vmatmul.mubr.bf16.gmra.mrb[60].mxu0 %v7445_v4  ;;  %2869 = vmatmul.mubr.bf16.gmra.mrb[92].mxu1 %v7445_v4 }
 0x1dd   : > { %2492 = vmatprep.mubr.bf16.mxu0 %v7475_v9  ;;  %2878 = vmatprep.mubr.bf16.mxu1 %v7475_v9 }
 0x1de   : > { %5930 = vmatpush3.bf16.msra.mxu0 %v6782_v37  ;;  %6042 = vmatpush3.bf16.msra.mxu1 %v6784_v33 }
 0x1df   : > { %5931 = vmatprep.subr.bf16.mxu0 %v6785_v7  ;;  %6043 = vmatprep.subr.bf16.mxu1 %v6787_v25 }
 0x1e2   : > { %5932 = vmatpush3.bf16.msra.mxu0 %v6786_v29  ;;  %6044 = vmatpush3.bf16.msra.mxu1 %v6788_v5 }
 0x1e4   : > { %2493 = vmatmul.mubr.bf16.gmra.mrb[64].mxu0 %v7471_v39  ;;  %2879 = vmatmul.mubr.bf16.gmra.mrb[96].mxu1 %v7471_v39 }
 0x1e5   : > { %2502 = vmatprep.mubr.bf16.mxu0 %v7495_v55  ;;  %2888 = vmatprep.mubr.bf16.mxu1 %v7495_v55 }
 0x1ec   : > { %2503 = vmatmul.mubr.bf16.gmra.mrb[68].mxu0 %v7491_v59  ;;  %2889 = vmatmul.mubr.bf16.gmra.mrb[100].mxu1 %v7491_v59 }
 0x1ed   : > { %2512 = vmatprep.mubr.bf16.mxu0 %v7515_v10  ;;  %2898 = vmatprep.mubr.bf16.mxu1 %v7515_v10 }
 0x1f4   : > { %2513 = vmatmul.mubr.bf16.gmra.mrb[72].mxu0 %v7511_v58  ;;  %2899 = vmatmul.mubr.bf16.gmra.mrb[104].mxu1 %v7511_v58 }
 0x1f5   : > { %2522 = vmatprep.mubr.bf16.mxu0 %v7535_v56  ;;  %2908 = vmatprep.mubr.bf16.mxu1 %v7535_v56 }
 0x1fc   : > { %2523 = vmatmul.mubr.bf16.gmra.mrb[76].mxu0 %v7531_v28  ;;  %2909 = vmatmul.mubr.bf16.gmra.mrb[108].mxu1 %v7531_v28 }
 0x1fd   : > { %2532 = vmatprep.mubr.bf16.mxu0 %v7549_v1  ;;  %2918 = vmatprep.mubr.bf16.mxu1 %v7549_v1 }
 0x204   : > { %2533 = vmatmul.mubr.bf16.gmra.mrb[80].mxu0 %v7547_v52  ;;  %2919 = vmatmul.mubr.bf16.gmra.mrb[112].mxu1 %v7547_v52 }
 0x205   : > { %2542 = vmatprep.mubr.bf16.mxu0 %v7561_v13  ;;  %2928 = vmatprep.mubr.bf16.mxu1 %v7561_v13 }
 0x20c   : > { %2543 = vmatmul.mubr.bf16.gmra.mrb[84].mxu0 %v7559_v11  ;;  %2929 = vmatmul.mubr.bf16.gmra.mrb[116].mxu1 %v7559_v11 }
 0x20d   : > { %2552 = vmatprep.mubr.bf16.mxu0 %v7573_v8  ;;  %2938 = vmatprep.mubr.bf16.mxu1 %v7573_v8 }
 0x214   : > { %2553 = vmatmul.mubr.bf16.gmra.mrb[88].mxu0 %v7571_v53  ;;  %2939 = vmatmul.mubr.bf16.gmra.mrb[120].mxu1 %v7571_v53 }
 0x215   : > { %2562 = vmatprep.mubr.bf16.mxu0 %v7585_v14  ;;  %2948 = vmatprep.mubr.bf16.mxu1 %v7585_v14 }
 0x21c   : > { %2563 = vmatmul.mubr.bf16.gmra.mrb[92].mxu0 %v7583_v50  ;;  %2949 = vmatmul.mubr.bf16.gmra.mrb[124].mxu1 %v7583_v50 }
 0x21d   : > { %2572 = vmatprep.mubr.bf16.mxu0 %v7600_v19  ;;  %2958 = vmatprep.mubr.bf16.mxu1 %v7600_v19 }
 0x224   : > { %2573 = vmatmul.mubr.bf16.gmra.mrb[96].mxu0 %v7595_v46  ;;  %2959 = vmatmul.mubr.bf16.gmra.mrb[128].mxu1 %v7595_v46 }
 0x225   : > { %2582 = vmatprep.mubr.bf16.mxu0 %v7633_v51  ;;  %2968 = vmatprep.mubr.bf16.mxu1 %v7633_v51 }
 0x22c   : > { %2583 = vmatmul.mubr.bf16.gmra.mrb[100].mxu0 %v7631_v43  ;;  %2969 = vmatmul.mubr.bf16.gmra.mrb[132].mxu1 %v7631_v43 }
 0x22d   : > { %2592 = vmatprep.mubr.bf16.mxu0 %v7669_v12  ;;  %2978 = vmatprep.mubr.bf16.mxu1 %v7669_v12 }
 0x234   : > { %2593 = vmatmul.mubr.bf16.gmra.mrb[104].mxu0 %v7667_v15  ;;  %2979 = vmatmul.mubr.bf16.gmra.mrb[136].mxu1 %v7667_v15 }
 0x235   : > { %2602 = vmatprep.mubr.bf16.mxu0 %v7705_v40  ;;  %2988 = vmatprep.mubr.bf16.mxu1 %v7705_v40 }
 0x23c   : > { %2603 = vmatmul.mubr.bf16.gmra.mrb[108].mxu0 %v7703_v63  ;;  %2989 = vmatmul.mubr.bf16.gmra.mrb[140].mxu1 %v7703_v63 }
 0x23d   : > { %3319 = vmatprep.mubr.bf16.mxu0 %v7295_v24  ;;  %3480 = vmatprep.mubr.bf16.mxu1 %v7389_v35  ;;  %v9888_v24 = vld [vmem:[#allocation19_spill] sm:$0xff] }
 0x244   : > { %3320 = vmatmul.mubr.bf16.vlgmr.msra.gmra.mrb[112].mxu0 %v7291_v21  ;;  %3481 = vmatmul.mubr.bf16.vlgmr.msra.gmra.mrb[144].mxu1 %v7385_v20  ;;  %v9887_v21 = vld [vmem:[#allocation17_spill] sm:$0xff] }
 0x245   : > { %3327 = vmatprep.mubr.bf16.mxu0 %v7315_v2  ;;  %3488 = vmatprep.mubr.bf16.mxu1 %v7409_v38  ;;  %v9891_v2 = vld [vmem:[#allocation20_spill] sm:$0xff] }
 0x24c   : > { %3328 = vmatmul.mubr.bf16.gmra.mrb[116].mxu0 %v7311_v62  ;;  %3489 = vmatmul.mubr.bf16.gmra.mrb[148].mxu1 %v7405_v17  ;;  %v9890_v62 = vld [vmem:[#allocation21_spill] sm:$0xff] }
 0x24d   : > { %3335 = vmatprep.mubr.bf16.mxu0 %v7335_v47  ;;  %3496 = vmatprep.mubr.bf16.mxu1 %v7429_v41  ;;  %v9901_v41 = vld [vmem:[#allocation9_spill] sm:$0xff] }
 0x254   : > { %3336 = vmatmul.mubr.bf16.gmra.mrb[120].mxu0 %v7331_v42  ;;  %3497 = vmatmul.mubr.bf16.gmra.mrb[152].mxu1 %v7425_v48 }
 0x255   : > { %3343 = vmatprep.mubr.bf16.mxu0 %v7367_v36  ;;  %3504 = vmatprep.mubr.bf16.mxu1 %v7449_v60 }
 0x25c   : > { %3344 = vmatmul.mubr.bf16.gmra.mrb[124].mxu0 %v7363_v32  ;;  %3505 = vmatmul.mubr.bf16.gmra.mrb[156].mxu1 %v7445_v4 }
 0x25d   : > { %3351 = vmatprep.mubr.bf16.mxu0 %v7387_v23  ;;  %3512 = vmatprep.mubr.bf16.mxu1 %v7475_v9  ;;  %v9892_v23 = vld [vmem:[#allocation22_spill] sm:$0xff] }
 0x264   : > { %3352 = vmatmul.mubr.bf16.gmra.mrb[128].mxu0 %v7383_v18  ;;  %3513 = vmatmul.mubr.bf16.gmra.mrb[160].mxu1 %v7471_v39 }
 0x265   : > { %3359 = vmatprep.mubr.bf16.mxu0 %v7407_v27  ;;  %3520 = vmatprep.mubr.bf16.mxu1 %v7495_v55 }
 0x26c   : > { %3360 = vmatmul.mubr.bf16.gmra.mrb[132].mxu0 %v7403_v16  ;;  %3521 = vmatmul.mubr.bf16.gmra.mrb[164].mxu1 %v7491_v59 }
 0x26d   : > { %3367 = vmatprep.mubr.bf16.mxu0 %v7427_v30  ;;  %3528 = vmatprep.mubr.bf16.mxu1 %v7515_v10 }
 0x274   : > { %3368 = vmatmul.mubr.bf16.gmra.mrb[136].mxu0 %v7423_v44  ;;  %3529 = vmatmul.mubr.bf16.gmra.mrb[168].mxu1 %v7511_v58  ;;  %v9889_v58 = vld [vmem:[#allocation18_spill] sm:$0xff] }
 0x275   : > { %3375 = vmatprep.mubr.bf16.mxu0 %v7447_v49  ;;  %3536 = vmatprep.mubr.bf16.mxu1 %v7535_v56  ;;  %v9911_v56 = vld [vmem:[#allocation11_spill] sm:$0xff] }
 0x27c   : > { %3376 = vmatmul.mubr.bf16.gmra.mrb[140].mxu0 %v7443_v3  ;;  %3537 = vmatmul.mubr.bf16.gmra.mrb[172].mxu1 %v7531_v28  ;;  %v9902_v3 = vld [vmem:[#allocation12_spill] sm:$0xff] }
 0x27d   : > { %3383 = vmatprep.mubr.bf16.mxu0 %v7473_v54  ;;  %3544 = vmatprep.mubr.bf16.mxu1 %v7549_v1 }
 0x284   : > { %3384 = vmatmul.mubr.bf16.gmra.mrb[144].mxu0 %v9887_v21  ;;  %3545 = vmatmul.mubr.bf16.gmra.mrb[176].mxu1 %v7547_v52  ;;  %v9912_v52 = vld [vmem:[#allocation14_spill] sm:$0xff] }
 0x285   : > { %3391 = vmatprep.mubr.bf16.mxu0 %v9888_v24  ;;  %3552 = vmatprep.mubr.bf16.mxu1 %v7561_v13 }
 0x28c   : > { %3392 = vmatmul.mubr.bf16.gmra.mrb[148].mxu0 %v9889_v58  ;;  %3553 = vmatmul.mubr.bf16.gmra.mrb[180].mxu1 %v7559_v11 }
 0x28d   : > { %3399 = vmatprep.mubr.bf16.mxu0 %v9890_v62  ;;  %3560 = vmatprep.mubr.bf16.mxu1 %v7573_v8 }
 0x294   : > { %3400 = vmatmul.mubr.bf16.gmra.mrb[152].mxu0 %v9891_v2  ;;  %3561 = vmatmul.mubr.bf16.gmra.mrb[184].mxu1 %v7571_v53 }
 0x295   : > { %3407 = vmatprep.mubr.bf16.mxu0 %v7533_v57  ;;  %3568 = vmatprep.mubr.bf16.mxu1 %v7585_v14  ;;  %v9893_v57 = vld [vmem:[#allocation10_spill] sm:$0xff] }
 0x297   : > { %v7821_v42 = vpop.f32.mrb[48].mxu0  ;;  %v7823_v47 = vpop.f32.mrb[80].mxu1 }
 0x298   : > { %v7825_v59 = vpop.f32.mrb[49].mxu0  ;;  %v7827_v4 = vpop.f32.mrb[81].mxu1 }
 0x299   : > { %v7829_v32 = vpop.f32.mrb[50].mxu0  ;;  %v7831_v36 = vpop.f32.mrb[82].mxu1 }
 0x29a   : > { %v7833_v18 = vpop.f32.mrb[51].mxu0  ;;  %v7835_v20 = vpop.f32.mrb[83].mxu1 }
 0x29c   : > { %3408 = vmatmul.mubr.bf16.gmra.mrb[156].mxu0 %v9892_v23  ;;  %3569 = vmatmul.mubr.bf16.gmra.mrb[188].mxu1 %v7583_v50 }
 0x29d   : > { %3415 = vmatprep.mubr.bf16.mxu0 %v9893_v57  ;;  %3576 = vmatprep.mubr.bf16.mxu1 %v7600_v19  ;;  %v9921_v19 = vld [vmem:[#allocation13_spill] sm:$0xff] }
 0x29f   : > { %v7841_v35 = vpop.f32.mrb[52].mxu0  ;;  %v7843_v16 = vpop.f32.mrb[84].mxu1 }
 0x2a0   : > { %9894 = vst [vmem:[#allocation17_spill] sm:$0xff] %v7843_v16  ;;  %v7845_v17 = vpop.f32.mrb[53].mxu0  ;;  %v7847_v27 = vpop.f32.mrb[85].mxu1 }
 0x2a1   : > { %9895 = vst [vmem:[#allocation19_spill] sm:$0xff] %v7845_v17  ;;  %9896 = vst [vmem:[#allocation18_spill] sm:$0xff] %v7847_v27  ;;  %v7849_v38 = vpop.f32.mrb[54].mxu0  ;;  %v7851_v44 = vpop.f32.mrb[86].mxu1  ;;  %v3094_v27 = vld [vmem:[%s8104_s16 + $0xf8] sm:$0xff] }
 0x2a2   : > { %9897 = vst [vmem:[#allocation21_spill] sm:$0xff] %v7849_v38  ;;  %9898 = vst [vmem:[#allocation20_spill] sm:$0xff] %v7851_v44  ;;  %v7853_v48 = vpop.f32.mrb[55].mxu0  ;;  %v7855_v30 = vpop.f32.mrb[87].mxu1  ;;  %v3092_v44 = vld [vmem:[%s8104_s16 + $0xe8] sm:$0xff] }
 0x2a3   : > { %9899 = vst [vmem:[#allocation22_spill] sm:$0xff] %v7853_v48  ;;  %9900 = vst [vmem:[#allocation10_spill] sm:$0xff] %v7855_v30 }
 0x2a4   : > { %3416 = vmatmul.mubr.bf16.gmra.mrb[160].mxu0 %v9901_v41  ;;  %3577 = vmatmul.mubr.bf16.gmra.mrb[192].mxu1 %v7595_v46 }
 0x2a5   : > { %3423 = vmatprep.mubr.bf16.mxu0 %v9902_v3  ;;  %3584 = vmatprep.mubr.bf16.mxu1 %v7633_v51 }
 0x2a7   : > { %v7861_v49 = vpop.f32.mrb[56].mxu0  ;;  %v7863_v60 = vpop.f32.mrb[88].mxu1 }
 0x2a8   : > { %9903 = vst [vmem:[#allocation9_spill] sm:$0xff] %v7861_v49  ;;  %9904 = vst [vmem:[#allocation12_spill] sm:$0xff] %v7863_v60  ;;  %v7865_v39 = vpop.f32.mrb[57].mxu0  ;;  %v7867_v54 = vpop.f32.mrb[89].mxu1 }
 0x2a9   : > { %9905 = vst [vmem:[#allocation23_spill] sm:$0xff] %v7865_v39  ;;  %9906 = vst [vmem:[#allocation24_spill] sm:$0xff] %v7867_v54  ;;  %v7869_v9 = vpop.f32.mrb[58].mxu0  ;;  %v7871_v28 = vpop.f32.mrb[90].mxu1 }
 0x2aa   : > { %9907 = vst [vmem:[#allocation25_spill] sm:$0xff] %v7869_v9  ;;  %9908 = vst [vmem:[#allocation26_spill] sm:$0xff] %v7871_v28  ;;  %v7873_v55 = vpop.f32.mrb[59].mxu0  ;;  %v7875_v10 = vpop.f32.mrb[91].mxu1 }
 0x2ab   : > { %9909 = vst [vmem:[#allocation27_spill] sm:$0xff] %v7873_v55  ;;  %9910 = vst [vmem:[#allocation28_spill] sm:$0xff] %v7875_v10 }
 0x2ac   : > { %3424 = vmatmul.mubr.bf16.gmra.mrb[164].mxu0 %v9911_v56  ;;  %3585 = vmatmul.mubr.bf16.gmra.mrb[196].mxu1 %v7631_v43  ;;  %v9922_v43 = vld [vmem:[#allocation16_spill] sm:$0xff] }
 0x2ad   : > { %3431 = vmatprep.mubr.bf16.mxu0 %v9912_v52  ;;  %3592 = vmatprep.mubr.bf16.mxu1 %v7669_v12 }
 0x2af   : > { %v7881_v1 = vpop.f32.mrb[60].mxu0  ;;  %v7883_v11 = vpop.f32.mrb[92].mxu1 }
 0x2b0   : > { %9913 = vst [vmem:[#allocation11_spill] sm:$0xff] %v7881_v1  ;;  %9914 = vst [vmem:[#allocation14_spill] sm:$0xff] %v7883_v11  ;;  %v7885_v13 = vpop.f32.mrb[61].mxu0  ;;  %v7887_v53 = vpop.f32.mrb[93].mxu1 }
 0x2b1   : > { %9915 = vst [vmem:[#allocation29_spill] sm:$0xff] %v7885_v13  ;;  %9916 = vst [vmem:[#allocation30_spill] sm:$0xff] %v7887_v53  ;;  %v7889_v8 = vpop.f32.mrb[62].mxu0  ;;  %v7891_v50 = vpop.f32.mrb[94].mxu1 }
 0x2b2   : > { %9917 = vst [vmem:[#allocation31_spill] sm:$0xff] %v7889_v8  ;;  %9918 = vst [vmem:[#allocation32_spill] sm:$0xff] %v7891_v50  ;;  %v7893_v14 = vpop.f32.mrb[63].mxu0  ;;  %v7895_v46 = vpop.f32.mrb[95].mxu1 }
 0x2b3   : > { %9919 = vst [vmem:[#allocation33_spill] sm:$0xff] %v7893_v14  ;;  %9920 = vst [vmem:[#allocation34_spill] sm:$0xff] %v7895_v46 }
 0x2b4   : > { %3432 = vmatmul.mubr.bf16.gmra.mrb[168].mxu0 %v9921_v19  ;;  %3593 = vmatmul.mubr.bf16.gmra.mrb[200].mxu1 %v7667_v15  ;;  %v9931_v15 = vld [vmem:[#allocation15_spill] sm:$0xff] }
 0x2b5   : > { %3439 = vmatprep.mubr.bf16.mxu0 %v9922_v43  ;;  %3600 = vmatprep.mubr.bf16.mxu1 %v7705_v40 }
 0x2b7   : > { %v7901_v51 = vpop.f32.mrb[64].mxu0  ;;  %v7903_v12 = vpop.f32.mrb[96].mxu1 }
 0x2b8   : > { %9923 = vst [vmem:[#allocation13_spill] sm:$0xff] %v7901_v51  ;;  %9924 = vst [vmem:[#allocation16_spill] sm:$0xff] %v7903_v12  ;;  %v7905_v0 = vpop.f32.mrb[65].mxu0  ;;  %v7907_v45 = vpop.f32.mrb[97].mxu1 }
 0x2b9   : > { %9925 = vst [vmem:[#allocation35_spill] sm:$0xff] %v7905_v0  ;;  %9926 = vst [vmem:[#allocation36_spill] sm:$0xff] %v7907_v45  ;;  %v7909_v22 = vpop.f32.mrb[66].mxu0  ;;  %v7911_v61 = vpop.f32.mrb[98].mxu1 }
 0x2ba   : > { %9927 = vst [vmem:[#allocation37_spill] sm:$0xff] %v7909_v22  ;;  %9928 = vst [vmem:[#allocation38_spill] sm:$0xff] %v7911_v61  ;;  %v7913_v6 = vpop.f32.mrb[67].mxu0  ;;  %v7915_v26 = vpop.f32.mrb[99].mxu1 }
 0x2bb   : > { %9929 = vst [vmem:[#allocation39_spill] sm:$0xff] %v7913_v6  ;;  %9930 = vst [vmem:[#allocation40_spill] sm:$0xff] %v7915_v26 }
 0x2bc   : > { %3440 = vmatmul.mubr.bf16.gmra.mrb[172].mxu0 %v9931_v15  ;;  %3601 = vmatmul.mubr.bf16.gmra.mrb[204].mxu1 %v7703_v63 }
 0x2bd   : > { %4402 = vmatprep.mubr.bf16.mxu0 %v9932_v34  ;;  %4595 = vmatprep.mubr.bf16.mxu1 %v9932_v34 }
 0x2bf   : > { %v7921_v31 = vpop.f32.mrb[68].mxu0  ;;  %v7923_v40 = vpop.f32.mrb[100].mxu1 }
 0x2c0   : > { %9933 = vst [vmem:[#allocation15_spill] sm:$0xff] %v7921_v31  ;;  %9934 = vst [vmem:[#allocation41_spill] sm:$0xff] %v7923_v40  ;;  %v7925_v37 = vpop.f32.mrb[69].mxu0  ;;  %v7927_v33 = vpop.f32.mrb[101].mxu1 }
 0x2c1   : > { %9935 = vst [vmem:[#allocation42_spill] sm:$0xff] %v7925_v37  ;;  %9936 = vst [vmem:[#allocation43_spill] sm:$0xff] %v7927_v33  ;;  %v7929_v7 = vpop.f32.mrb[70].mxu0  ;;  %v7931_v25 = vpop.f32.mrb[102].mxu1 }
 0x2c2   : > { %9937 = vst [vmem:[#allocation44_spill] sm:$0xff] %v7929_v7  ;;  %9938 = vst [vmem:[#allocation45_spill] sm:$0xff] %v7931_v25  ;;  %v7933_v29 = vpop.f32.mrb[71].mxu0  ;;  %v7935_v5 = vpop.f32.mrb[103].mxu1 }
 0x2c3   : > { %9939 = vst [vmem:[#allocation46_spill] sm:$0xff] %v7933_v29  ;;  %9940 = vst [vmem:[#allocation47_spill] sm:$0xff] %v7935_v5 }
 0x2c7   : > { %v7937_v63 = vpop.f32.mrb[72].mxu0  ;;  %v7939_v21 = vpop.f32.mrb[104].mxu1 }
 0x2c8   : > { %9941 = vst [vmem:[#allocation48_spill] sm:$0xff] %v7937_v63  ;;  %9942 = vst [vmem:[#allocation49_spill] sm:$0xff] %v7939_v21  ;;  %v7941_v24 = vpop.f32.mrb[73].mxu0  ;;  %v7943_v58 = vpop.f32.mrb[105].mxu1 }
 0x2c9   : > { %9943 = vst [vmem:[#allocation50_spill] sm:$0xff] %v7941_v24  ;;  %9944 = vst [vmem:[#allocation51_spill] sm:$0xff] %v7943_v58  ;;  %v7945_v62 = vpop.f32.mrb[74].mxu0  ;;  %v7947_v2 = vpop.f32.mrb[106].mxu1 }
 0x2ca   : > { %9945 = vst [vmem:[#allocation52_spill] sm:$0xff] %v7945_v62  ;;  %9946 = vst [vmem:[#allocation53_spill] sm:$0xff] %v7947_v2  ;;  %v7949_v23 = vpop.f32.mrb[75].mxu0  ;;  %v7951_v57 = vpop.f32.mrb[107].mxu1 }
 0x2cb   : > { %9947 = vst [vmem:[#allocation54_spill] sm:$0xff] %v7949_v23  ;;  %9948 = vst [vmem:[#allocation55_spill] sm:$0xff] %v7951_v57 }
 0x2cf   : > { %v7953_v41 = vpop.f32.mrb[76].mxu0  ;;  %v7955_v3 = vpop.f32.mrb[108].mxu1 }
 0x2d0   : > { %9949 = vst [vmem:[#allocation56_spill] sm:$0xff] %v7953_v41  ;;  %9950 = vst [vmem:[#allocation57_spill] sm:$0xff] %v7955_v3  ;;  %v7957_v56 = vpop.f32.mrb[77].mxu0  ;;  %v7959_v52 = vpop.f32.mrb[109].mxu1 }
 0x2d1   : > { %9951 = vst [vmem:[#allocation58_spill] sm:$0xff] %v7957_v56  ;;  %9952 = vst [vmem:[#allocation59_spill] sm:$0xff] %v7959_v52  ;;  %v7961_v19 = vpop.f32.mrb[78].mxu0  ;;  %v7963_v43 = vpop.f32.mrb[110].mxu1 }
 0x2d2   : > { %9953 = vst [vmem:[#allocation60_spill] sm:$0xff] %v7961_v19  ;;  %9954 = vst [vmem:[#allocation61_spill] sm:$0xff] %v7963_v43  ;;  %v7965_v15 = vpop.f32.mrb[79].mxu0  ;;  %v7967_v62 = vpop.f32.mrb[111].mxu1 }
 0x2d3   : > { %9955 = vst [vmem:[#allocation62_spill] sm:$0xff] %v7965_v15  ;;  %9956 = vst [vmem:[#allocation63_spill] sm:$0xff] %v7967_v62 }
 0x2d7   : > { %v7969_v2 = vpop.f32.mrb[80].mxu0  ;;  %v7971_v23 = vpop.f32.mrb[112].mxu1 }
 0x2d8   : > { %9957 = vst [vmem:[#allocation64_spill] sm:$0xff] %v7969_v2  ;;  %9958 = vst [vmem:[#allocation65_spill] sm:$0xff] %v7971_v23  ;;  %v7973_v57 = vpop.f32.mrb[81].mxu0  ;;  %v7975_v41 = vpop.f32.mrb[113].mxu1 }
 0x2d9   : > { %9959 = vst [vmem:[#allocation66_spill] sm:$0xff] %v7973_v57  ;;  %9960 = vst [vmem:[#allocation67_spill] sm:$0xff] %v7975_v41  ;;  %v7977_v3 = vpop.f32.mrb[82].mxu0  ;;  %v7979_v56 = vpop.f32.mrb[114].mxu1 }
 0x2da   : > { %9961 = vst [vmem:[#allocation68_spill] sm:$0xff] %v7977_v3  ;;  %9962 = vst [vmem:[#allocation69_spill] sm:$0xff] %v7979_v56  ;;  %v7981_v52 = vpop.f32.mrb[83].mxu0  ;;  %v7983_v19 = vpop.f32.mrb[115].mxu1 }
 0x2db   : > { %9963 = vst [vmem:[#allocation70_spill] sm:$0xff] %v7981_v52  ;;  %9964 = vst [vmem:[#allocation71_spill] sm:$0xff] %v7983_v19 }
 0x2df   : > { %v7985_v43 = vpop.f32.mrb[84].mxu0  ;;  %v7987_v15 = vpop.f32.mrb[116].mxu1 }
 0x2e0   : > { %9965 = vst [vmem:[#allocation72_spill] sm:$0xff] %v7985_v43  ;;  %9966 = vst [vmem:[#allocation73_spill] sm:$0xff] %v7987_v15  ;;  %v7989_v62 = vpop.f32.mrb[85].mxu0  ;;  %v7991_v2 = vpop.f32.mrb[117].mxu1 }
 0x2e1   : > { %9967 = vst [vmem:[#allocation74_spill] sm:$0xff] %v7989_v62  ;;  %9968 = vst [vmem:[#allocation75_spill] sm:$0xff] %v7991_v2  ;;  %v7993_v23 = vpop.f32.mrb[86].mxu0  ;;  %v7995_v57 = vpop.f32.mrb[118].mxu1 }
 0x2e2   : > { %9969 = vst [vmem:[#allocation76_spill] sm:$0xff] %v7993_v23  ;;  %9970 = vst [vmem:[#allocation77_spill] sm:$0xff] %v7995_v57  ;;  %v7997_v41 = vpop.f32.mrb[87].mxu0  ;;  %v7999_v3 = vpop.f32.mrb[119].mxu1 }
 0x2e3   : > { %9971 = vst [vmem:[#allocation78_spill] sm:$0xff] %v7997_v41  ;;  %9972 = vst [vmem:[#allocation79_spill] sm:$0xff] %v7999_v3 }
 0x2e7   : > { %v8001_v56 = vpop.f32.mrb[88].mxu0  ;;  %v8003_v52 = vpop.f32.mrb[120].mxu1 }
 0x2e8   : > { %9973 = vst [vmem:[#allocation80_spill] sm:$0xff] %v8001_v56  ;;  %9974 = vst [vmem:[#allocation81_spill] sm:$0xff] %v8003_v52  ;;  %v8005_v19 = vpop.f32.mrb[89].mxu0  ;;  %v8007_v43 = vpop.f32.mrb[121].mxu1 }
 0x2e9   : > { %9975 = vst [vmem:[#allocation82_spill] sm:$0xff] %v8005_v19  ;;  %9976 = vst [vmem:[#allocation83_spill] sm:$0xff] %v8007_v43  ;;  %v8009_v15 = vpop.f32.mrb[90].mxu0  ;;  %v8011_v62 = vpop.f32.mrb[122].mxu1 }
 0x2ea   : > { %9977 = vst [vmem:[#allocation84_spill] sm:$0xff] %v8009_v15  ;;  %9978 = vst [vmem:[#allocation85_spill] sm:$0xff] %v8011_v62  ;;  %v8013_v2 = vpop.f32.mrb[91].mxu0  ;;  %v8015_v23 = vpop.f32.mrb[123].mxu1 }
 0x2eb   : > { %9979 = vst [vmem:[#allocation86_spill] sm:$0xff] %v8013_v2  ;;  %9980 = vst [vmem:[#allocation87_spill] sm:$0xff] %v8015_v23 }
 0x2ef   : > { %v8017_v57 = vpop.f32.mrb[92].mxu0  ;;  %v8019_v41 = vpop.f32.mrb[124].mxu1 }
 0x2f0   : > { %9981 = vst [vmem:[#allocation88_spill] sm:$0xff] %v8017_v57  ;;  %9982 = vst [vmem:[#allocation89_spill] sm:$0xff] %v8019_v41  ;;  %v8021_v3 = vpop.f32.mrb[93].mxu0  ;;  %v8023_v56 = vpop.f32.mrb[125].mxu1 }
 0x2f1   : > { %9983 = vst [vmem:[#allocation90_spill] sm:$0xff] %v8021_v3  ;;  %9984 = vst [vmem:[#allocation91_spill] sm:$0xff] %v8023_v56  ;;  %v8025_v52 = vpop.f32.mrb[94].mxu0  ;;  %v8027_v19 = vpop.f32.mrb[126].mxu1 }
 0x2f2   : > { %9985 = vst [vmem:[#allocation92_spill] sm:$0xff] %v8025_v52  ;;  %9986 = vst [vmem:[#allocation93_spill] sm:$0xff] %v8027_v19  ;;  %v8029_v43 = vpop.f32.mrb[95].mxu0  ;;  %v8031_v15 = vpop.f32.mrb[127].mxu1 }
 0x2f3   : > { %9987 = vst [vmem:[#allocation94_spill] sm:$0xff] %v8029_v43  ;;  %9988 = vst [vmem:[#allocation95_spill] sm:$0xff] %v8031_v15 }
 0x2f7   : > { %v8033_v62 = vpop.f32.mrb[96].mxu0  ;;  %v8035_v2 = vpop.f32.mrb[128].mxu1 }
 0x2f8   : > { %9989 = vst [vmem:[#allocation96_spill] sm:$0xff] %v8033_v62  ;;  %9990 = vst [vmem:[#allocation97_spill] sm:$0xff] %v8035_v2  ;;  %v8037_v23 = vpop.f32.mrb[97].mxu0  ;;  %v8039_v57 = vpop.f32.mrb[129].mxu1 }
 0x2f9   : > { %9991 = vst [vmem:[#allocation98_spill] sm:$0xff] %v8037_v23  ;;  %9992 = vst [vmem:[#allocation99_spill] sm:$0xff] %v8039_v57  ;;  %v8041_v41 = vpop.f32.mrb[98].mxu0  ;;  %v8043_v3 = vpop.f32.mrb[130].mxu1 }
 0x2fa   : > { %9993 = vst [vmem:[#allocation100_spill] sm:$0xff] %v8041_v41  ;;  %9994 = vst [vmem:[#allocation101_spill] sm:$0xff] %v8043_v3  ;;  %v8045_v56 = vpop.f32.mrb[99].mxu0  ;;  %v8047_v52 = vpop.f32.mrb[131].mxu1 }
 0x2fb   : > { %9995 = vst [vmem:[#allocation102_spill] sm:$0xff] %v8045_v56  ;;  %9996 = vst [vmem:[#allocation103_spill] sm:$0xff] %v8047_v52 }
 0x2ff   : > { %v8049_v19 = vpop.f32.mrb[100].mxu0  ;;  %v8051_v43 = vpop.f32.mrb[132].mxu1 }
 0x300   : > { %9997 = vst [vmem:[#allocation104_spill] sm:$0xff] %v8049_v19  ;;  %9998 = vst [vmem:[#allocation105_spill] sm:$0xff] %v8051_v43  ;;  %v8053_v15 = vpop.f32.mrb[101].mxu0  ;;  %v8055_v62 = vpop.f32.mrb[133].mxu1 }
 0x301   : > { %9999 = vst [vmem:[#allocation106_spill] sm:$0xff] %v8053_v15  ;;  %10000 = vst [vmem:[#allocation107_spill] sm:$0xff] %v8055_v62  ;;  %v8057_v2 = vpop.f32.mrb[102].mxu0  ;;  %v8059_v23 = vpop.f32.mrb[134].mxu1 }
 0x302   : > { %10001 = vst [vmem:[#allocation108_spill] sm:$0xff] %v8057_v2  ;;  %10002 = vst [vmem:[#allocation109_spill] sm:$0xff] %v8059_v23  ;;  %v8061_v57 = vpop.f32.mrb[103].mxu0  ;;  %v8063_v41 = vpop.f32.mrb[135].mxu1 }
 0x303   : > { %10003 = vst [vmem:[#allocation110_spill] sm:$0xff] %v8061_v57  ;;  %10004 = vst [vmem:[#allocation111_spill] sm:$0xff] %v8063_v41 }
 0x307   : > { %v8065_v3 = vpop.f32.mrb[104].mxu0  ;;  %v8067_v52 = vpop.f32.mrb[136].mxu1 }
 0x308   : > { %10005 = vst [vmem:[#allocation112_spill] sm:$0xff] %v8065_v3  ;;  %10006 = vst [vmem:[#allocation113_spill] sm:$0xff] %v8067_v52  ;;  %v8069_v19 = vpop.f32.mrb[105].mxu0  ;;  %v8071_v43 = vpop.f32.mrb[137].mxu1 }
 0x309   : > { %10007 = vst [vmem:[#allocation114_spill] sm:$0xff] %v8069_v19  ;;  %10008 = vst [vmem:[#allocation115_spill] sm:$0xff] %v8071_v43  ;;  %v8073_v15 = vpop.f32.mrb[106].mxu0  ;;  %v8075_v62 = vpop.f32.mrb[138].mxu1 }
 0x30a   : > { %10009 = vst [vmem:[#allocation116_spill] sm:$0xff] %v8073_v15  ;;  %10010 = vst [vmem:[#allocation117_spill] sm:$0xff] %v8075_v62  ;;  %v8077_v2 = vpop.f32.mrb[107].mxu0  ;;  %v8079_v23 = vpop.f32.mrb[139].mxu1 }
 0x30b   : > { %10011 = vst [vmem:[#allocation118_spill] sm:$0xff] %v8077_v2  ;;  %10012 = vst [vmem:[#allocation119_spill] sm:$0xff] %v8079_v23  ;;  %v3064_v2 = vld [vmem:[%s8104_s16 + $0x8] sm:$0xff] }
 0x30f   : > { %v8081_v57 = vpop.f32.mrb[108].mxu0  ;;  %v8083_v41 = vpop.f32.mrb[140].mxu1 }
 0x310   : > { %10013 = vst [vmem:[#allocation120_spill] sm:$0xff] %v8081_v57  ;;  %10014 = vst [vmem:[#allocation121_spill] sm:$0xff] %v8083_v41  ;;  %v8085_v3 = vpop.f32.mrb[109].mxu0  ;;  %v8087_v56 = vpop.f32.mrb[141].mxu1  ;;  %v3063_v41 = vld [vmem:[%s8104_s16] sm:$0xff] }
 0x311   : > { %10015 = vst [vmem:[#allocation122_spill] sm:$0xff] %v8085_v3  ;;  %10016 = vst [vmem:[#allocation123_spill] sm:$0xff] %v8087_v56  ;;  %v8089_v52 = vpop.f32.mrb[110].mxu0  ;;  %v8091_v19 = vpop.f32.mrb[142].mxu1 }
 0x312   : > { %10017 = vst [vmem:[#allocation124_spill] sm:$0xff] %v8089_v52  ;;  %10018 = vst [vmem:[#allocation125_spill] sm:$0xff] %v8091_v19  ;;  %v8093_v43 = vpop.f32.mrb[111].mxu0  ;;  %v8095_v15 = vpop.f32.mrb[143].mxu1 }
 0x313   : > { %10019 = vst [vmem:[#allocation126_spill] sm:$0xff] %v8093_v43  ;;  %10020 = vst [vmem:[#allocation127_spill] sm:$0xff] %v8095_v15 }
 0x317   : > { %v5933_v3 = vpop.f32.mrb[112].mxu0  ;;  %v6045_v56 = vpop.f32.mrb[144].mxu1 }
 0x318   : > { %v5934_v52 = vpop.f32.mrb[113].mxu0  ;;  %v6046_v57 = vpop.f32.mrb[145].mxu1 }
 0x319   : > { %v5935_v19 = vadd.f32 %v5934_v52, %v5933_v3  ;;  %v6047_v23 = vadd.f32 %v6046_v57, %v6045_v56  ;;  %v5936_v43 = vpop.f32.mrb[114].mxu0  ;;  %v6048_v15 = vpop.f32.mrb[146].mxu1  ;;  %v3065_v56 = vld [vmem:[%s8104_s16 + $0x10] sm:$0xff] }
 0x31a   : > { %v5937_v62 = vpop.f32.mrb[115].mxu0  ;;  %v6049_v58 = vpop.f32.mrb[147].mxu1 }
 0x31b   : > { %v3322_v24 = vadd.f32 %v5935_v19, %v3063_v41  ;;  %v5938_v21 = vadd.f32 %v5937_v62, %v5936_v43  ;;  %v6050_v63 = vadd.f32 %v6049_v58, %v6048_v15  ;;  %v3066_v19 = vld [vmem:[%s8104_s16 + $0x18] sm:$0xff] }
 0x31d   : > { %v3325_v5 = vadd.f32 %v5938_v21, %v3064_v2  ;;  %v8108_v29 = vadd.f32 %v6047_v23, %v3322_v24 }
 0x31f   : > { %v5939_v25 = vpop.f32.mrb[116].mxu0  ;;  %v6051_v7 = vpop.f32.mrb[148].mxu1  ;;  %v3610_v3 = vsel %vm3609_vm0, %v8108_v29, -inf  ;;  %v8112_v57 = vadd.f32 %v6050_v63, %v3325_v5 }
 0x320   : > { %v5940_v52 = vpop.f32.mrb[117].mxu0  ;;  %v6052_v33 = vpop.f32.mrb[149].mxu1  ;;  %3611 = vmax.xlane.f32.xlu0 %v3610_v3 }
 0x321   : > { %v5941_v37 = vadd.f32 %v5940_v52, %v5939_v25  ;;  %v6053_v41 = vadd.f32 %v6052_v33, %v6051_v7  ;;  %v5942_v62 = vpop.f32.mrb[118].mxu0  ;;  %v6054_v58 = vpop.f32.mrb[150].mxu1  ;;  %v3613_v15 = vsel %vm3609_vm0, %v8112_v57, -inf  ;;  %v3067_v52 = vld [vmem:[%s8104_s16 + $0x20] sm:$0xff] }
 0x322   : > { %v5943_v21 = vpop.f32.mrb[119].mxu0  ;;  %v6055_v24 = vpop.f32.mrb[151].mxu1 }
 0x323   : > { %v3330_v2 = vadd.f32 %v5941_v37, %v3065_v56  ;;  %v5944_v23 = vadd.f32 %v5943_v21, %v5942_v62  ;;  %v6056_v43 = vadd.f32 %v6055_v24, %v6054_v58  ;;  %v3068_v24 = vld [vmem:[%s8104_s16 + $0x28] sm:$0xff] }
 0x324   : > { %3614 = vmax.xlane.f32.xlu0 %v3613_v15 }
 0x325   : > { %v3333_v5 = vadd.f32 %v5944_v23, %v3066_v19  ;;  %v8118_v63 = vadd.f32 %v6053_v41, %v3330_v2 }
 0x327   : > { %v5945_v3 = vpop.f32.mrb[120].mxu0  ;;  %v6057_v25 = vpop.f32.mrb[152].mxu1  ;;  %v3616_v33 = vsel %vm3609_vm0, %v8118_v63, -inf  ;;  %v8122_v7 = vadd.f32 %v6056_v43, %v3333_v5 }
 0x328   : > { %v5946_v40 = vpop.f32.mrb[121].mxu0  ;;  %v6058_v37 = vpop.f32.mrb[153].mxu1  ;;  %3617 = vmax.xlane.f32.xlu1 %v3616_v33 }
 0x329   : > { %v5947_v56 = vadd.f32 %v5946_v40, %v5945_v3  ;;  %v6059_v62 = vadd.f32 %v6058_v37, %v6057_v25  ;;  %v5948_v58 = vpop.f32.mrb[122].mxu0  ;;  %v6060_v21 = vpop.f32.mrb[154].mxu1  ;;  %v3619_v31 = vsel %vm3609_vm0, %v8122_v7, -inf  ;;  %v3069_v37 = vld [vmem:[%s8104_s16 + $0x30] sm:$0xff] }
 0x32a   : > { %v5949_v19 = vpop.f32.mrb[123].mxu0  ;;  %v6061_v41 = vpop.f32.mrb[155].mxu1 }
 0x32b   : > { %v3338_v2 = vadd.f32 %v5947_v56, %v3067_v52  ;;  %v5950_v23 = vadd.f32 %v5949_v19, %v5948_v58  ;;  %v6062_v15 = vadd.f32 %v6061_v41, %v6060_v21 }
 0x32c   : > { %3620 = vmax.xlane.f32.xlu1 %v3619_v31 }
 0x32d   : > { %v3341_v43 = vadd.f32 %v5950_v23, %v3068_v24  ;;  %v8128_v5 = vadd.f32 %v6059_v62, %v3338_v2  ;;  %v3070_v24 = vld [vmem:[%s8104_s16 + $0x38] sm:$0xff] }
 0x32f   : > { %v5951_v33 = vpop.f32.mrb[124].mxu0  ;;  %v6063_v40 = vpop.f32.mrb[156].mxu1  ;;  %v3622_v3 = vsel %vm3609_vm0, %v8128_v5, -inf  ;;  %v8132_v25 = vadd.f32 %v6062_v15, %v3341_v43 }
 0x330   : > { %v5952_v26 = vpop.f32.mrb[125].mxu0  ;;  %v6064_v52 = vpop.f32.mrb[157].mxu1  ;;  %3623 = vmax.xlane.f32.xlu0 %v3622_v3 }
 0x331   : > { %v5953_v56 = vadd.f32 %v5952_v26, %v5951_v33  ;;  %v6065_v58 = vadd.f32 %v6064_v52, %v6063_v40  ;;  %v5954_v21 = vpop.f32.mrb[126].mxu0  ;;  %v6066_v31 = vpop.f32.mrb[158].mxu1  ;;  %v3625_v62 = vsel %vm3609_vm0, %v8132_v25, -inf  ;;  %v3071_v52 = vld [vmem:[%s8104_s16 + $0x40] sm:$0xff] }
 0x332   : > { %v5955_v19 = vpop.f32.mrb[127].mxu0  ;;  %v6067_v41 = vpop.f32.mrb[159].mxu1  ;;  %3626 = vmax.xlane.f32.xlu1 %v3625_v62 }
 0x333   : > { %v3346_v2 = vadd.f32 %v5953_v56, %v3069_v37  ;;  %v5956_v23 = vadd.f32 %v5955_v19, %v5954_v21  ;;  %v6068_v15 = vadd.f32 %v6067_v41, %v6066_v31  ;;  %v3072_v21 = vld [vmem:[%s8104_s16 + $0x48] sm:$0xff] }
 0x335   : > { %v3349_v43 = vadd.f32 %v5956_v23, %v3070_v24  ;;  %v8138_v6 = vadd.f32 %v6065_v58, %v3346_v2 }
 0x337   : > { %v5957_v3 = vpop.f32.mrb[128].mxu0  ;;  %v6069_v26 = vpop.f32.mrb[160].mxu1  ;;  %v3628_v33 = vsel %vm3609_vm0, %v8138_v6, -inf  ;;  %v8142_v40 = vadd.f32 %v6068_v15, %v3349_v43 }
 0x338   : > { %v5958_v61 = vpop.f32.mrb[129].mxu0  ;;  %v6070_v22 = vpop.f32.mrb[161].mxu1  ;;  %3629 = vmax.xlane.f32.xlu0 %v3628_v33 }
 0x339   : > { %v5959_v45 = vadd.f32 %v5958_v61, %v5957_v3  ;;  %v6071_v62 = vadd.f32 %v6070_v22, %v6069_v26  ;;  %v5960_v37 = vpop.f32.mrb[130].mxu0  ;;  %v6072_v56 = vpop.f32.mrb[162].mxu1  ;;  %v3631_v58 = vsel %vm3609_vm0, %v8142_v40, -inf  ;;  %v3073_v26 = vld [vmem:[%s8104_s16 + $0x50] sm:$0xff] }
 0x33a   : > { %v5961_v31 = vpop.f32.mrb[131].mxu0  ;;  %v6073_v24 = vpop.f32.mrb[163].mxu1  ;;  %3632 = vmax.xlane.f32.xlu1 %v3631_v58 }
 0x33b   : > { %v3354_v19 = vadd.f32 %v5959_v45, %v3071_v52  ;;  %v5962_v41 = vadd.f32 %v5961_v31, %v5960_v37  ;;  %v6074_v2 = vadd.f32 %v6073_v24, %v6072_v56  ;;  %v3074_v37 = vld [vmem:[%s8104_s16 + $0x58] sm:$0xff] }
 0x33d   : > { %v3357_v23 = vadd.f32 %v5962_v41, %v3072_v21  ;;  %v8148_v15 = vadd.f32 %v6071_v62, %v3354_v19 }
 0x33f   : > { %v5963_v43 = vpop.f32.mrb[132].mxu0  ;;  %v6075_v61 = vpop.f32.mrb[164].mxu1  ;;  %v3634_v22 = vsel %vm3609_vm0, %v8148_v15, -inf  ;;  %v8152_v3 = vadd.f32 %v6074_v2, %v3357_v23 }
 0x340   : > { %v5964_v33 = vpop.f32.mrb[133].mxu0  ;;  %v6076_v0 = vpop.f32.mrb[165].mxu1  ;;  %3635 = vmax.xlane.f32.xlu0 %v3634_v22  ;;  %v3075_v22 = vld [vmem:[%s8104_s16 + $0x60] sm:$0xff] }
 0x341   : > { %v5965_v12 = vadd.f32 %v5964_v33, %v5963_v43  ;;  %v6077_v58 = vadd.f32 %v6076_v0, %v6075_v61  ;;  %v5966_v45 = vpop.f32.mrb[134].mxu0  ;;  %v6078_v52 = vpop.f32.mrb[166].mxu1  ;;  %v3637_v62 = vsel %vm3609_vm0, %v8152_v3, -inf }
 0x342   : > { %v5967_v56 = vpop.f32.mrb[135].mxu0  ;;  %v6079_v21 = vpop.f32.mrb[167].mxu1  ;;  %3638 = vmax.xlane.f32.xlu1 %v3637_v62 }
 0x343   : > { %v3362_v31 = vadd.f32 %v5965_v12, %v3073_v26  ;;  %v5968_v24 = vadd.f32 %v5967_v56, %v5966_v45  ;;  %v6080_v19 = vadd.f32 %v6079_v21, %v6078_v52  ;;  %v3076_v45 = vld [vmem:[%s8104_s16 + $0x68] sm:$0xff] }
 0x345   : > { %v3365_v41 = vadd.f32 %v5968_v24, %v3074_v37  ;;  %v8158_v2 = vadd.f32 %v6077_v58, %v3362_v31 }
 0x347   : > { %v5969_v23 = vpop.f32.mrb[136].mxu0  ;;  %v6081_v43 = vpop.f32.mrb[168].mxu1  ;;  %v3640_v0 = vsel %vm3609_vm0, %v8158_v2, -inf  ;;  %v8162_v61 = vadd.f32 %v6080_v19, %v3365_v41 }
 0x348   : > { %v5970_v33 = vpop.f32.mrb[137].mxu0  ;;  %v6082_v51 = vpop.f32.mrb[169].mxu1  ;;  %3641 = vmax.xlane.f32.xlu0 %v3640_v0  ;;  %v3077_v0 = vld [vmem:[%s8104_s16 + $0x70] sm:$0xff] }
 0x349   : > { %v5971_v46 = vadd.f32 %v5970_v33, %v5969_v23  ;;  %v6083_v62 = vadd.f32 %v6082_v51, %v6081_v43  ;;  %v5972_v12 = vpop.f32.mrb[138].mxu0  ;;  %v6084_v26 = vpop.f32.mrb[170].mxu1  ;;  %v3643_v58 = vsel %vm3609_vm0, %v8162_v61, -inf }
 0x34a   : > { %v5973_v52 = vpop.f32.mrb[139].mxu0  ;;  %v6085_v37 = vpop.f32.mrb[171].mxu1  ;;  %3644 = vmax.xlane.f32.xlu1 %v3643_v58 }
 0x34b   : > { %v3370_v56 = vadd.f32 %v5971_v46, %v3075_v22  ;;  %v5974_v21 = vadd.f32 %v5973_v52, %v5972_v12  ;;  %v6086_v31 = vadd.f32 %v6085_v37, %v6084_v26  ;;  %v3078_v12 = vld [vmem:[%s8104_s16 + $0x78] sm:$0xff] }
 0x34d   : > { %v3373_v24 = vadd.f32 %v5974_v21, %v3076_v45  ;;  %v8168_v19 = vadd.f32 %v6083_v62, %v3370_v56 }
 0x34f   : > { %v5975_v41 = vpop.f32.mrb[140].mxu0  ;;  %v6087_v23 = vpop.f32.mrb[172].mxu1  ;;  %v3646_v51 = vsel %vm3609_vm0, %v8168_v19, -inf  ;;  %v8172_v43 = vadd.f32 %v6086_v31, %v3373_v24 }
 0x350   : > { %v5976_v33 = vpop.f32.mrb[141].mxu0  ;;  %v6088_v14 = vpop.f32.mrb[173].mxu1  ;;  %3647 = vmax.xlane.f32.xlu0 %v3646_v51  ;;  %v3079_v51 = vld [vmem:[%s8104_s16 + $0x80] sm:$0xff] }
 0x351   : > { %v5977_v50 = vadd.f32 %v5976_v33, %v5975_v41  ;;  %v6089_v58 = vadd.f32 %v6088_v14, %v6087_v23  ;;  %v5978_v46 = vpop.f32.mrb[142].mxu0  ;;  %v6090_v22 = vpop.f32.mrb[174].mxu1  ;;  %v3649_v62 = vsel %vm3609_vm0, %v8172_v43, -inf }
 0x352   : > { %v5979_v26 = vpop.f32.mrb[143].mxu0  ;;  %v6091_v45 = vpop.f32.mrb[175].mxu1  ;;  %3650 = vmax.xlane.f32.xlu1 %v3649_v62 }
 0x353   : > { %v3378_v52 = vadd.f32 %v5977_v50, %v3077_v0  ;;  %v5980_v37 = vadd.f32 %v5979_v26, %v5978_v46  ;;  %v6092_v56 = vadd.f32 %v6091_v45, %v6090_v22  ;;  %v3080_v46 = vld [vmem:[%s8104_s16 + $0x88] sm:$0xff] }
 0x355   : > { %v3381_v21 = vadd.f32 %v5980_v37, %v3078_v12  ;;  %v8178_v31 = vadd.f32 %v6089_v58, %v3378_v52 }
 0x357   : > { %v5981_v24 = vpop.f32.mrb[144].mxu0  ;;  %v6093_v41 = vpop.f32.mrb[176].mxu1  ;;  %v3652_v14 = vsel %vm3609_vm0, %v8178_v31, -inf  ;;  %v8182_v23 = vadd.f32 %v6092_v56, %v3381_v21 }
 0x358   : > { %v5982_v33 = vpop.f32.mrb[145].mxu0  ;;  %v6094_v8 = vpop.f32.mrb[177].mxu1  ;;  %3653 = vmax.xlane.f32.xlu0 %v3652_v14  ;;  %v3081_v14 = vld [vmem:[%s8104_s16 + $0x90] sm:$0xff] }
 0x359   : > { %v5983_v53 = vadd.f32 %v5982_v33, %v5981_v24  ;;  %v6095_v62 = vadd.f32 %v6094_v8, %v6093_v41  ;;  %v5984_v50 = vpop.f32.mrb[146].mxu0  ;;  %v6096_v0 = vpop.f32.mrb[178].mxu1  ;;  %v3655_v58 = vsel %vm3609_vm0, %v8182_v23, -inf }
 0x35a   : > { %v5985_v22 = vpop.f32.mrb[147].mxu0  ;;  %v6097_v12 = vpop.f32.mrb[179].mxu1  ;;  %3656 = vmax.xlane.f32.xlu1 %v3655_v58 }
 0x35b   : > { %v3386_v26 = vadd.f32 %v5983_v53, %v3079_v51  ;;  %v5986_v45 = vadd.f32 %v5985_v22, %v5984_v50  ;;  %v6098_v52 = vadd.f32 %v6097_v12, %v6096_v0  ;;  %v3082_v50 = vld [vmem:[%s8104_s16 + $0x98] sm:$0xff] }
 0x35d   : > { %v3389_v37 = vadd.f32 %v5986_v45, %v3080_v46  ;;  %v8188_v56 = vadd.f32 %v6095_v62, %v3386_v26 }
 0x35f   : > { %v5987_v21 = vpop.f32.mrb[148].mxu0  ;;  %v6099_v24 = vpop.f32.mrb[180].mxu1  ;;  %v3658_v8 = vsel %vm3609_vm0, %v8188_v56, -inf  ;;  %v8192_v41 = vadd.f32 %v6098_v52, %v3389_v37 }
 0x360   : > { %v5988_v33 = vpop.f32.mrb[149].mxu0  ;;  %v6100_v13 = vpop.f32.mrb[181].mxu1  ;;  %3659 = vmax.xlane.f32.xlu0 %v3658_v8  ;;  %v3083_v8 = vld [vmem:[%s8104_s16 + $0xa0] sm:$0xff] }
 0x361   : > { %v5989_v11 = vadd.f32 %v5988_v33, %v5987_v21  ;;  %v6101_v58 = vadd.f32 %v6100_v13, %v6099_v24  ;;  %v5990_v53 = vpop.f32.mrb[150].mxu0  ;;  %v6102_v51 = vpop.f32.mrb[182].mxu1  ;;  %v3661_v62 = vsel %vm3609_vm0, %v8192_v41, -inf }
 0x362   : > { %v5991_v0 = vpop.f32.mrb[151].mxu0  ;;  %v6103_v46 = vpop.f32.mrb[183].mxu1  ;;  %3662 = vmax.xlane.f32.xlu1 %v3661_v62 }
 0x363   : > { %v3394_v22 = vadd.f32 %v5989_v11, %v3081_v14  ;;  %v5992_v12 = vadd.f32 %v5991_v0, %v5990_v53  ;;  %v6104_v26 = vadd.f32 %v6103_v46, %v6102_v51  ;;  %v3084_v53 = vld [vmem:[%s8104_s16 + $0xa8] sm:$0xff] }
 0x365   : > { %v3397_v45 = vadd.f32 %v5992_v12, %v3082_v50  ;;  %v8198_v52 = vadd.f32 %v6101_v58, %v3394_v22 }
 0x367   : > { %v5993_v37 = vpop.f32.mrb[152].mxu0  ;;  %v6105_v21 = vpop.f32.mrb[184].mxu1  ;;  %v3664_v13 = vsel %vm3609_vm0, %v8198_v52, -inf  ;;  %v8202_v24 = vadd.f32 %v6104_v26, %v3397_v45 }
 0x368   : > { %v5994_v33 = vpop.f32.mrb[153].mxu0  ;;  %v6106_v1 = vpop.f32.mrb[185].mxu1  ;;  %3665 = vmax.xlane.f32.xlu0 %v3664_v13  ;;  %v3085_v13 = vld [vmem:[%s8104_s16 + $0xb0] sm:$0xff] }
 0x369   : > { %v5995_v10 = vadd.f32 %v5994_v33, %v5993_v37  ;;  %v6107_v62 = vadd.f32 %v6106_v1, %v6105_v21  ;;  %v5996_v11 = vpop.f32.mrb[154].mxu0  ;;  %v6108_v14 = vpop.f32.mrb[186].mxu1  ;;  %v3667_v58 = vsel %vm3609_vm0, %v8202_v24, -inf }
 0x36a   : > { %v5997_v51 = vpop.f32.mrb[155].mxu0  ;;  %v6109_v50 = vpop.f32.mrb[187].mxu1  ;;  %3668 = vmax.xlane.f32.xlu1 %v3667_v58 }
 0x36b   : > { %v3402_v0 = vadd.f32 %v5995_v10, %v3083_v8  ;;  %v5998_v46 = vadd.f32 %v5997_v51, %v5996_v11  ;;  %v6110_v22 = vadd.f32 %v6109_v50, %v6108_v14  ;;  %v3086_v11 = vld [vmem:[%s8104_s16 + $0xb8] sm:$0xff] }
 0x36d   : > { %v3405_v12 = vadd.f32 %v5998_v46, %v3084_v53  ;;  %v8208_v26 = vadd.f32 %v6107_v62, %v3402_v0 }
 0x36f   : > { %v5999_v45 = vpop.f32.mrb[156].mxu0  ;;  %v6111_v37 = vpop.f32.mrb[188].mxu1  ;;  %v3670_v1 = vsel %vm3609_vm0, %v8208_v26, -inf  ;;  %v8212_v21 = vadd.f32 %v6110_v22, %v3405_v12 }
 0x370   : > { %v6000_v33 = vpop.f32.mrb[157].mxu0  ;;  %v6112_v55 = vpop.f32.mrb[189].mxu1  ;;  %3671 = vmax.xlane.f32.xlu0 %v3670_v1  ;;  %v3087_v1 = vld [vmem:[%s8104_s16 + $0xc0] sm:$0xff] }
 0x371   : > { %v6001_v28 = vadd.f32 %v6000_v33, %v5999_v45  ;;  %v6113_v58 = vadd.f32 %v6112_v55, %v6111_v37  ;;  %v6002_v10 = vpop.f32.mrb[158].mxu0  ;;  %v6114_v8 = vpop.f32.mrb[190].mxu1  ;;  %v3673_v62 = vsel %vm3609_vm0, %v8212_v21, -inf }
 0x372   : > { %v6003_v14 = vpop.f32.mrb[159].mxu0  ;;  %v6115_v53 = vpop.f32.mrb[191].mxu1  ;;  %3674 = vmax.xlane.f32.xlu1 %v3673_v62 }
 0x373   : > { %v3410_v51 = vadd.f32 %v6001_v28, %v3085_v13  ;;  %v6004_v50 = vadd.f32 %v6003_v14, %v6002_v10  ;;  %v6116_v0 = vadd.f32 %v6115_v53, %v6114_v8  ;;  %v3088_v10 = vld [vmem:[%s8104_s16 + $0xc8] sm:$0xff] }
 0x375   : > { %v3413_v46 = vadd.f32 %v6004_v50, %v3086_v11  ;;  %v8218_v22 = vadd.f32 %v6113_v58, %v3410_v51 }
 0x377   : > { %v6005_v12 = vpop.f32.mrb[160].mxu0  ;;  %v6117_v45 = vpop.f32.mrb[192].mxu1  ;;  %v3676_v55 = vsel %vm3609_vm0, %v8218_v22, -inf  ;;  %v8222_v37 = vadd.f32 %v6116_v0, %v3413_v46 }
 0x378   : > { %v6006_v33 = vpop.f32.mrb[161].mxu0  ;;  %v6118_v9 = vpop.f32.mrb[193].mxu1  ;;  %3677 = vmax.xlane.f32.xlu0 %v3676_v55 }
 0x379   : > { %v6007_v54 = vadd.f32 %v6006_v33, %v6005_v12  ;;  %v6119_v62 = vadd.f32 %v6118_v9, %v6117_v45  ;;  %v6008_v28 = vpop.f32.mrb[162].mxu0  ;;  %v6120_v13 = vpop.f32.mrb[194].mxu1  ;;  %v3679_v58 = vsel %vm3609_vm0, %v8222_v37, -inf  ;;  %v3089_v45 = vld [vmem:[%s8104_s16 + $0xd0] sm:$0xff] }
 0x37a   : > { %v6009_v8 = vpop.f32.mrb[163].mxu0  ;;  %v6121_v11 = vpop.f32.mrb[195].mxu1  ;;  %3680 = vmax.xlane.f32.xlu1 %v3679_v58  ;;  %v3090_v58 = vld [vmem:[%s8104_s16 + $0xd8] sm:$0xff] }
 0x37b   : > { %v3418_v14 = vadd.f32 %v6007_v54, %v3087_v1  ;;  %v6010_v53 = vadd.f32 %v6009_v8, %v6008_v28  ;;  %v6122_v51 = vadd.f32 %v6121_v11, %v6120_v13 }
 0x37d   : > { %v3421_v50 = vadd.f32 %v6010_v53, %v3088_v10  ;;  %v8228_v0 = vadd.f32 %v6119_v62, %v3418_v14  ;;  %v3091_v53 = vld [vmem:[%s8104_s16 + $0xe0] sm:$0xff] }
 0x37f   : > { %v6011_v46 = vpop.f32.mrb[164].mxu0  ;;  %v6123_v12 = vpop.f32.mrb[196].mxu1  ;;  %v8230_v9 = vadd.f32 %v6122_v51, %v3421_v50 }
 0x380   : > { %v6012_v55 = vpop.f32.mrb[165].mxu0  ;;  %v6124_v33 = vpop.f32.mrb[197].mxu1 }
 0x381   : > { %v6013_v39 = vadd.f32 %v6012_v55, %v6011_v46  ;;  %v6125_v60 = vadd.f32 %v6124_v33, %v6123_v12  ;;  %v6014_v49 = vpop.f32.mrb[166].mxu0  ;;  %v6126_v30 = vpop.f32.mrb[198].mxu1 }
 0x382   : > { %v6015_v48 = vpop.f32.mrb[167].mxu0  ;;  %v6127_v54 = vpop.f32.mrb[199].mxu1 }
 0x383   : > { %v3426_v1 = vadd.f32 %v6013_v39, %v3089_v45  ;;  %v6016_v28 = vadd.f32 %v6015_v48, %v6014_v49  ;;  %v6128_v62 = vadd.f32 %v6127_v54, %v6126_v30 }
 0x385   : > { %v3429_v13 = vadd.f32 %v6016_v28, %v3090_v58  ;;  %v8234_v10 = vadd.f32 %v6125_v60, %v3426_v1  ;;  %v3093_v28 = vld [vmem:[%s8104_s16 + $0xf0] sm:$0xff] }
 0x387   : > { %v6017_v8 = vpop.f32.mrb[168].mxu0  ;;  %v6129_v11 = vpop.f32.mrb[200].mxu1  ;;  %v8236_v14 = vadd.f32 %v6128_v62, %v3429_v13 }
 0x388   : > { %v6018_v51 = vpop.f32.mrb[169].mxu0  ;;  %v6130_v50 = vpop.f32.mrb[201].mxu1 }
 0x389   : > { %v6019_v46 = vadd.f32 %v6018_v51, %v6017_v8  ;;  %v6131_v12 = vadd.f32 %v6130_v50, %v6129_v11  ;;  %v6020_v55 = vpop.f32.mrb[170].mxu0  ;;  %v6132_v33 = vpop.f32.mrb[202].mxu1 }
 0x38a   : > { %v6021_v38 = vpop.f32.mrb[171].mxu0  ;;  %v6133_v39 = vpop.f32.mrb[203].mxu1 }
 0x38b   : > { %v3434_v48 = vadd.f32 %v6019_v46, %v3091_v53  ;;  %v6022_v30 = vadd.f32 %v6021_v38, %v6020_v55  ;;  %v6134_v49 = vadd.f32 %v6133_v39, %v6132_v33  ;;  %v6789_v33 = vld [vmem:[%s9826_s9] ss:$16 sps:$4 sm:$0xff]   ;;  %v6791_v39 = vld [vmem:[%s9826_s9 + $0x4] ss:$16 sps:$4 sm:$0xff]  }
 0x38c   : > { %4370 = vmatprep.subr.bf16.mxu0 %v6791_v39 }
 0x38d   : > { %v3437_v60 = vadd.f32 %v6022_v30, %v3092_v44  ;;  %v8240_v45 = vadd.f32 %v6131_v12, %v3434_v48  ;;  %v6792_v48 = vld [vmem:[%s9826_s9 + $0x8] ss:$16 sps:$4 sm:$0xff]   ;;  %4371 = vmatpush1.bf16.msra.mxu0 %v6789_v33 }
 0x38f   : > { %v6023_v58 = vpop.f32.mrb[172].mxu0  ;;  %v6135_v54 = vpop.f32.mrb[204].mxu1  ;;  %v8242_v1 = vadd.f32 %v6134_v49, %v3437_v60 }
 0x390   : > { %v6024_v62 = vpop.f32.mrb[173].mxu0  ;;  %v6136_v13 = vpop.f32.mrb[205].mxu1 }
 0x391   : > { %v6025_v8 = vadd.f32 %v6024_v62, %v6023_v58  ;;  %v6137_v11 = vadd.f32 %v6136_v13, %v6135_v54  ;;  %v6026_v51 = vpop.f32.mrb[174].mxu0  ;;  %v6138_v50 = vpop.f32.mrb[206].mxu1 }
 0x392   : > { %v6027_v17 = vpop.f32.mrb[175].mxu0  ;;  %v6139_v16 = vpop.f32.mrb[207].mxu1 }
 0x393   : > { %v3442_v53 = vadd.f32 %v6025_v8, %v3093_v28  ;;  %v6028_v38 = vadd.f32 %v6027_v17, %v6026_v51  ;;  %v6140_v46 = vadd.f32 %v6139_v16, %v6138_v50  ;;  %v6794_v16 = vld [vmem:[%s9826_s9 + $0xc] ss:$16 sps:$4 sm:$0xff]  }
 0x394   : > { %4563 = vmatprep.subr.bf16.mxu1 %v6794_v16 }
 0x395   : > { %v3445_v44 = vadd.f32 %v6028_v38, %v3094_v27  ;;  %v8246_v12 = vadd.f32 %v6137_v11, %v3442_v53  ;;  %4564 = vmatpush1.bf16.msra.mxu1 %v6792_v48 }
 0x397   : > { %v8248_v55 = vadd.f32 %v6140_v46, %v3445_v44 }
 0x3ad   : > { %v3612_v17 = vpop.xlane.xlu0 %3611 }
 0x3ae   : > { %v3706_v27 = vsub.f32 %v8108_v29, %v3612_v17 }
 0x3b0   : > { %v3738_v30 = vmul.f32 1.442695, %v3706_v27 }
 0x3b1   : > { %v3615_v49 = vpop.xlane.xlu0 %3614 }
 0x3b2   : > { %6797 = vpow2.f32 %v3738_v30  ;;  %v3707_v60 = vsub.f32 %v8112_v57, %v3615_v49 }
 0x3b4   : > { %v3740_v58 = vmul.f32 1.442695, %v3707_v60  ;;  %v3688_v60 = vsel %vm3609_vm0, %v8234_v10, -inf }
 0x3b5   : > { %v3618_v54 = vpop.xlane.xlu1 %3617 }
 0x3b6   : > { %6799 = vpow2.f32 %v3740_v58  ;;  %v3708_v28 = vsub.f32 %v8118_v63, %v3618_v54 }
 0x3b8   : > { %v3742_v62 = vmul.f32 1.442695, %v3708_v28 }
 0x3b9   : > { %v3621_v13 = vpop.xlane.xlu1 %3620 }
 0x3ba   : > { %6801 = vpow2.f32 %v3742_v62  ;;  %v3709_v8 = vsub.f32 %v8122_v7, %v3621_v13  ;;  %v3682_v7 = vsel %vm3609_vm0, %v8228_v0, -inf  ;;  %v3691_v62 = vsel %vm3609_vm0, %v8236_v14, -inf }
 0x3bc   : > { %v8266_v11 = vpop.eup %6797  ;;  %v3744_v51 = vmul.f32 1.442695, %v3709_v8 }
 0x3bd   : > { %v3624_v50 = vpop.xlane.xlu0 %3623  ;;  %v3802_v29 = vsel %vm3609_vm0, %v8266_v11, 0.0 }
 0x3be   : > { %6803 = vpow2.f32 %v3744_v51  ;;  %v3710_v57 = vsub.f32 %v8128_v5, %v3624_v50  ;;  %3803 = vadd.xlane.f32.xlu0 %v3802_v29 }
 0x3bf   : > { %v3627_v53 = vpop.xlane.xlu1 %3626 }
 0x3c0   : > { %v8271_v38 = vpop.eup %6799  ;;  %v3746_v63 = vmul.f32 1.442695, %v3710_v57  ;;  %v3711_v46 = vsub.f32 %v8132_v25, %v3627_v53  ;;  %v3685_v25 = vsel %vm3609_vm0, %v8230_v9, -inf  ;;  %v3694_v53 = vsel %vm3609_vm0, %v8240_v45, -inf }
 0x3c1   : > { %v3805_v44 = vsel %vm3609_vm0, %v8271_v38, 0.0 }
 0x3c2   : > { %6805 = vpow2.f32 %v3746_v63  ;;  %v3748_v33 = vmul.f32 1.442695, %v3711_v46  ;;  %3683 = vmax.xlane.f32.xlu0 %v3682_v7  ;;  %3806 = vadd.xlane.f32.xlu1 %v3805_v44  ;;  %v3697_v7 = vsel %vm3609_vm0, %v8242_v1, -inf }
 0x3c4   : > { %v8278_v39 = vpop.eup %6801  ;;  %6807 = vpow2.f32 %v3748_v33 }
 0x3c5   : > { %v3630_v5 = vpop.xlane.xlu0 %3629  ;;  %v3808_v48 = vsel %vm3609_vm0, %v8278_v39, 0.0 }
 0x3c6   : > { %v3712_v16 = vsub.f32 %v8138_v6, %v3630_v5  ;;  %3809 = vadd.xlane.f32.xlu0 %v3808_v48  ;;  %3686 = vmax.xlane.f32.xlu1 %v3685_v25 }
 0x3c7   : > { %v3633_v17 = vpop.xlane.xlu1 %3632 }
 0x3c8   : > { %v8285_v27 = vpop.eup %6803  ;;  %v3750_v30 = vmul.f32 1.442695, %v3712_v16  ;;  %v3713_v49 = vsub.f32 %v8142_v40, %v3633_v17  ;;  %v3700_v17 = vsel %vm3609_vm0, %v8246_v12, -inf }
 0x3c9   : > { %v3811_v58 = vsel %vm3609_vm0, %v8285_v27, 0.0 }
 0x3ca   : > { %6809 = vpow2.f32 %v3750_v30  ;;  %v3752_v54 = vmul.f32 1.442695, %v3713_v49  ;;  %3689 = vmax.xlane.f32.xlu0 %v3688_v60  ;;  %3812 = vadd.xlane.f32.xlu1 %v3811_v58  ;;  %v3703_v60 = vsel %vm3609_vm0, %v8248_v55, -inf }
 0x3cc   : > { %v8292_v28 = vpop.eup %6805  ;;  %6811 = vpow2.f32 %v3752_v54 }
 0x3cd   : > { %v3636_v6 = vpop.xlane.xlu0 %3635  ;;  %v3814_v40 = vsel %vm3609_vm0, %v8292_v28, 0.0 }
 0x3ce   : > { %v8298_v13 = vpop.eup %6807  ;;  %v3714_v8 = vsub.f32 %v8148_v15, %v3636_v6  ;;  %3692 = vmax.xlane.f32.xlu1 %v3691_v62  ;;  %3815 = vadd.xlane.f32.xlu0 %v3814_v40 }
 0x3cf   : > { %v3639_v51 = vpop.xlane.xlu1 %3638  ;;  %v3817_v57 = vsel %vm3609_vm0, %v8298_v13, 0.0 }
 0x3d0   : > { %v3754_v50 = vmul.f32 1.442695, %v3714_v8  ;;  %v3715_v29 = vsub.f32 %v8152_v3, %v3639_v51 }
 0x3d2   : > { %6813 = vpow2.f32 %v3754_v50  ;;  %v3756_v63 = vmul.f32 1.442695, %v3715_v29  ;;  %3818 = vadd.xlane.f32.xlu1 %v3817_v57  ;;  %3695 = vmax.xlane.f32.xlu0 %v3694_v53 }
 0x3d4   : > { %v8306_v46 = vpop.eup %6809  ;;  %6815 = vpow2.f32 %v3756_v63 }
 0x3d5   : > { %v3642_v15 = vpop.xlane.xlu0 %3641  ;;  %v3820_v3 = vsel %vm3609_vm0, %v8306_v46, 0.0 }
 0x3d6   : > { %v8312_v44 = vpop.eup %6811  ;;  %v3716_v33 = vsub.f32 %v8158_v2, %v3642_v15  ;;  %3698 = vmax.xlane.f32.xlu1 %v3697_v7  ;;  %3821 = vadd.xlane.f32.xlu0 %v3820_v3 }
 0x3d7   : > { %v3645_v5 = vpop.xlane.xlu1 %3644  ;;  %v3823_v16 = vsel %vm3609_vm0, %v8312_v44, 0.0 }
 0x3d8   : > { %v3758_v48 = vmul.f32 1.442695, %v3716_v33  ;;  %v3717_v25 = vsub.f32 %v8162_v61, %v3645_v5 }
 0x3da   : > { %6817 = vpow2.f32 %v3758_v48  ;;  %v3760_v30 = vmul.f32 1.442695, %v3717_v25  ;;  %3824 = vadd.xlane.f32.xlu1 %v3823_v16  ;;  %3701 = vmax.xlane.f32.xlu0 %v3700_v17 }
 0x3dc   : > { %v8320_v49 = vpop.eup %6813  ;;  %6819 = vpow2.f32 %v3760_v30 }
 0x3dd   : > { %v3648_v2 = vpop.xlane.xlu0 %3647  ;;  %v3826_v61 = vsel %vm3609_vm0, %v8320_v49, 0.0 }
 0x3de   : > { %v8326_v58 = vpop.eup %6815  ;;  %v3718_v54 = vsub.f32 %v8168_v19, %v3648_v2  ;;  %3704 = vmax.xlane.f32.xlu1 %v3703_v60  ;;  %3827 = vadd.xlane.f32.xlu0 %v3826_v61 }
 0x3df   : > { %v3651_v6 = vpop.xlane.xlu1 %3650  ;;  %v3829_v8 = vsel %vm3609_vm0, %v8326_v58, 0.0 }
 0x3e0   : > { %v3762_v62 = vmul.f32 1.442695, %v3718_v54  ;;  %v3719_v40 = vsub.f32 %v8172_v43, %v3651_v6 }
 0x3e2   : > { %6821 = vpow2.f32 %v3762_v62  ;;  %v3764_v51 = vmul.f32 1.442695, %v3719_v40  ;;  %3830 = vadd.xlane.f32.xlu1 %v3829_v8 }
 0x3e4   : > { %v8332_v50 = vpop.eup %6817  ;;  %6823 = vpow2.f32 %v3764_v51 }
 0x3e5   : > { %v3654_v29 = vpop.xlane.xlu0 %3653  ;;  %v3832_v57 = vsel %vm3609_vm0, %v8332_v50, 0.0 }
 0x3e6   : > { %v8336_v19 = vpop.eup %6819  ;;  %v3720_v53 = vsub.f32 %v8178_v31, %v3654_v29  ;;  %3833 = vadd.xlane.f32.xlu0 %v3832_v57 }
 0x3e7   : > { %v3657_v63 = vpop.xlane.xlu1 %3656  ;;  %v3835_v43 = vsel %vm3609_vm0, %v8336_v19, 0.0 }
 0x3e8   : > { %v3766_v15 = vmul.f32 1.442695, %v3720_v53  ;;  %v3721_v7 = vsub.f32 %v8182_v23, %v3657_v63  ;;  %3836 = vadd.xlane.f32.xlu1 %v3835_v43 }
 0x3ea   : > { %6825 = vpow2.f32 %v3766_v15  ;;  %v3768_v3 = vmul.f32 1.442695, %v3721_v7 }
 0x3ec   : > { %v8342_v33 = vpop.eup %6821  ;;  %6827 = vpow2.f32 %v3768_v3 }
 0x3ed   : > { %v3660_v5 = vpop.xlane.xlu0 %3659  ;;  %v3838_v48 = vsel %vm3609_vm0, %v8342_v33, 0.0 }
 0x3ee   : > { %v8346_v25 = vpop.eup %6823  ;;  %v3722_v31 = vsub.f32 %v8188_v56, %v3660_v5  ;;  %3839 = vadd.xlane.f32.xlu0 %v3838_v48 }
 0x3ef   : > { %v3663_v16 = vpop.xlane.xlu1 %3662  ;;  %v3841_v17 = vsel %vm3609_vm0, %v8346_v25, 0.0 }
 0x3f0   : > { %v3770_v23 = vmul.f32 1.442695, %v3722_v31  ;;  %v3723_v30 = vsub.f32 %v8192_v41, %v3663_v16  ;;  %3842 = vadd.xlane.f32.xlu1 %v3841_v17 }
 0x3f2   : > { %6829 = vpow2.f32 %v3770_v23  ;;  %v3772_v2 = vmul.f32 1.442695, %v3723_v30 }
 0x3f4   : > { %v8352_v60 = vpop.eup %6825  ;;  %6831 = vpow2.f32 %v3772_v2 }
 0x3f5   : > { %v3666_v61 = vpop.xlane.xlu0 %3665  ;;  %v3844_v54 = vsel %vm3609_vm0, %v8352_v60, 0.0 }
 0x3f6   : > { %v8356_v6 = vpop.eup %6827  ;;  %v3724_v56 = vsub.f32 %v8198_v52, %v3666_v61  ;;  %3845 = vadd.xlane.f32.xlu0 %v3844_v54 }
 0x3f7   : > { %v3669_v62 = vpop.xlane.xlu1 %3668  ;;  %v3847_v40 = vsel %vm3609_vm0, %v8356_v6, 0.0 }
 0x3f8   : > { %v3774_v41 = vmul.f32 1.442695, %v3724_v56  ;;  %v3725_v8 = vsub.f32 %v8202_v24, %v3669_v62  ;;  %3848 = vadd.xlane.f32.xlu1 %v3847_v40 }
 0x3fa   : > { %6833 = vpow2.f32 %v3774_v41  ;;  %v3776_v51 = vmul.f32 1.442695, %v3725_v8 }
 0x3fc   : > { %v8362_v29 = vpop.eup %6829  ;;  %6835 = vpow2.f32 %v3776_v51 }
 0x3fd   : > { %v3672_v57 = vpop.xlane.xlu0 %3671  ;;  %v3850_v53 = vsel %vm3609_vm0, %v8362_v29, 0.0 }
 0x3fe   : > { %v8366_v63 = vpop.eup %6831  ;;  %v3726_v52 = vsub.f32 %v8208_v26, %v3672_v57  ;;  %3851 = vadd.xlane.f32.xlu0 %v3850_v53 }
 0x3ff   : > { %v3675_v43 = vpop.xlane.xlu1 %3674  ;;  %v3853_v15 = vsel %vm3609_vm0, %v8366_v63, 0.0 }
 0x400   : > { %v3778_v24 = vmul.f32 1.442695, %v3726_v52  ;;  %v3727_v7 = vsub.f32 %v8212_v21, %v3675_v43  ;;  %3854 = vadd.xlane.f32.xlu1 %v3853_v15 }
 0x402   : > { %6837 = vpow2.f32 %v3778_v24  ;;  %v3780_v3 = vmul.f32 1.442695, %v3727_v7 }
 0x404   : > { %v8372_v5 = vpop.eup %6833  ;;  %6839 = vpow2.f32 %v3780_v3 }
 0x405   : > { %v3678_v48 = vpop.xlane.xlu0 %3677  ;;  %v3856_v31 = vsel %vm3609_vm0, %v8372_v5, 0.0 }
 0x406   : > { %v8376_v16 = vpop.eup %6835  ;;  %v3728_v26 = vsub.f32 %v8218_v22, %v3678_v48  ;;  %3857 = vadd.xlane.f32.xlu0 %v3856_v31 }
 0x407   : > { %v3681_v17 = vpop.xlane.xlu1 %3680  ;;  %v3859_v23 = vsel %vm3609_vm0, %v8376_v16, 0.0 }
 0x408   : > { %v3782_v21 = vmul.f32 1.442695, %v3728_v26  ;;  %v3729_v30 = vsub.f32 %v8222_v37, %v3681_v17  ;;  %3860 = vadd.xlane.f32.xlu1 %v3859_v23 }
 0x40a   : > { %6841 = vpow2.f32 %v3782_v21  ;;  %v3784_v2 = vmul.f32 1.442695, %v3729_v30 }
 0x40c   : > { %v8382_v61 = vpop.eup %6837  ;;  %6843 = vpow2.f32 %v3784_v2 }
 0x40d   : > { %v3862_v54 = vsel %vm3609_vm0, %v8382_v61, 0.0 }
 0x40e   : > { %v8386_v56 = vpop.eup %6839  ;;  %3863 = vadd.xlane.f32.xlu0 %v3862_v54 }
 0x40f   : > { %v3865_v22 = vsel %vm3609_vm0, %v8386_v56, 0.0 }
 0x410   : > { %3866 = vadd.xlane.f32.xlu1 %v3865_v22 }
 0x414   : > { %v8390_v62 = vpop.eup %6841 }
 0x415   : > { %v3868_v37 = vsel %vm3609_vm0, %v8390_v62, 0.0 }
 0x416   : > { %v8394_v40 = vpop.eup %6843  ;;  %3869 = vadd.xlane.f32.xlu0 %v3868_v37 }
 0x417   : > { %v3871_v41 = vsel %vm3609_vm0, %v8394_v40, 0.0 }
 0x418   : > { %3872 = vadd.xlane.f32.xlu1 %v3871_v41 }
 0x44b   : > { %v3804_v8 = vpop.xlane.xlu0 %3803 }
 0x44c   : > { %6845 = vrcp.f32 %v3804_v8 }
 0x44f   : > { %v3807_v51 = vpop.xlane.xlu1 %3806  ;;  %v3684_v57 = vpop.xlane.xlu0 %3683 }
 0x450   : > { %6847 = vrcp.f32 %v3807_v51  ;;  %v3730_v53 = vsub.f32 %v8228_v0, %v3684_v57 }
 0x452   : > { %v3786_v52 = vmul.f32 1.442695, %v3730_v53 }
 0x453   : > { %v3687_v43 = vpop.xlane.xlu1 %3686  ;;  %v3810_v15 = vpop.xlane.xlu0 %3809 }
 0x454   : > { %6849 = vpow2.f32 %v3786_v52  ;;  %v3731_v24 = vsub.f32 %v8230_v9, %v3687_v43 }
 0x455   : > { %6851 = vrcp.f32 %v3810_v15 }
 0x456   : > { %v3788_v7 = vmul.f32 1.442695, %v3731_v24  ;;  %v6846_v31 = vpop.eup %6845 }
 0x457   : > { %v3813_v3 = vpop.xlane.xlu1 %3812  ;;  %v3690_v48 = vpop.xlane.xlu0 %3689  ;;  %v3930_v21 = vmul.f32 %v6846_v31, %v8266_v11 }
 0x458   : > { %6853 = vpow2.f32 %v3788_v7  ;;  %v3732_v26 = vsub.f32 %v8234_v10, %v3690_v48 }
 0x459   : > { %6855 = vrcp.f32 %v3813_v3 }
 0x45a   : > { %v6848_v17 = vpop.eup %6847  ;;  %v3790_v23 = vmul.f32 1.442695, %v3732_v26 }
 0x45b   : > { %v3931_v0 = vmul.f32 %v6848_v17, %v8271_v38  ;;  %v3693_v30 = vpop.xlane.xlu1 %3692  ;;  %v3816_v2 = vpop.xlane.xlu0 %3815 }
 0x45c   : > { %6857 = vpow2.f32 %v3790_v23  ;;  %v3733_v9 = vsub.f32 %v8236_v14, %v3693_v30 }
 0x45d   : > { %v4282_v54 = vpack.c.bf16 %v3931_v0, %v3930_v21  ;;  %6859 = vrcp.f32 %v3816_v2 }
 0x45e   : > { %v8404_v22 = vpop.eup %6849  ;;  %v3792_v37 = vmul.f32 1.442695, %v3733_v9 }
 0x45f   : > { %v3819_v41 = vpop.xlane.xlu1 %3818  ;;  %5863 = vmatmul.mubr.msk.bf16.vlgmr.msra.gmra.mrb[176].mxu0 %vm3609_vm0, %v4282_v54  ;;  %5879 = vmatmul.mubr.msk.bf16.vlgmr.msra.gmra.mrb[208].mxu1 %vm3609_vm0, %v4282_v54  ;;  %v3696_v10 = vpop.xlane.xlu0 %3695  ;;  %v3874_v11 = vsel %vm3609_vm0, %v8404_v22, 0.0 }
 0x460   : > { %6861 = vpow2.f32 %v3792_v37  ;;  %v3734_v38 = vsub.f32 %v8240_v45, %v3696_v10  ;;  %3875 = vadd.xlane.f32.xlu0 %v3874_v11  ;;  %4412 = vmatprep.mubr.bf16.mxu0 %v9932_v34  ;;  %v6852_v14 = vpop.eup %6851 }
 0x461   : > { %6863 = vrcp.f32 %v3819_v41  ;;  %4605 = vmatprep.mubr.bf16.mxu1 %v9932_v34  ;;  %v3932_v45 = vmul.f32 %v6852_v14, %v8278_v39 }
 0x462   : > { %v8413_v8 = vpop.eup %6853  ;;  %v3794_v51 = vmul.f32 1.442695, %v3734_v38 }
 0x463   : > { %v6856_v57 = vpop.eup %6855  ;;  %v3699_v53 = vpop.xlane.xlu1 %3698  ;;  %v3877_v43 = vsel %vm3609_vm0, %v8413_v8, 0.0 }
 0x464   : > { %v3822_v52 = vpop.xlane.xlu0 %3821  ;;  %6865 = vpow2.f32 %v3794_v51  ;;  %v3735_v15 = vsub.f32 %v8242_v1, %v3699_v53  ;;  %3878 = vadd.xlane.f32.xlu1 %v3877_v43  ;;  %v3933_v24 = vmul.f32 %v6856_v57, %v8285_v27 }
 0x465   : > { %6867 = vrcp.f32 %v3822_v52 }
 0x466   : > { %v8420_v7 = vpop.eup %6857  ;;  %v3796_v3 = vmul.f32 1.442695, %v3735_v15  ;;  %v4283_v48 = vpack.c.bf16 %v3933_v24, %v3932_v45 }
 0x467   : > { %v3825_v31 = vpop.xlane.xlu1 %3824  ;;  %v3880_v17 = vsel %vm3609_vm0, %v8420_v7, 0.0  ;;  %v6860_v39 = vpop.eup %6859 }
 0x468   : > { %v3702_v26 = vpop.xlane.xlu0 %3701  ;;  %6869 = vpow2.f32 %v3796_v3  ;;  %5864 = vmatmul.mubr.msk.bf16.gmra.mrb[180].mxu0 %vm3609_vm0, %v4283_v48  ;;  %5880 = vmatmul.mubr.msk.bf16.gmra.mrb[212].mxu1 %vm3609_vm0, %v4283_v48 }
 0x469   : > { %v3736_v1 = vsub.f32 %v8246_v12, %v3702_v26  ;;  %6871 = vrcp.f32 %v3825_v31  ;;  %3881 = vadd.xlane.f32.xlu0 %v3880_v17  ;;  %4422 = vmatprep.mubr.bf16.mxu0 %v9932_v34  ;;  %v3934_v12 = vmul.f32 %v6860_v39, %v8292_v28 }
 0x46a   : > { %v8428_v27 = vpop.eup %6861  ;;  %4615 = vmatprep.mubr.bf16.mxu1 %v9932_v34 }
 0x46b   : > { %v3798_v23 = vmul.f32 1.442695, %v3736_v1  ;;  %v6864_v21 = vpop.eup %6863  ;;  %v3705_v0 = vpop.xlane.xlu1 %3704  ;;  %v3883_v30 = vsel %vm3609_vm0, %v8428_v27, 0.0 }
 0x46c   : > { %v3737_v2 = vsub.f32 %v8248_v55, %v3705_v0  ;;  %v3828_v9 = vpop.xlane.xlu0 %3827  ;;  %3884 = vadd.xlane.f32.xlu1 %v3883_v30  ;;  %v3935_v54 = vmul.f32 %v6864_v21, %v8298_v13 }
 0x46d   : > { %6873 = vpow2.f32 %v3798_v23 }
 0x46e   : > { %v8436_v37 = vpop.eup %6865  ;;  %v3800_v41 = vmul.f32 1.442695, %v3737_v2  ;;  %v4284_v10 = vpack.c.bf16 %v3935_v54, %v3934_v12  ;;  %6875 = vrcp.f32 %v3828_v9 }
 0x46f   : > { %v3831_v11 = vpop.xlane.xlu1 %3830  ;;  %v3886_v38 = vsel %vm3609_vm0, %v8436_v37, 0.0  ;;  %v6868_v55 = vpop.eup %6867 }
 0x470   : > { %6877 = vpow2.f32 %v3800_v41  ;;  %5865 = vmatmul.mubr.msk.bf16.gmra.mrb[184].mxu0 %vm3609_vm0, %v4284_v10  ;;  %5881 = vmatmul.mubr.msk.bf16.gmra.mrb[216].mxu1 %vm3609_vm0, %v4284_v10  ;;  %v3936_v57 = vmul.f32 %v6868_v55, %v8306_v46 }
 0x471   : > { %6879 = vrcp.f32 %v3831_v11  ;;  %3887 = vadd.xlane.f32.xlu0 %v3886_v38  ;;  %4432 = vmatprep.mubr.bf16.mxu0 %v9932_v34 }
 0x472   : > { %v8443_v28 = vpop.eup %6869  ;;  %4625 = vmatprep.mubr.bf16.mxu1 %v9932_v34 }
 0x473   : > { %v6872_v13 = vpop.eup %6871  ;;  %v3889_v14 = vsel %vm3609_vm0, %v8443_v28, 0.0  ;;  %v3834_v51 = vpop.xlane.xlu0 %3833 }
 0x474   : > { %3890 = vadd.xlane.f32.xlu1 %v3889_v14  ;;  %v3937_v53 = vmul.f32 %v6872_v13, %v8312_v44 }
 0x475   : > { %v3837_v52 = vpop.xlane.xlu1 %3836 }
 0x476   : > { %6881 = vrcp.f32 %v3837_v52  ;;  %v4285_v15 = vpack.c.bf16 %v3937_v53, %v3936_v57 }
 0x477   : > { %v8450_v43 = vpop.eup %6873  ;;  %6883 = vrcp.f32 %v3834_v51 }
 0x478   : > { %v3892_v45 = vsel %vm3609_vm0, %v8450_v43, 0.0  ;;  %5866 = vmatmul.mubr.msk.bf16.gmra.mrb[188].mxu0 %vm3609_vm0, %v4285_v15  ;;  %5882 = vmatmul.mubr.msk.bf16.gmra.mrb[220].mxu1 %vm3609_vm0, %v4285_v15  ;;  %v6876_v24 = vpop.eup %6875 }
 0x479   : > { %3893 = vadd.xlane.f32.xlu0 %v3892_v45  ;;  %4442 = vmatprep.mubr.bf16.mxu0 %v9932_v34  ;;  %v3938_v31 = vmul.f32 %v6876_v24, %v8320_v49 }
 0x47a   : > { %v8457_v46 = vpop.eup %6877  ;;  %4635 = vmatprep.mubr.bf16.mxu1 %v9932_v34 }
 0x47b   : > { %v6880_v44 = vpop.eup %6879  ;;  %v3895_v3 = vsel %vm3609_vm0, %v8457_v46, 0.0  ;;  %v3840_v48 = vpop.xlane.xlu0 %3839 }
 0x47c   : > { %3896 = vadd.xlane.f32.xlu1 %v3895_v3  ;;  %v3939_v26 = vmul.f32 %v6880_v44, %v8326_v58 }
 0x47d   : > { %v3843_v17 = vpop.xlane.xlu1 %3842 }
 0x47e   : > { %6885 = vrcp.f32 %v3843_v17  ;;  %v4286_v1 = vpack.c.bf16 %v3939_v26, %v3938_v31 }
 0x47f   : > { %6887 = vrcp.f32 %v3840_v48 }
 0x480   : > { %v6882_v39 = vpop.eup %6881  ;;  %5867 = vmatmul.mubr.msk.bf16.gmra.mrb[192].mxu0 %vm3609_vm0, %v4286_v1  ;;  %5883 = vmatmul.mubr.msk.bf16.gmra.mrb[224].mxu1 %vm3609_vm0, %v4286_v1 }
 0x481   : > { %v6884_v23 = vpop.eup %6883  ;;  %4452 = vmatprep.mubr.bf16.mxu0 %v9932_v34  ;;  %4645 = vmatprep.mubr.bf16.mxu1 %v9932_v34  ;;  %v3941_v21 = vmul.f32 %v6882_v39, %v8336_v19 }
 0x482   : > { %v3940_v49 = vmul.f32 %v6884_v23, %v8332_v50 }
 0x483   : > { %v3846_v0 = vpop.xlane.xlu0 %3845 }
 0x484   : > { %v4287_v30 = vpack.c.bf16 %v3941_v21, %v3940_v49 }
 0x485   : > { %v3849_v58 = vpop.xlane.xlu1 %3848 }
 0x486   : > { %6889 = vrcp.f32 %v3849_v58 }
 0x487   : > { %6891 = vrcp.f32 %v3846_v0 }
 0x488   : > { %v6886_v2 = vpop.eup %6885  ;;  %5868 = vmatmul.mubr.msk.bf16.gmra.mrb[196].mxu0 %vm3609_vm0, %v4287_v30  ;;  %5884 = vmatmul.mubr.msk.bf16.gmra.mrb[228].mxu1 %vm3609_vm0, %v4287_v30 }
 0x489   : > { %v6888_v9 = vpop.eup %6887  ;;  %4462 = vmatprep.mubr.bf16.mxu0 %v9932_v34  ;;  %4655 = vmatprep.mubr.bf16.mxu1 %v9932_v34  ;;  %v3943_v12 = vmul.f32 %v6886_v2, %v8346_v25 }
 0x48a   : > { %v3942_v54 = vmul.f32 %v6888_v9, %v8342_v33 }
 0x48b   : > { %v3852_v19 = vpop.xlane.xlu0 %3851 }
 0x48c   : > { %v4288_v41 = vpack.c.bf16 %v3943_v12, %v3942_v54 }
 0x48d   : > { %v3855_v50 = vpop.xlane.xlu1 %3854 }
 0x48e   : > { %6893 = vrcp.f32 %v3855_v50 }
 0x48f   : > { %6895 = vrcp.f32 %v3852_v19 }
 0x490   : > { %v6890_v10 = vpop.eup %6889  ;;  %5869 = vmatmul.mubr.msk.bf16.gmra.mrb[200].mxu0 %vm3609_vm0, %v4288_v41  ;;  %5885 = vmatmul.mubr.msk.bf16.gmra.mrb[232].mxu1 %vm3609_vm0, %v4288_v41 }
 0x491   : > { %v6892_v11 = vpop.eup %6891  ;;  %4472 = vmatprep.mubr.bf16.mxu0 %v9932_v34  ;;  %4665 = vmatprep.mubr.bf16.mxu1 %v9932_v34  ;;  %v3945_v38 = vmul.f32 %v6890_v10, %v8356_v6 }
 0x492   : > { %v3944_v55 = vmul.f32 %v6892_v11, %v8352_v60 }
 0x493   : > { %v3858_v25 = vpop.xlane.xlu0 %3857 }
 0x494   : > { %v4289_v13 = vpack.c.bf16 %v3945_v38, %v3944_v55 }
 0x495   : > { %v3861_v33 = vpop.xlane.xlu1 %3860 }
 0x496   : > { %6897 = vrcp.f32 %v3861_v33 }
 0x497   : > { %6899 = vrcp.f32 %v3858_v25 }
 0x498   : > { %v6894_v14 = vpop.eup %6893  ;;  %5870 = vmatmul.mubr.msk.bf16.gmra.mrb[204].mxu0 %vm3609_vm0, %v4289_v13  ;;  %5886 = vmatmul.mubr.msk.bf16.gmra.mrb[236].mxu1 %vm3609_vm0, %v4289_v13 }
 0x499   : > { %v6896_v51 = vpop.eup %6895  ;;  %4482 = vmatprep.mubr.bf16.mxu0 %v9932_v34  ;;  %4675 = vmatprep.mubr.bf16.mxu1 %v9932_v34  ;;  %v3947_v57 = vmul.f32 %v6894_v14, %v8366_v63 }
 0x49a   : > { %v3946_v53 = vmul.f32 %v6896_v51, %v8362_v29 }
 0x49b   : > { %v3864_v6 = vpop.xlane.xlu0 %3863 }
 0x49c   : > { %v4290_v52 = vpack.c.bf16 %v3947_v57, %v3946_v53  ;;  %v10021_v57 = vld [vmem:[#allocation8_spill] sm:$0xff] }
 0x49d   : > { %v3867_v60 = vpop.xlane.xlu1 %3866 }
 0x49e   : > { %6901 = vrcp.f32 %v3867_v60  ;;  %v10023_v60 = vsub.s32 2, %v10021_v57 }
 0x49f   : > { %6903 = vrcp.f32 %v3864_v6  ;;  %v10022_v6 = vsub.s32 0, %v10021_v57 }
 0x4a0   : > { %v6898_v15 = vpop.eup %6897  ;;  %5871 = vmatmul.mubr.msk.bf16.gmra.mrb[208].mxu0 %vm3609_vm0, %v4290_v52  ;;  %5887 = vmatmul.mubr.msk.bf16.gmra.mrb[240].mxu1 %vm3609_vm0, %v4290_v52 }
 0x4a1   : > { %v6900_v45 = vpop.eup %6899  ;;  %4492 = vmatprep.mubr.bf16.mxu0 %v9932_v34  ;;  %4685 = vmatprep.mubr.bf16.mxu1 %v9932_v34  ;;  %v3949_v24 = vmul.f32 %v6898_v15, %v8376_v16  ;;  %v10024_v15 = vsub.s32 1, %v10021_v57 }
 0x4a2   : > { %v3948_v44 = vmul.f32 %v6900_v45, %v8372_v5 }
 0x4a3   : > { %v3870_v63 = vpop.xlane.xlu0 %3869 }
 0x4a4   : > { %v4291_v3 = vpack.c.bf16 %v3949_v24, %v3948_v44  ;;  %v8566_v24 = vld [vmem:[%s8534_s23 + $0x20] sm:$0xff]  ;;  %v10025_v44 = vsub.s32 3, %v10021_v57  ;;  %v8642_v57 = vld [vmem:[%s8534_s23 + $0x98] sm:$0xff] }
 0x4a5   : > { %v3873_v29 = vpop.xlane.xlu1 %3872 }
 0x4a6   : > { %6905 = vrcp.f32 %v3873_v29 }
 0x4a7   : > { %6907 = vrcp.f32 %v3870_v63  ;;  %v8569_v63 = vld [vmem:[%s8534_s23 + $0x28] sm:$0xff] }
 0x4a8   : > { %v6902_v48 = vpop.eup %6901  ;;  %5872 = vmatmul.mubr.msk.bf16.gmra.mrb[212].mxu0 %vm3609_vm0, %v4291_v3  ;;  %5888 = vmatmul.mubr.msk.bf16.gmra.mrb[244].mxu1 %vm3609_vm0, %v4291_v3 }
 0x4a9   : > { %v6904_v31 = vpop.eup %6903  ;;  %4502 = vmatprep.mubr.bf16.mxu0 %v9932_v34  ;;  %4695 = vmatprep.mubr.bf16.mxu1 %v9932_v34  ;;  %v3951_v26 = vmul.f32 %v6902_v48, %v8386_v56 }
 0x4aa   : > { %v3950_v16 = vmul.f32 %v6904_v31, %v8382_v61 }
 0x4ac   : > { %v4292_v17 = vpack.c.bf16 %v3951_v26, %v3950_v16  ;;  %v8579_v26 = vld [vmem:[%s8534_s23 + $0x30] sm:$0xff]  ;;  %v8582_v16 = vld [vmem:[%s8534_s23 + $0x38] sm:$0xff] }
 0x4b0   : > { %v6906_v5 = vpop.eup %6905  ;;  %5873 = vmatmul.mubr.msk.bf16.gmra.mrb[216].mxu0 %vm3609_vm0, %v4292_v17  ;;  %5889 = vmatmul.mubr.msk.bf16.gmra.mrb[248].mxu1 %vm3609_vm0, %v4292_v17 }
 0x4b1   : > { %v6908_v1 = vpop.eup %6907  ;;  %4512 = vmatprep.mubr.bf16.mxu0 %v9932_v34  ;;  %4705 = vmatprep.mubr.bf16.mxu1 %v9932_v34  ;;  %v3953_v39 = vmul.f32 %v6906_v5, %v8394_v40 }
 0x4b2   : > { %v3952_v23 = vmul.f32 %v6908_v1, %v8390_v62 }
 0x4b4   : > { %v4293_v21 = vpack.c.bf16 %v3953_v39, %v3952_v23  ;;  %v8589_v23 = vld [vmem:[%s8534_s23 + $0x40] sm:$0xff] }
 0x4b8   : > { %5874 = vmatmul.mubr.msk.bf16.gmra.mrb[220].mxu0 %vm3609_vm0, %v4293_v21  ;;  %5890 = vmatmul.mubr.msk.bf16.gmra.mrb[252].mxu1 %vm3609_vm0, %v4293_v21  ;;  %v8592_v21 = vld [vmem:[%s8534_s23 + $0x48] sm:$0xff] }
 0x4b9   : > { %4522 = vmatprep.mubr.bf16.mxu0 %v9932_v34  ;;  %4715 = vmatprep.mubr.bf16.mxu1 %v9932_v34 }
 0x4ed   : > { %v3876_v61 = vpop.xlane.xlu0 %3875 }
 0x4ee   : > { %6909 = vrcp.f32 %v3876_v61 }
 0x4f1   : > { %v3879_v56 = vpop.xlane.xlu1 %3878 }
 0x4f2   : > { %6911 = vrcp.f32 %v3879_v56 }
 0x4f6   : > { %v3882_v0 = vpop.xlane.xlu0 %3881 }
 0x4f7   : > { %6913 = vrcp.f32 %v3882_v0 }
 0x4f8   : > { %v6910_v58 = vpop.eup %6909 }
 0x4f9   : > { %v3885_v49 = vpop.xlane.xlu1 %3884  ;;  %v3954_v62 = vmul.f32 %v6910_v58, %v8404_v22  ;;  %v8599_v58 = vld [vmem:[%s8534_s23 + $0x50] sm:$0xff] }
 0x4fa   : > { %6915 = vrcp.f32 %v3885_v49 }
 0x4fc   : > { %v6912_v40 = vpop.eup %6911 }
 0x4fd   : > { %v3955_v30 = vmul.f32 %v6912_v40, %v8413_v8  ;;  %v8602_v40 = vld [vmem:[%s8534_s23 + $0x58] sm:$0xff] }
 0x4fe   : > { %v3888_v2 = vpop.xlane.xlu0 %3887 }
 0x4ff   : > { %v4294_v9 = vpack.c.bf16 %v3955_v30, %v3954_v62  ;;  %6917 = vrcp.f32 %v3888_v2  ;;  %v8707_v62 = vld [vmem:[%s8534_s23 + $0xf0] sm:$0xff]  ;;  %v8721_v30 = vld [vmem:[%s8534_s23 + $0x100] sm:$0xff] }
 0x500   : > { %10026 = vst [vmem:[#allocation8_spill] sm:$0xff] %v8707_v62  ;;  %10028 = vst [vmem:[#allocation129_spill] sm:$0xff] %v8721_v30 }
 0x501   : > { %v3891_v12 = vpop.xlane.xlu1 %3890  ;;  %5875 = vmatmul.mubr.msk.bf16.gmra.mrb[224].mxu0 %vm3609_vm0, %v4294_v9  ;;  %5891 = vmatmul.mubr.msk.bf16.gmra.mrb[0].mxu1 %vm3609_vm0, %v4294_v9  ;;  %v6914_v19 = vpop.eup %6913 }
 0x502   : > { %6919 = vrcp.f32 %v3891_v12  ;;  %4532 = vmatprep.mubr.bf16.mxu0 %v9932_v34  ;;  %4725 = vmatprep.mubr.bf16.mxu1 %v9932_v34  ;;  %v3956_v50 = vmul.f32 %v6914_v19, %v8420_v7  ;;  %v8609_v12 = vld [vmem:[%s8534_s23 + $0x60] sm:$0xff]  ;;  %v8612_v19 = vld [vmem:[%s8534_s23 + $0x68] sm:$0xff] }
 0x504   : > { %v6916_v54 = vpop.eup %6915 }
 0x505   : > { %v3957_v22 = vmul.f32 %v6916_v54, %v8428_v27 }
 0x506   : > { %v3894_v8 = vpop.xlane.xlu0 %3893 }
 0x507   : > { %v4295_v41 = vpack.c.bf16 %v3957_v22, %v3956_v50  ;;  %6921 = vrcp.f32 %v3894_v8  ;;  %v8679_v22 = vld [vmem:[%s8534_s23 + $0xd0] sm:$0xff]  ;;  %v8724_v8 = vld [vmem:[%s8534_s23 + $0x108] sm:$0xff] }
 0x509   : > { %v3897_v10 = vpop.xlane.xlu1 %3896  ;;  %5876 = vmatmul.mubr.msk.bf16.gmra.mrb[228].mxu0 %vm3609_vm0, %v4295_v41  ;;  %5892 = vmatmul.mubr.msk.bf16.gmra.mrb[4].mxu1 %vm3609_vm0, %v4295_v41  ;;  %v6918_v11 = vpop.eup %6917  ;;  %v8619_v41 = vld [vmem:[%s8534_s23 + $0x70] sm:$0xff] }
 0x50a   : > { %6923 = vrcp.f32 %v3897_v10  ;;  %4542 = vmatprep.mubr.bf16.mxu0 %v9932_v34  ;;  %4735 = vmatprep.mubr.bf16.mxu1 %v9932_v34  ;;  %v3958_v7 = vmul.f32 %v6918_v11, %v8436_v37  ;;  %v8542_v37 = vld [vmem:[%s8534_s23] sm:$0xff]  ;;  %v8622_v10 = vld [vmem:[%s8534_s23 + $0x78] sm:$0xff]  ;;  %v8672_v11 = vld [vmem:[%s8534_s23 + $0xc8] sm:$0xff] }
 0x50b   : > { %v4026_v3 = vunpack.c.l.bf16 %v8542_v37  ;;  %v4027_v31 = vunpack.c.h.bf16 %v8542_v37 }
 0x50c   : > { %v6920_v38 = vpop.eup %6919 }
 0x50d   : > { %v3959_v27 = vmul.f32 %v6920_v38, %v8443_v28  ;;  %v8545_v28 = vld [vmem:[%s8534_s23 + $0x8] sm:$0xff] }
 0x50e   : > { %v4028_v48 = vunpack.c.l.bf16 %v8545_v28  ;;  %v4029_v17 = vunpack.c.h.bf16 %v8545_v28 }
 0x50f   : > { %v4296_v25 = vpack.c.bf16 %v3959_v27, %v3958_v7  ;;  %v8662_v7 = vld [vmem:[%s8534_s23 + $0xb8] sm:$0xff]  ;;  %v8689_v27 = vld [vmem:[%s8534_s23 + $0xe0] sm:$0xff] }
 0x511   : > { %5877 = vmatmul.mubr.msk.bf16.gmra.mrb[232].mxu0 %vm3609_vm0, %v4296_v25  ;;  %5893 = vmatmul.mubr.msk.bf16.gmra.mrb[8].mxu1 %vm3609_vm0, %v4296_v25  ;;  %v6922_v55 = vpop.eup %6921  ;;  %v8629_v25 = vld [vmem:[%s8534_s23 + $0x80] sm:$0xff] }
 0x512   : > { %4552 = vmatprep.mubr.bf16.mxu0 %v9932_v34  ;;  %4745 = vmatprep.mubr.bf16.mxu1 %v9932_v34  ;;  %v3960_v13 = vmul.f32 %v6922_v55, %v8450_v43  ;;  %v1565_v34 = vld [vmem:[%s9824_s7] sm:$0xf]  ;;  %v8548_v43 = vld [vmem:[%s8534_s23 + $0x10] sm:$0xff]  ;;  %v8632_v55 = vld [vmem:[%s8534_s23 + $0x88] sm:$0xff] }
 0x513   : > { %v8555_v53 = vrot.slane %v1565_v34, %v10022_v6  ;;  %v8559_v52 = vrot.slane %v1565_v34, %v10023_v60  ;;  %v8563_v45 = vrot.slane %v1565_v34, %v10024_v15  ;;  %v8573_v29 = vrot.slane %v1565_v34, %v10025_v44  ;;  %v8639_v34 = vld [vmem:[%s8534_s23 + $0x90] sm:$0xff]  ;;  %v8682_v15 = vld [vmem:[%s8534_s23 + $0xd8] sm:$0xff]  ;;  %v8692_v6 = vld [vmem:[%s8534_s23 + $0xe8] sm:$0xff] }
 0x514   : > { %v6924_v33 = vpop.eup %6923  ;;  %v4030_v5 = vunpack.c.l.bf16 %v8548_v43  ;;  %v4031_v39 = vunpack.c.h.bf16 %v8548_v43  ;;  %v8659_v60 = vld [vmem:[%s8534_s23 + $0xb0] sm:$0xff] }
 0x515   : > { %v3961_v14 = vmul.f32 %v6924_v33, %v8457_v46  ;;  %v8551_v46 = vld [vmem:[%s8534_s23 + $0x18] sm:$0xff]  ;;  %v8652_v33 = vld [vmem:[%s8534_s23 + $0xa8] sm:$0xff]  ;;  %v6211_v50 = vadd.f32 %v7821_v42, %v8555_v53  ;;  %v6275_v54 = vadd.f32 %v7823_v47, %v8559_v52  ;;  %v6212_v2 = vadd.f32 %v7825_v59, %v8563_v45  ;;  %v10032_v43 = vld [vmem:[#allocation18_spill] sm:$0xff] }
 0x516   : > { %v4032_v1 = vunpack.c.l.bf16 %v8551_v46  ;;  %v6276_v44 = vadd.f32 %v7827_v4, %v8573_v29  ;;  %v6213_v9 = vadd.f32 %v7829_v32, %v8555_v53  ;;  %v6277_v38 = vadd.f32 %v7831_v36, %v8559_v52  ;;  %v10036_v59 = vld [vmem:[#allocation10_spill] sm:$0xff] }
 0x517   : > { %v4297_v51 = vpack.c.bf16 %v3961_v14, %v3960_v13  ;;  %v8649_v13 = vld [vmem:[%s8534_s23 + $0xa0] sm:$0xff]  ;;  %v6214_v42 = vadd.f32 %v7833_v18, %v8563_v45  ;;  %v6278_v47 = vadd.f32 %v7835_v20, %v8573_v29  ;;  %v4154_v18 = vadd.f32 %v6211_v50, %v4026_v3  ;;  %v10031_v50 = vld [vmem:[#allocation19_spill] sm:$0xff] }
 0x518   : > { %v8669_v14 = vld [vmem:[%s8534_s23 + $0xc0] sm:$0xff]  ;;  %v4156_v20 = vadd.f32 %v6275_v54, %v4028_v48  ;;  %v4155_v4 = vadd.f32 %v6212_v2, %v4027_v31  ;;  %v4157_v0 = vadd.f32 %v6276_v44, %v4029_v17  ;;  %v4158_v32 = vadd.f32 %v6213_v9, %v4030_v5  ;;  %v10030_v31 = vld [vmem:[#allocation17_spill] sm:$0xff] }
 0x519   : > { %5878 = vmatmul.mubr.msk.bf16.gmra.mrb[236].mxu0 %vm3609_vm0, %v4297_v51  ;;  %5894 = vmatmul.mubr.msk.bf16.gmra.mrb[12].mxu1 %vm3609_vm0, %v4297_v51  ;;  %v8710_v51 = vld [vmem:[%s8534_s23 + $0xf8] sm:$0xff]  ;;  %v4160_v61 = vadd.f32 %v6277_v38, %v4032_v1  ;;  %v4159_v3 = vadd.f32 %v6214_v42, %v4031_v39  ;;  %v10029_v48 = vunpack.c.h.bf16 %v8551_v46  ;;  %v6215_v28 = vadd.f32 %v7841_v35, %v8555_v53 }
 0x51a   : > { %10027 = vst [vmem:[#allocation128_spill] sm:$0xff] %v8710_v51  ;;  %v6279_v17 = vadd.f32 %v10030_v31, %v8559_v52  ;;  %v6216_v1 = vadd.f32 %v10031_v50, %v8563_v45  ;;  %v6280_v38 = vadd.f32 %v10032_v43, %v8573_v29  ;;  %v8770_v35 = vld [vmem:[%s8534_s23 + $0x118] sm:$0xff]  ;;  %v10035_v43 = vld [vmem:[#allocation22_spill] sm:$0xff]  ;;  %v6282_v30 = vadd.f32 %v10036_v59, %v8573_v29 }
 0x51b   : > { %v4161_v37 = vadd.f32 %v6278_v47, %v10029_v48  ;;  %v8767_v47 = vld [vmem:[%s8534_s23 + $0x110] sm:$0xff]  ;;  %v10033_v48 = vld [vmem:[#allocation21_spill] sm:$0xff]  ;;  %v10040_v59 = vunpack.c.h.bf16 %v8569_v63  ;;  %v10056_v51 = vunpack.c.h.bf16 %v8592_v21 }
 0x532   : > { %v4404_v49 = vpop.f32.mrb[176].mxu0  ;;  %v4597_v56 = vpop.f32.mrb[208].mxu1 }
 0x533   : > { %v4756_v2 = vmul.f32 %v4404_v49, %v4154_v18  ;;  %v4758_v54 = vmul.f32 %v4597_v56, %v4156_v20  ;;  %v4406_v5 = vpop.f32.mrb[177].mxu0  ;;  %v4599_v9 = vpop.f32.mrb[209].mxu1  ;;  %v6217_v49 = vadd.f32 %v10033_v48, %v8555_v53  ;;  %v10034_v56 = vld [vmem:[#allocation20_spill] sm:$0xff] }
 0x534   : > { %v4757_v39 = vmul.f32 %v4406_v5, %v4155_v4  ;;  %v4759_v44 = vmul.f32 %v4599_v9, %v4157_v0  ;;  %v4408_v46 = vpop.f32.mrb[178].mxu0  ;;  %v4601_v42 = vpop.f32.mrb[210].mxu1  ;;  %v6281_v18 = vadd.f32 %v10034_v56, %v8559_v52  ;;  %v6218_v4 = vadd.f32 %v10035_v43, %v8563_v45 }
 0x535   : > { %v4760_v20 = vmul.f32 %v4408_v46, %v4158_v32  ;;  %v4762_v31 = vmul.f32 %v4601_v42, %v4160_v61  ;;  %v4410_v50 = vpop.f32.mrb[179].mxu0  ;;  %v4603_v36 = vpop.f32.mrb[211].mxu1  ;;  %v10037_v61 = vunpack.c.l.bf16 %v8566_v24 }
 0x536   : > { %v4884_v0 = vadd.f32 %v4757_v39, %v4756_v2  ;;  %v4761_v5 = vmul.f32 %v4410_v50, %v4159_v3  ;;  %v4763_v9 = vmul.f32 %v4603_v36, %v4161_v37  ;;  %v10038_v2 = vunpack.c.l.bf16 %v8569_v63  ;;  %v10046_v63 = vld [vmem:[#allocation23_spill] sm:$0xff] }
 0x537   : > { %v4162_v46 = vadd.f32 %v6215_v28, %v10037_v61  ;;  %v10039_v36 = vunpack.c.h.bf16 %v8566_v24  ;;  %v4165_v39 = vadd.f32 %v6280_v38, %v10040_v59  ;;  %v10041_v50 = vunpack.c.l.bf16 %v8579_v26  ;;  %v10045_v24 = vld [vmem:[#allocation12_spill] sm:$0xff] }
 0x538   : > { %v4916_v56 = vadd.f32 %v4884_v0, %v4758_v54  ;;  %v4885_v32 = vadd.f32 %v4761_v5, %v4760_v20  ;;  %v4164_v3 = vadd.f32 %v6279_v17, %v10038_v2  ;;  %v10042_v20 = vunpack.c.l.bf16 %v8582_v16  ;;  %v10044_v17 = vld [vmem:[#allocation9_spill] sm:$0xff] }
 0x539   : > { %v4163_v37 = vadd.f32 %v6216_v1, %v10039_v36  ;;  %v4166_v43 = vadd.f32 %v6217_v49, %v10041_v50  ;;  %v10043_v0 = vunpack.c.h.bf16 %v8579_v26  ;;  %v6219_v61 = vadd.f32 %v10044_v17, %v8555_v53  ;;  %v10049_v50 = vld [vmem:[#allocation25_spill] sm:$0xff] }
 0x53a   : > { %v8794_v62 = vadd.f32 %v4916_v56, %v4759_v44  ;;  %v4917_v54 = vadd.f32 %v4885_v32, %v4762_v31  ;;  %v4168_v28 = vadd.f32 %v6281_v18, %v10042_v20  ;;  %v6283_v1 = vadd.f32 %v10045_v24, %v8559_v52  ;;  %v10048_v18 = vld [vmem:[#allocation24_spill] sm:$0xff] }
 0x53b   : > { %v4167_v5 = vadd.f32 %v6218_v4, %v10043_v0  ;;  %v6220_v38 = vadd.f32 %v10046_v63, %v8563_v45  ;;  %v4414_v2 = vpop.f32.mrb[180].mxu0  ;;  %v4607_v49 = vpop.f32.mrb[212].mxu1  ;;  %v10047_v44 = vunpack.c.h.bf16 %v8582_v16  ;;  %v6284_v56 = vadd.f32 %v10048_v18, %v8573_v29  ;;  %v10050_v16 = vld [vmem:[#allocation26_spill] sm:$0xff] }
 0x53c   : > { %v8810_v26 = vadd.f32 %v4917_v54, %v4763_v9  ;;  %v4764_v4 = vmul.f32 %v4414_v2, %v4162_v46  ;;  %v4766_v32 = vmul.f32 %v4607_v49, %v4164_v3  ;;  %v4416_v36 = vpop.f32.mrb[181].mxu0  ;;  %v4609_v59 = vpop.f32.mrb[213].mxu1  ;;  %4980 = vrot.lane.b32.xlu0 %v8794_v62, %s7002_s15  ;;  %v6221_v20 = vadd.f32 %v10049_v50, %v8555_v53  ;;  %v8819_v9 = vld [vmem:[%s8534_s23 + $0x120] sm:$0xff]  ;;  %v10051_v46 = vld [vmem:[#allocation27_spill] sm:$0xff] }
 0x53d   : > { %v4169_v31 = vadd.f32 %v6282_v30, %v10047_v44  ;;  %v6285_v0 = vadd.f32 %v10050_v16, %v8559_v52  ;;  %v4765_v30 = vmul.f32 %v4416_v36, %v4163_v37  ;;  %v4767_v17 = vmul.f32 %v4609_v59, %v4165_v39  ;;  %v4418_v24 = vpop.f32.mrb[182].mxu0  ;;  %v4611_v63 = vpop.f32.mrb[214].mxu1  ;;  %v10052_v54 = vld [vmem:[#allocation28_spill] sm:$0xff] }
 0x53e   : > { %v6222_v3 = vadd.f32 %v10051_v46, %v8563_v45  ;;  %v6286_v2 = vadd.f32 %v10052_v54, %v8573_v29  ;;  %v4768_v49 = vmul.f32 %v4418_v24, %v4166_v43  ;;  %v4770_v44 = vmul.f32 %v4611_v63, %v4168_v28  ;;  %v4420_v18 = vpop.f32.mrb[183].mxu0  ;;  %v4613_v42 = vpop.f32.mrb[215].mxu1  ;;  %4982 = vrot.lane.b32.xlu1 %v8810_v26, %s7002_s15 }
 0x53f   : > { %v4886_v50 = vadd.f32 %v4765_v30, %v4764_v4  ;;  %v4769_v37 = vmul.f32 %v4420_v18, %v4167_v5  ;;  %v4771_v39 = vmul.f32 %v4613_v42, %v4169_v31  ;;  %v10053_v59 = vunpack.c.l.bf16 %v8589_v23  ;;  %v10058_v31 = vld [vmem:[#allocation11_spill] sm:$0xff] }
 0x540   : > { %v10054_v46 = vunpack.c.l.bf16 %v8592_v21  ;;  %v10055_v54 = vunpack.c.h.bf16 %v8589_v23  ;;  %v4173_v4 = vadd.f32 %v6284_v56, %v10056_v51  ;;  %v10057_v42 = vunpack.c.l.bf16 %v8599_v58  ;;  %v10063_v51 = vld [vmem:[#allocation29_spill] sm:$0xff] }
 0x541   : > { %v4170_v16 = vadd.f32 %v6219_v61, %v10053_v59  ;;  %v4918_v24 = vadd.f32 %v4886_v50, %v4766_v32  ;;  %v4887_v63 = vadd.f32 %v4769_v37, %v4768_v49  ;;  %v6223_v30 = vadd.f32 %v10058_v31, %v8555_v53  ;;  %v10062_v49 = vld [vmem:[#allocation14_spill] sm:$0xff]  ;;  %v8858_v31 = vld [vmem:[%s8534_s23 + $0x128] sm:$0xff] }
 0x542   : > { %v4172_v48 = vadd.f32 %v6283_v1, %v10054_v46  ;;  %v4171_v43 = vadd.f32 %v6220_v38, %v10055_v54  ;;  %v4174_v5 = vadd.f32 %v6221_v20, %v10057_v42  ;;  %v10059_v61 = vunpack.c.l.bf16 %v8602_v40  ;;  %v10064_v46 = vld [vmem:[#allocation30_spill] sm:$0xff] }
 0x543   : > { %v10060_v23 = vunpack.c.h.bf16 %v8599_v58  ;;  %v10061_v18 = vunpack.c.h.bf16 %v8602_v40  ;;  %v6287_v21 = vadd.f32 %v10062_v49, %v8559_v52  ;;  %v6224_v56 = vadd.f32 %v10063_v51, %v8563_v45  ;;  %v4424_v37 = vpop.f32.mrb[184].mxu0  ;;  %v4617_v59 = vpop.f32.mrb[216].mxu1  ;;  %v10065_v58 = vld [vmem:[#allocation31_spill] sm:$0xff]  ;;  %v10067_v49 = vld [vmem:[#allocation33_spill] sm:$0xff] }
 0x544   : > { %v4176_v1 = vadd.f32 %v6285_v0, %v10059_v61  ;;  %v8851_v20 = vadd.f32 %v4918_v24, %v4767_v17  ;;  %v4919_v50 = vadd.f32 %v4887_v63, %v4770_v44  ;;  %v6288_v0 = vadd.f32 %v10064_v46, %v8573_v29  ;;  %v4619_v42 = vpop.f32.mrb[217].mxu1  ;;  %v10066_v61 = vld [vmem:[#allocation32_spill] sm:$0xff] }
 0x545   : > { %v4175_v38 = vadd.f32 %v6222_v3, %v10060_v23  ;;  %v4177_v32 = vadd.f32 %v6286_v2, %v10061_v18  ;;  %v6225_v3 = vadd.f32 %v10065_v58, %v8555_v53  ;;  %v4772_v54 = vmul.f32 %v4424_v37, %v4170_v16  ;;  %v4426_v2 = vpop.f32.mrb[185].mxu0  ;;  %v4621_v18 = vpop.f32.mrb[218].mxu1 }
 0x546   : > { %v4774_v40 = vmul.f32 %v4617_v59, %v4172_v48  ;;  %v6289_v23 = vadd.f32 %v10066_v61, %v8559_v52  ;;  %v8862_v17 = vadd.f32 %v4919_v50, %v4771_v39  ;;  %v4773_v44 = vmul.f32 %v4426_v2, %v4171_v43  ;;  %v4428_v63 = vpop.f32.mrb[186].mxu0  ;;  %4984 = vrot.lane.b32.xlu1 %v8851_v20, %s7002_s15  ;;  %v10068_v48 = vld [vmem:[#allocation34_spill] sm:$0xff]  ;;  %v4623_v58 = vpop.f32.mrb[219].mxu1 }
 0x547   : > { %v4775_v24 = vmul.f32 %v4619_v42, %v4173_v4  ;;  %v6226_v16 = vadd.f32 %v10067_v49, %v8563_v45  ;;  %v6290_v51 = vadd.f32 %v10068_v48, %v8573_v29  ;;  %v4776_v37 = vmul.f32 %v4428_v63, %v4174_v5  ;;  %v4430_v46 = vpop.f32.mrb[187].mxu0 }
 0x548   : > { %v4778_v59 = vmul.f32 %v4621_v18, %v4176_v1  ;;  %v4888_v61 = vadd.f32 %v4773_v44, %v4772_v54  ;;  %v4777_v39 = vmul.f32 %v4430_v46, %v4175_v38  ;;  %v4779_v50 = vmul.f32 %v4623_v58, %v4177_v32  ;;  %v10078_v46 = vld [vmem:[#allocation16_spill] sm:$0xff] }
 0x549   : > { %v4100_v43 = vunpack.c.l.bf16 %v8858_v31  ;;  %v10069_v4 = vunpack.c.l.bf16 %v8609_v12  ;;  %v10070_v42 = vunpack.c.l.bf16 %v8612_v19  ;;  %v10071_v49 = vunpack.c.h.bf16 %v8609_v12 }
 0x54a   : > { %v4099_v48 = vunpack.c.h.bf16 %v8819_v9  ;;  %v4920_v5 = vadd.f32 %v4888_v61, %v4774_v40  ;;  %v4889_v1 = vadd.f32 %v4777_v39, %v4776_v37  ;;  %4986 = vrot.lane.b32.xlu1 %v8862_v17, %s7002_s15  ;;  %v10072_v38 = vunpack.c.h.bf16 %v8612_v19  ;;  %v10079_v19 = vld [vmem:[#allocation35_spill] sm:$0xff] }
 0x54b   : > { %v4178_v2 = vadd.f32 %v6223_v30, %v10069_v4  ;;  %v4180_v28 = vadd.f32 %v6287_v21, %v10070_v42  ;;  %v4179_v36 = vadd.f32 %v6224_v56, %v10071_v49  ;;  %v10073_v54 = vunpack.c.l.bf16 %v8619_v41  ;;  %v10074_v30 = vld [vmem:[#allocation13_spill] sm:$0xff]  ;;  %v4434_v39 = vpop.f32.mrb[188].mxu0  ;;  %v4627_v4 = vpop.f32.mrb[220].mxu1 }
 0x54c   : > { %v4181_v32 = vadd.f32 %v6288_v0, %v10072_v38  ;;  %v6227_v63 = vadd.f32 %v10074_v30, %v8555_v53  ;;  %v10075_v21 = vunpack.c.l.bf16 %v8622_v10  ;;  %v10076_v56 = vunpack.c.h.bf16 %v8619_v41  ;;  %v10081_v41 = vld [vmem:[#allocation37_spill] sm:$0xff]  ;;  %v4436_v49 = vpop.f32.mrb[189].mxu0  ;;  %v4629_v38 = vpop.f32.mrb[221].mxu1 }
 0x54d   : > { %v4182_v44 = vadd.f32 %v6225_v3, %v10073_v54  ;;  %v10077_v40 = vunpack.c.h.bf16 %v8622_v10  ;;  %v6291_v58 = vadd.f32 %v10078_v46, %v8559_v52  ;;  %v6228_v0 = vadd.f32 %v10079_v19, %v8563_v45  ;;  %v10082_v54 = vld [vmem:[#allocation38_spill] sm:$0xff] }
 0x54e   : > { %v4184_v12 = vadd.f32 %v6289_v23, %v10075_v21  ;;  %v4183_v18 = vadd.f32 %v6226_v16, %v10076_v56  ;;  %v8896_v61 = vadd.f32 %v4920_v5, %v4775_v24  ;;  %v4921_v3 = vadd.f32 %v4889_v1, %v4778_v59  ;;  %v10080_v23 = vld [vmem:[#allocation36_spill] sm:$0xff]  ;;  %v4438_v5 = vpop.f32.mrb[190].mxu0  ;;  %v4631_v1 = vpop.f32.mrb[222].mxu1  ;;  %v8909_v56 = vld [vmem:[%s8534_s23 + $0x130] sm:$0xff] }
 0x54f   : > { %v4185_v37 = vadd.f32 %v6290_v51, %v10077_v40  ;;  %v6292_v42 = vadd.f32 %v10080_v23, %v8573_v29  ;;  %v6229_v16 = vadd.f32 %v10081_v41, %v8555_v53  ;;  %v4780_v10 = vmul.f32 %v4434_v39, %v4178_v2  ;;  %v10083_v40 = vld [vmem:[#allocation39_spill] sm:$0xff] }
 0x550   : > { %v4782_v51 = vmul.f32 %v4627_v4, %v4180_v28  ;;  %v6293_v30 = vadd.f32 %v10082_v54, %v8559_v52  ;;  %v8904_v21 = vadd.f32 %v4921_v3, %v4779_v50  ;;  %v4781_v24 = vmul.f32 %v4436_v49, %v4179_v36  ;;  %4988 = vrot.lane.b32.xlu0 %v8896_v61, %s7002_s15  ;;  %v10084_v28 = vld [vmem:[#allocation40_spill] sm:$0xff]  ;;  %v4440_v4 = vpop.f32.mrb[191].mxu0  ;;  %v4633_v50 = vpop.f32.mrb[223].mxu1 }
 0x551   : > { %v4783_v59 = vmul.f32 %v4629_v38, %v4181_v32  ;;  %v6230_v2 = vadd.f32 %v10083_v40, %v8563_v45  ;;  %v6294_v46 = vadd.f32 %v10084_v28, %v8573_v29  ;;  %v4784_v19 = vmul.f32 %v4438_v5, %v4182_v44  ;;  %v10090_v28 = vld [vmem:[#allocation15_spill] sm:$0xff] }
 0x552   : > { %v4786_v39 = vmul.f32 %v4631_v1, %v4184_v12  ;;  %v4890_v3 = vadd.f32 %v4781_v24, %v4780_v10  ;;  %v4785_v36 = vmul.f32 %v4440_v4, %v4183_v18  ;;  %v4787_v32 = vmul.f32 %v4633_v50, %v4185_v37  ;;  %4990 = vrot.lane.b32.xlu1 %v8904_v21, %s7002_s15 }
 0x553   : > { %v4101_v23 = vunpack.c.h.bf16 %v8858_v31  ;;  %v10085_v41 = vunpack.c.l.bf16 %v8629_v25  ;;  %v10086_v38 = vunpack.c.l.bf16 %v8632_v55  ;;  %v10087_v40 = vunpack.c.h.bf16 %v8629_v25 }
 0x554   : > { %v4922_v5 = vadd.f32 %v4890_v3, %v4782_v51  ;;  %v4891_v10 = vadd.f32 %v4785_v36, %v4784_v19  ;;  %v10088_v18 = vunpack.c.h.bf16 %v8632_v55  ;;  %v10089_v24 = vunpack.c.l.bf16 %v8639_v34  ;;  %v10094_v19 = vld [vmem:[#allocation41_spill] sm:$0xff] }
 0x555   : > { %v4186_v49 = vadd.f32 %v6227_v63, %v10085_v41  ;;  %v4188_v54 = vadd.f32 %v6291_v58, %v10086_v38  ;;  %v4187_v44 = vadd.f32 %v6228_v0, %v10087_v40  ;;  %v6231_v4 = vadd.f32 %v10090_v28, %v8555_v53  ;;  %v4444_v41 = vpop.f32.mrb[192].mxu0  ;;  %v4637_v38 = vpop.f32.mrb[224].mxu1  ;;  %v10096_v40 = vld [vmem:[#allocation43_spill] sm:$0xff] }
 0x556   : > { %v4189_v37 = vadd.f32 %v6292_v42, %v10088_v18  ;;  %v4190_v1 = vadd.f32 %v6229_v16, %v10089_v24  ;;  %v10091_v63 = vunpack.c.l.bf16 %v8642_v57  ;;  %v10092_v25 = vunpack.c.h.bf16 %v8639_v34  ;;  %v10095_v42 = vld [vmem:[#allocation42_spill] sm:$0xff]  ;;  %v10097_v34 = vld [vmem:[#allocation44_spill] sm:$0xff]  ;;  %v4639_v24 = vpop.f32.mrb[225].mxu1  ;;  %v8948_v28 = vld [vmem:[%s8534_s23 + $0x138] sm:$0xff] }
 0x557   : > { %v10093_v50 = vunpack.c.h.bf16 %v8642_v57  ;;  %v6295_v55 = vadd.f32 %v10094_v19, %v8559_v52  ;;  %v6232_v3 = vadd.f32 %v10095_v42, %v8563_v45  ;;  %v8941_v16 = vadd.f32 %v4922_v5, %v4783_v59  ;;  %v10099_v19 = vld [vmem:[#allocation46_spill] sm:$0xff] }
 0x558   : > { %v4192_v58 = vadd.f32 %v6293_v30, %v10091_v63  ;;  %v4191_v0 = vadd.f32 %v6230_v2, %v10092_v25  ;;  %v4923_v36 = vadd.f32 %v4891_v10, %v4786_v39  ;;  %v6296_v30 = vadd.f32 %v10096_v40, %v8573_v29  ;;  %v10098_v63 = vld [vmem:[#allocation45_spill] sm:$0xff] }
 0x559   : > { %v4193_v51 = vadd.f32 %v6294_v46, %v10093_v50  ;;  %v6233_v2 = vadd.f32 %v10097_v34, %v8555_v53  ;;  %v4788_v18 = vmul.f32 %v4444_v41, %v4186_v49  ;;  %v4790_v57 = vmul.f32 %v4637_v38, %v4188_v54  ;;  %v4446_v46 = vpop.f32.mrb[193].mxu0  ;;  %v4641_v50 = vpop.f32.mrb[226].mxu1  ;;  %4992 = vrot.lane.b32.xlu0 %v8941_v16, %s7002_s15  ;;  %v10100_v54 = vld [vmem:[#allocation47_spill] sm:$0xff] }
 0x55a   : > { %v6297_v25 = vadd.f32 %v10098_v63, %v8559_v52  ;;  %v8952_v59 = vadd.f32 %v4923_v36, %v4787_v32  ;;  %v4789_v39 = vmul.f32 %v4446_v46, %v4187_v44  ;;  %v4791_v5 = vmul.f32 %v4639_v24, %v4189_v37  ;;  %v4448_v10 = vpop.f32.mrb[194].mxu0  ;;  %v4643_v34 = vpop.f32.mrb[227].mxu1 }
 0x55b   : > { %v6234_v49 = vadd.f32 %v10099_v19, %v8563_v45  ;;  %v6298_v42 = vadd.f32 %v10100_v54, %v8573_v29  ;;  %v4792_v41 = vmul.f32 %v4448_v10, %v4190_v1  ;;  %v4794_v38 = vmul.f32 %v4641_v50, %v4192_v58  ;;  %v4450_v40 = vpop.f32.mrb[195].mxu0 }
 0x55c   : > { %v4892_v63 = vadd.f32 %v4789_v39, %v4788_v18  ;;  %v4793_v32 = vmul.f32 %v4450_v40, %v4191_v0  ;;  %v4795_v36 = vmul.f32 %v4643_v34, %v4193_v51  ;;  %4994 = vrot.lane.b32.xlu1 %v8952_v59, %s7002_s15  ;;  %v10101_v37 = vunpack.c.l.bf16 %v8649_v13  ;;  %v10106_v40 = vld [vmem:[#allocation48_spill] sm:$0xff] }
 0x55d   : > { %v10102_v24 = vunpack.c.l.bf16 %v8652_v33  ;;  %v10103_v54 = vunpack.c.h.bf16 %v8649_v13  ;;  %v10104_v0 = vunpack.c.h.bf16 %v8652_v33  ;;  %v10105_v39 = vunpack.c.l.bf16 %v8659_v60  ;;  %v10111_v33 = vld [vmem:[#allocation50_spill] sm:$0xff] }
 0x55e   : > { %v4194_v46 = vadd.f32 %v6231_v4, %v10101_v37  ;;  %v4924_v10 = vadd.f32 %v4892_v63, %v4790_v57  ;;  %v4893_v18 = vadd.f32 %v4793_v32, %v4792_v41  ;;  %v6235_v34 = vadd.f32 %v10106_v40, %v8555_v53  ;;  %v10110_v57 = vld [vmem:[#allocation49_spill] sm:$0xff]  ;;  %v4454_v32 = vpop.f32.mrb[196].mxu0 }
 0x55f   : > { %v4196_v19 = vadd.f32 %v6295_v55, %v10102_v24  ;;  %v4195_v1 = vadd.f32 %v6232_v3, %v10103_v54  ;;  %v4197_v51 = vadd.f32 %v6296_v30, %v10104_v0  ;;  %v4198_v50 = vadd.f32 %v6233_v2, %v10105_v39  ;;  %v4647_v54 = vpop.f32.mrb[228].mxu1  ;;  %v4456_v39 = vpop.f32.mrb[197].mxu0 }
 0x560   : > { %v10107_v4 = vunpack.c.l.bf16 %v8662_v7  ;;  %v10108_v55 = vunpack.c.h.bf16 %v8659_v60  ;;  %v10109_v3 = vunpack.c.h.bf16 %v8662_v7  ;;  %v6299_v41 = vadd.f32 %v10110_v57, %v8559_v52  ;;  %v10113_v60 = vld [vmem:[#allocation52_spill] sm:$0xff]  ;;  %v4649_v40 = vpop.f32.mrb[229].mxu1 }
 0x561   : > { %v6236_v30 = vadd.f32 %v10111_v33, %v8563_v45  ;;  %v8986_v63 = vadd.f32 %v4924_v10, %v4791_v5  ;;  %v4925_v2 = vadd.f32 %v4893_v18, %v4794_v38  ;;  %v4796_v7 = vmul.f32 %v4454_v32, %v4194_v46  ;;  %v4458_v10 = vpop.f32.mrb[198].mxu0  ;;  %v4651_v18 = vpop.f32.mrb[230].mxu1  ;;  %v8999_v57 = vld [vmem:[%s8534_s23 + $0x140] sm:$0xff]  ;;  %v10115_v33 = vld [vmem:[#allocation54_spill] sm:$0xff] }
 0x562   : > { %v4200_v37 = vadd.f32 %v6297_v25, %v10107_v4  ;;  %v4199_v13 = vadd.f32 %v6234_v49, %v10108_v55  ;;  %v4201_v24 = vadd.f32 %v6298_v42, %v10109_v3  ;;  %v10112_v25 = vld [vmem:[#allocation51_spill] sm:$0xff]  ;;  %v6237_v49 = vadd.f32 %v10113_v60, %v8555_v53  ;;  %v10114_v4 = vld [vmem:[#allocation53_spill] sm:$0xff]  ;;  %v4460_v60 = vpop.f32.mrb[199].mxu0 }
 0x563   : > { %v6300_v0 = vadd.f32 %v10112_v25, %v8573_v29  ;;  %v4798_v42 = vmul.f32 %v4647_v54, %v4196_v19  ;;  %v6301_v55 = vadd.f32 %v10114_v4, %v8559_v52  ;;  %v8994_v3 = vadd.f32 %v4925_v2, %v4795_v36  ;;  %4996 = vrot.lane.b32.xlu0 %v8986_v63, %s7002_s15  ;;  %v10116_v19 = vld [vmem:[#allocation55_spill] sm:$0xff]  ;;  %v4653_v36 = vpop.f32.mrb[231].mxu1 }
 0x564   : > { %v4797_v5 = vmul.f32 %v4456_v39, %v4195_v1  ;;  %v4799_v38 = vmul.f32 %v4649_v40, %v4197_v51  ;;  %v6238_v46 = vadd.f32 %v10115_v33, %v8563_v45  ;;  %v6302_v32 = vadd.f32 %v10116_v19, %v8573_v29 }
 0x565   : > { %v4800_v54 = vmul.f32 %v4458_v10, %v4198_v50  ;;  %v4802_v25 = vmul.f32 %v4651_v18, %v4200_v37  ;;  %v4801_v1 = vmul.f32 %v4460_v60, %v4199_v13  ;;  %v4803_v51 = vmul.f32 %v4653_v36, %v4201_v24  ;;  %4998 = vrot.lane.b32.xlu1 %v8994_v3, %s7002_s15  ;;  %v10122_v60 = vld [vmem:[#allocation56_spill] sm:$0xff] }
 0x566   : > { %v4894_v2 = vadd.f32 %v4797_v5, %v4796_v7  ;;  %v10117_v40 = vunpack.c.l.bf16 %v8669_v14  ;;  %v10118_v33 = vunpack.c.l.bf16 %v8672_v11  ;;  %v10119_v19 = vunpack.c.h.bf16 %v8669_v14 }
 0x567   : > { %v4895_v7 = vadd.f32 %v4801_v1, %v4800_v54  ;;  %v10120_v13 = vunpack.c.h.bf16 %v8672_v11  ;;  %v10121_v5 = vunpack.c.l.bf16 %v8679_v22  ;;  %v6239_v36 = vadd.f32 %v10122_v60, %v8555_v53  ;;  %v10126_v54 = vld [vmem:[#allocation57_spill] sm:$0xff] }
 0x568   : > { %v4202_v4 = vadd.f32 %v6235_v34, %v10117_v40  ;;  %v4204_v58 = vadd.f32 %v6299_v41, %v10118_v33  ;;  %v4203_v50 = vadd.f32 %v6236_v30, %v10119_v19  ;;  %v4926_v10 = vadd.f32 %v4894_v2, %v4798_v42  ;;  %v4464_v33 = vpop.f32.mrb[200].mxu0  ;;  %v4657_v19 = vpop.f32.mrb[232].mxu1 }
 0x569   : > { %v4205_v24 = vadd.f32 %v6300_v0, %v10120_v13  ;;  %v4206_v18 = vadd.f32 %v6237_v49, %v10121_v5  ;;  %v10123_v34 = vunpack.c.l.bf16 %v8682_v15  ;;  %v10124_v14 = vunpack.c.h.bf16 %v8679_v22  ;;  %v10127_v0 = vld [vmem:[#allocation58_spill] sm:$0xff]  ;;  %v10128_v13 = vld [vmem:[#allocation59_spill] sm:$0xff]  ;;  %v10129_v22 = vld [vmem:[#allocation60_spill] sm:$0xff]  ;;  %v4659_v60 = vpop.f32.mrb[233].mxu1 }
 0x56a   : > { %v10125_v40 = vunpack.c.h.bf16 %v8682_v15  ;;  %v6303_v11 = vadd.f32 %v10126_v54, %v8559_v52  ;;  %v6240_v2 = vadd.f32 %v10127_v0, %v8563_v45  ;;  %v9031_v49 = vadd.f32 %v4926_v10, %v4799_v38  ;;  %v4661_v54 = vpop.f32.mrb[234].mxu1  ;;  %v10131_v0 = vld [vmem:[#allocation62_spill] sm:$0xff] }
 0x56b   : > { %v4208_v41 = vadd.f32 %v6301_v55, %v10123_v34  ;;  %v4207_v30 = vadd.f32 %v6238_v46, %v10124_v14  ;;  %v4927_v1 = vadd.f32 %v4895_v7, %v4802_v25  ;;  %v6304_v55 = vadd.f32 %v10128_v13, %v8573_v29  ;;  %v9038_v34 = vld [vmem:[%s8534_s23 + $0x148] sm:$0xff]  ;;  %v4663_v37 = vpop.f32.mrb[235].mxu1 }
 0x56c   : > { %v4209_v42 = vadd.f32 %v6302_v32, %v10125_v40  ;;  %v6241_v46 = vadd.f32 %v10129_v22, %v8555_v53  ;;  %v4804_v5 = vmul.f32 %v4464_v33, %v4202_v4  ;;  %v4806_v15 = vmul.f32 %v4657_v19, %v4204_v58  ;;  %v4466_v32 = vpop.f32.mrb[201].mxu0  ;;  %v10130_v14 = vld [vmem:[#allocation61_spill] sm:$0xff]  ;;  %5000 = vrot.lane.b32.xlu0 %v9031_v49, %s7002_s15  ;;  %v10132_v58 = vld [vmem:[#allocation63_spill] sm:$0xff] }
 0x56d   : > { %v6305_v40 = vadd.f32 %v10130_v14, %v8559_v52  ;;  %v9042_v38 = vadd.f32 %v4927_v1, %v4803_v51  ;;  %v4805_v25 = vmul.f32 %v4466_v32, %v4203_v50  ;;  %v4807_v10 = vmul.f32 %v4659_v60, %v4205_v24  ;;  %v4468_v7 = vpop.f32.mrb[202].mxu0 }
 0x56e   : > { %v6242_v4 = vadd.f32 %v10131_v0, %v8563_v45  ;;  %v6306_v33 = vadd.f32 %v10132_v58, %v8573_v29  ;;  %v4808_v19 = vmul.f32 %v4468_v7, %v4206_v18  ;;  %v4810_v13 = vmul.f32 %v4661_v54, %v4208_v41  ;;  %v4470_v22 = vpop.f32.mrb[203].mxu0 }
 0x56f   : > { %v4896_v14 = vadd.f32 %v4805_v25, %v4804_v5  ;;  %v4809_v51 = vmul.f32 %v4470_v22, %v4207_v30  ;;  %v4811_v1 = vmul.f32 %v4663_v37, %v4209_v42  ;;  %5002 = vrot.lane.b32.xlu1 %v9042_v38, %s7002_s15  ;;  %v10133_v24 = vunpack.c.l.bf16 %v8689_v27  ;;  %v10137_v42 = vld [vmem:[#allocation8_spill] sm:$0xff] }
 0x570   : > { %v10134_v60 = vunpack.c.l.bf16 %v8692_v6  ;;  %v10135_v58 = vunpack.c.h.bf16 %v8689_v27  ;;  %v10136_v37 = vunpack.c.h.bf16 %v8692_v6  ;;  %v10138_v25 = vunpack.c.l.bf16 %v10137_v42  ;;  %v10139_v22 = vld [vmem:[#allocation64_spill] sm:$0xff]  ;;  %v10145_v6 = vld [vmem:[#allocation66_spill] sm:$0xff] }
 0x571   : > { %v4210_v32 = vadd.f32 %v6239_v36, %v10133_v24  ;;  %v4928_v7 = vadd.f32 %v4896_v14, %v4806_v15  ;;  %v4897_v5 = vadd.f32 %v4809_v51, %v4808_v19  ;;  %v6243_v50 = vadd.f32 %v10139_v22, %v8555_v53  ;;  %v10140_v36 = vld [vmem:[#allocation128_spill] sm:$0xff]  ;;  %v10144_v15 = vld [vmem:[#allocation65_spill] sm:$0xff]  ;;  %v4474_v51 = vpop.f32.mrb[204].mxu0 }
 0x572   : > { %v4212_v0 = vadd.f32 %v6303_v11, %v10134_v60  ;;  %v4211_v18 = vadd.f32 %v6240_v2, %v10135_v58  ;;  %v4213_v30 = vadd.f32 %v6304_v55, %v10136_v37  ;;  %v4214_v54 = vadd.f32 %v6241_v46, %v10138_v25  ;;  %v4667_v58 = vpop.f32.mrb[236].mxu1  ;;  %v4476_v22 = vpop.f32.mrb[205].mxu0 }
 0x573   : > { %v10141_v24 = vunpack.c.l.bf16 %v10140_v36  ;;  %v10142_v11 = vunpack.c.h.bf16 %v10137_v42  ;;  %v10143_v2 = vunpack.c.h.bf16 %v10140_v36  ;;  %v6307_v19 = vadd.f32 %v10144_v15, %v8559_v52  ;;  %v4669_v36 = vpop.f32.mrb[237].mxu1  ;;  %v9089_v15 = vld [vmem:[%s8534_s23 + $0x150] sm:$0xff] }
 0x574   : > { %v6244_v55 = vadd.f32 %v10145_v6, %v8563_v45  ;;  %v9076_v14 = vadd.f32 %v4928_v7, %v4807_v10  ;;  %v4929_v46 = vadd.f32 %v4897_v5, %v4810_v13  ;;  %v4814_v25 = vmul.f32 %v4667_v58, %v4212_v0  ;;  %v4478_v5 = vpop.f32.mrb[206].mxu0  ;;  %v9092_v6 = vld [vmem:[%s8534_s23 + $0x158] sm:$0xff] }
 0x575   : > { %v4216_v39 = vadd.f32 %v6305_v40, %v10141_v24  ;;  %v4215_v27 = vadd.f32 %v6242_v4, %v10142_v11  ;;  %v4217_v60 = vadd.f32 %v6306_v33, %v10143_v2  ;;  %v10146_v40 = vld [vmem:[#allocation67_spill] sm:$0xff]  ;;  %v10147_v4 = vld [vmem:[#allocation68_spill] sm:$0xff]  ;;  %v4812_v33 = vmul.f32 %v4474_v51, %v4210_v32  ;;  %v10148_v24 = vld [vmem:[#allocation69_spill] sm:$0xff]  ;;  %v4671_v2 = vpop.f32.mrb[238].mxu1 }
 0x576   : > { %v6308_v37 = vadd.f32 %v10146_v40, %v8573_v29  ;;  %v6245_v42 = vadd.f32 %v10147_v4, %v8555_v53  ;;  %v6309_v11 = vadd.f32 %v10148_v24, %v8559_v52  ;;  %v9084_v10 = vadd.f32 %v4929_v46, %v4811_v1  ;;  %5004 = vrot.lane.b32.xlu0 %v9076_v14, %s7002_s15  ;;  %v10149_v32 = vld [vmem:[#allocation70_spill] sm:$0xff]  ;;  %v10150_v51 = vld [vmem:[#allocation71_spill] sm:$0xff]  ;;  %v4480_v46 = vpop.f32.mrb[207].mxu0  ;;  %v10151_v24 = vld [vmem:[#allocation129_spill] sm:$0xff] }
 0x577   : > { %v4813_v13 = vmul.f32 %v4476_v22, %v4211_v18  ;;  %v4815_v7 = vmul.f32 %v4669_v36, %v4213_v30  ;;  %v6246_v0 = vadd.f32 %v10149_v32, %v8563_v45  ;;  %v6310_v58 = vadd.f32 %v10150_v51, %v8573_v29  ;;  %v4673_v18 = vpop.f32.mrb[239].mxu1 }
 0x578   : > { %v4816_v40 = vmul.f32 %v4478_v5, %v4214_v54  ;;  %v4818_v1 = vmul.f32 %v4671_v2, %v4216_v39  ;;  %v4817_v4 = vmul.f32 %v4480_v46, %v4215_v27  ;;  %v4819_v22 = vmul.f32 %v4673_v18, %v4217_v60  ;;  %5006 = vrot.lane.b32.xlu1 %v9084_v10, %s7002_s15 }
 0x579   : > { %v4898_v30 = vadd.f32 %v4813_v13, %v4812_v33  ;;  %v4109_v36 = vunpack.c.h.bf16 %v9038_v34  ;;  %v10152_v41 = vunpack.c.l.bf16 %v10151_v24  ;;  %v10153_v32 = vunpack.c.l.bf16 %v8724_v8 }
 0x57a   : > { %v4110_v51 = vunpack.c.l.bf16 %v9089_v15  ;;  %v4899_v5 = vadd.f32 %v4817_v4, %v4816_v40  ;;  %v10154_v27 = vunpack.c.h.bf16 %v10151_v24  ;;  %v10155_v33 = vunpack.c.h.bf16 %v8724_v8  ;;  %v4677_v4 = vpop.f32.mrb[240].mxu1 }
 0x57b   : > { %v4218_v44 = vadd.f32 %v6243_v50, %v10152_v41  ;;  %v4220_v12 = vadd.f32 %v6307_v19, %v10153_v32  ;;  %v4930_v54 = vadd.f32 %v4898_v30, %v4814_v25  ;;  %v10156_v2 = vunpack.c.l.bf16 %v8767_v47  ;;  %v10160_v25 = vld [vmem:[#allocation72_spill] sm:$0xff] }
 0x57c   : > { %v4219_v60 = vadd.f32 %v6244_v55, %v10154_v27  ;;  %v4221_v13 = vadd.f32 %v6308_v37, %v10155_v33  ;;  %v10157_v50 = vunpack.c.l.bf16 %v8770_v35  ;;  %v10158_v19 = vunpack.c.h.bf16 %v8767_v47  ;;  %v10161_v55 = vld [vmem:[#allocation73_spill] sm:$0xff]  ;;  %v10163_v47 = vld [vmem:[#allocation75_spill] sm:$0xff]  ;;  %v4679_v33 = vpop.f32.mrb[241].mxu1 }
 0x57d   : > { %v4222_v46 = vadd.f32 %v6245_v42, %v10156_v2  ;;  %v10159_v32 = vunpack.c.h.bf16 %v8770_v35  ;;  %v6247_v40 = vadd.f32 %v10160_v25, %v8555_v53  ;;  %v6311_v30 = vadd.f32 %v10161_v55, %v8559_v52  ;;  %v4484_v42 = vpop.f32.mrb[208].mxu0  ;;  %v10164_v2 = vld [vmem:[#allocation76_spill] sm:$0xff]  ;;  %v10165_v25 = vld [vmem:[#allocation77_spill] sm:$0xff] }
 0x57e   : > { %v4224_v41 = vadd.f32 %v6309_v11, %v10157_v50  ;;  %v4223_v18 = vadd.f32 %v6246_v0, %v10158_v19  ;;  %v9123_v8 = vadd.f32 %v4930_v54, %v4815_v7  ;;  %v4931_v37 = vadd.f32 %v4899_v5, %v4818_v1  ;;  %v10162_v11 = vld [vmem:[#allocation74_spill] sm:$0xff]  ;;  %v4486_v27 = vpop.f32.mrb[209].mxu0  ;;  %v4681_v5 = vpop.f32.mrb[242].mxu1 }
 0x57f   : > { %v4225_v39 = vadd.f32 %v6310_v58, %v10159_v32  ;;  %v6248_v24 = vadd.f32 %v10162_v11, %v8563_v45  ;;  %v6312_v0 = vadd.f32 %v10163_v47, %v8573_v29  ;;  %v4820_v35 = vmul.f32 %v4484_v42, %v4218_v44  ;;  %v4488_v54 = vpop.f32.mrb[210].mxu0  ;;  %v9136_v32 = vld [vmem:[%s8534_s23 + $0x160] sm:$0xff] }
 0x580   : > { %v4822_v58 = vmul.f32 %v4677_v4, %v4220_v12  ;;  %v6249_v50 = vadd.f32 %v10164_v2, %v8555_v53  ;;  %v9131_v19 = vadd.f32 %v4931_v37, %v4819_v22  ;;  %v4821_v7 = vmul.f32 %v4486_v27, %v4219_v60  ;;  %5008 = vrot.lane.b32.xlu0 %v9123_v8, %s7002_s15  ;;  %v10166_v12 = vld [vmem:[#allocation78_spill] sm:$0xff]  ;;  %v4490_v11 = vpop.f32.mrb[211].mxu0  ;;  %v4683_v22 = vpop.f32.mrb[243].mxu1  ;;  %v10167_v60 = vld [vmem:[#allocation79_spill] sm:$0xff] }
 0x581   : > { %v4823_v1 = vmul.f32 %v4679_v33, %v4221_v13  ;;  %v6313_v44 = vadd.f32 %v10165_v25, %v8559_v52  ;;  %v6250_v55 = vadd.f32 %v10166_v12, %v8563_v45  ;;  %v4824_v42 = vmul.f32 %v4488_v54, %v4222_v46 }
 0x582   : > { %v4826_v4 = vmul.f32 %v4681_v5, %v4224_v41  ;;  %v6314_v13 = vadd.f32 %v10167_v60, %v8573_v29  ;;  %v4900_v37 = vadd.f32 %v4821_v7, %v4820_v35  ;;  %v4825_v47 = vmul.f32 %v4490_v11, %v4223_v18  ;;  %5010 = vrot.lane.b32.xlu1 %v9131_v19, %s7002_s15 }
 0x583   : > { %v4827_v27 = vmul.f32 %v4683_v22, %v4225_v39  ;;  %v10168_v33 = vunpack.c.l.bf16 %v8819_v9  ;;  %v4111_v25 = vunpack.c.h.bf16 %v9089_v15  ;;  %v4113_v12 = vunpack.c.h.bf16 %v9092_v6  ;;  %v4494_v9 = vpop.f32.mrb[212].mxu0 }
 0x584   : > { %v4114_v46 = vunpack.c.l.bf16 %v9136_v32  ;;  %v4932_v41 = vadd.f32 %v4900_v37, %v4822_v58  ;;  %v4901_v54 = vadd.f32 %v4825_v47, %v4824_v42  ;;  %v4228_v5 = vadd.f32 %v6311_v30, %v4100_v43  ;;  %v10172_v58 = vld [vmem:[#allocation80_spill] sm:$0xff]  ;;  %v10174_v30 = vld [vmem:[#allocation81_spill] sm:$0xff] }
 0x585   : > { %v4226_v2 = vadd.f32 %v6247_v40, %v10168_v33  ;;  %v4227_v39 = vadd.f32 %v6248_v24, %v4099_v48  ;;  %v4229_v18 = vadd.f32 %v6312_v0, %v4101_v23  ;;  %v10169_v35 = vunpack.c.l.bf16 %v8909_v56  ;;  %v4687_v48 = vpop.f32.mrb[244].mxu1  ;;  %v10175_v0 = vld [vmem:[#allocation82_spill] sm:$0xff] }
 0x586   : > { %v10170_v7 = vunpack.c.l.bf16 %v8948_v28  ;;  %v10171_v22 = vunpack.c.h.bf16 %v8909_v56  ;;  %v6251_v42 = vadd.f32 %v10172_v58, %v8555_v53  ;;  %v9165_v37 = vadd.f32 %v4932_v41, %v4823_v1  ;;  %v4689_v47 = vpop.f32.mrb[245].mxu1  ;;  %v10176_v1 = vld [vmem:[#allocation83_spill] sm:$0xff] }
 0x587   : > { %v4230_v40 = vadd.f32 %v6249_v50, %v10169_v35  ;;  %v4933_v43 = vadd.f32 %v4901_v54, %v4826_v4  ;;  %v10173_v31 = vunpack.c.h.bf16 %v8948_v28  ;;  %v6315_v24 = vadd.f32 %v10174_v30, %v8559_v52  ;;  %v9180_v35 = vld [vmem:[%s8534_s23 + $0x168] sm:$0xff] }
 0x588   : > { %v4232_v11 = vadd.f32 %v6313_v44, %v10170_v7  ;;  %v4231_v60 = vadd.f32 %v6250_v55, %v10171_v22  ;;  %v6252_v50 = vadd.f32 %v10175_v0, %v8563_v45  ;;  %v4828_v56 = vmul.f32 %v4494_v9, %v4226_v2  ;;  %v4496_v55 = vpop.f32.mrb[213].mxu0  ;;  %5012 = vrot.lane.b32.xlu0 %v9165_v37, %s7002_s15  ;;  %v10177_v2 = vld [vmem:[#allocation84_spill] sm:$0xff]  ;;  %v10178_v7 = vld [vmem:[#allocation85_spill] sm:$0xff] }
 0x589   : > { %v4233_v23 = vadd.f32 %v6314_v13, %v10173_v31  ;;  %v4830_v44 = vmul.f32 %v4687_v48, %v4228_v5  ;;  %v6316_v4 = vadd.f32 %v10176_v1, %v8573_v29  ;;  %v9175_v33 = vadd.f32 %v4933_v43, %v4827_v27  ;;  %v4498_v28 = vpop.f32.mrb[214].mxu0  ;;  %v4691_v13 = vpop.f32.mrb[246].mxu1  ;;  %v9187_v43 = vld [vmem:[%s8534_s23 + $0x170] sm:$0xff] }
 0x58a   : > { %v4829_v41 = vmul.f32 %v4496_v55, %v4227_v39  ;;  %v4831_v54 = vmul.f32 %v4689_v47, %v4229_v18  ;;  %v6253_v5 = vadd.f32 %v10177_v2, %v8555_v53  ;;  %v6317_v22 = vadd.f32 %v10178_v7, %v8559_v52  ;;  %v4500_v48 = vpop.f32.mrb[215].mxu0  ;;  %v4693_v27 = vpop.f32.mrb[247].mxu1  ;;  %v10179_v39 = vld [vmem:[#allocation86_spill] sm:$0xff]  ;;  %v10180_v55 = vld [vmem:[#allocation87_spill] sm:$0xff] }
 0x58b   : > { %v4832_v58 = vmul.f32 %v4498_v28, %v4230_v40  ;;  %v4834_v9 = vmul.f32 %v4691_v13, %v4232_v11  ;;  %v6254_v18 = vadd.f32 %v10179_v39, %v8563_v45  ;;  %v4833_v30 = vmul.f32 %v4500_v48, %v4231_v60  ;;  %5014 = vrot.lane.b32.xlu1 %v9175_v33, %s7002_s15 }
 0x58c   : > { %v4902_v31 = vadd.f32 %v4829_v41, %v4828_v56  ;;  %v4835_v0 = vmul.f32 %v4693_v27, %v4233_v23  ;;  %v6318_v47 = vadd.f32 %v10180_v55, %v8573_v29  ;;  %v4116_v1 = vunpack.c.l.bf16 %v9180_v35 }
 0x58d   : > { %v4115_v40 = vunpack.c.h.bf16 %v9136_v32  ;;  %v4117_v11 = vunpack.c.h.bf16 %v9180_v35  ;;  %v4903_v13 = vadd.f32 %v4833_v30, %v4832_v58  ;;  %v10181_v2 = vunpack.c.l.bf16 %v8999_v57  ;;  %v4504_v58 = vpop.f32.mrb[216].mxu0 }
 0x58e   : > { %v4934_v28 = vadd.f32 %v4902_v31, %v4830_v44  ;;  %v4118_v60 = vunpack.c.l.bf16 %v9187_v43  ;;  %v10182_v23 = vunpack.c.l.bf16 %v9038_v34  ;;  %v10183_v41 = vunpack.c.h.bf16 %v8999_v57  ;;  %v4697_v31 = vpop.f32.mrb[248].mxu1  ;;  %v4506_v34 = vpop.f32.mrb[217].mxu0 }
 0x58f   : > { %v4234_v7 = vadd.f32 %v6251_v42, %v10181_v2  ;;  %v4237_v27 = vadd.f32 %v6316_v4, %v4109_v36  ;;  %v4238_v39 = vadd.f32 %v6253_v5, %v4110_v51  ;;  %v4935_v44 = vadd.f32 %v4903_v13, %v4834_v9  ;;  %v4699_v36 = vpop.f32.mrb[249].mxu1  ;;  %v10186_v51 = vld [vmem:[#allocation89_spill] sm:$0xff] }
 0x590   : > { %v4236_v56 = vadd.f32 %v6315_v24, %v10182_v23  ;;  %v4235_v48 = vadd.f32 %v6252_v50, %v10183_v41  ;;  %v9209_v35 = vadd.f32 %v4934_v28, %v4831_v54  ;;  %v10184_v42 = vunpack.c.l.bf16 %v9092_v6  ;;  %v10185_v24 = vld [vmem:[#allocation88_spill] sm:$0xff]  ;;  %v4508_v28 = vpop.f32.mrb[218].mxu0 }
 0x591   : > { %v4239_v55 = vadd.f32 %v6254_v18, %v4111_v25  ;;  %v6255_v57 = vadd.f32 %v10185_v24, %v8555_v53  ;;  %v4836_v50 = vmul.f32 %v4504_v58, %v4234_v7  ;;  %v4241_v15 = vadd.f32 %v6318_v47, %v4113_v12  ;;  %v4009_v25 = vld [vmem:[%s8534_s23 + $0x178] sm:$0xff]  ;;  %v10188_v18 = vld [vmem:[#allocation90_spill] sm:$0xff]  ;;  %v4510_v23 = vpop.f32.mrb[219].mxu0  ;;  %v10191_v58 = vld [vmem:[#allocation93_spill] sm:$0xff] }
 0x592   : > { %v4240_v30 = vadd.f32 %v6317_v22, %v10184_v42  ;;  %v4838_v2 = vmul.f32 %v4697_v31, %v4236_v56  ;;  %v6319_v4 = vadd.f32 %v10186_v51, %v8559_v52  ;;  %v9219_v54 = vadd.f32 %v4935_v44, %v4835_v0  ;;  %v4701_v22 = vpop.f32.mrb[250].mxu1  ;;  %5016 = vrot.lane.b32.xlu0 %v9209_v35, %s7002_s15  ;;  %v10189_v7 = vld [vmem:[#allocation91_spill] sm:$0xff]  ;;  %v10190_v0 = vld [vmem:[#allocation92_spill] sm:$0xff]  ;;  %v10192_v42 = vld [vmem:[#allocation94_spill] sm:$0xff] }
 0x593   : > { %v4837_v5 = vmul.f32 %v4506_v34, %v4235_v48  ;;  %v4839_v9 = vmul.f32 %v4699_v36, %v4237_v27  ;;  %v6256_v13 = vadd.f32 %v10188_v18, %v8563_v45  ;;  %v6320_v6 = vadd.f32 %v10189_v7, %v8573_v29  ;;  %v4703_v56 = vpop.f32.mrb[251].mxu1  ;;  %v4514_v7 = vpop.f32.mrb[220].mxu0 }
 0x594   : > { %10187 = vst [vmem:[#allocation17_spill] sm:$0xff] %v9219_v54  ;;  %v4840_v12 = vmul.f32 %v4508_v28, %v4238_v39  ;;  %v4842_v47 = vmul.f32 %v4701_v22, %v4240_v30  ;;  %v6257_v41 = vadd.f32 %v10190_v0, %v8555_v53  ;;  %v4841_v27 = vmul.f32 %v4510_v23, %v4239_v55  ;;  %v10193_v30 = vld [vmem:[#allocation95_spill] sm:$0xff]  ;;  %v4707_v23 = vpop.f32.mrb[252].mxu1 }
 0x595   : > { %v4904_v48 = vadd.f32 %v4837_v5, %v4836_v50  ;;  %v4843_v44 = vmul.f32 %v4703_v56, %v4241_v15  ;;  %5018 = vrot.lane.b32.xlu1 %v9219_v54, %s7002_s15  ;;  %v6321_v31 = vadd.f32 %v10191_v58, %v8559_v52  ;;  %v6258_v24 = vadd.f32 %v10192_v42, %v8563_v45  ;;  %v4516_v42 = vpop.f32.mrb[221].mxu0  ;;  %v4709_v54 = vpop.f32.mrb[253].mxu1 }
 0x596   : > { %v4120_v34 = vunpack.c.l.bf16 %v4009_v25  ;;  %v4119_v39 = vunpack.c.h.bf16 %v9187_v43  ;;  %v6322_v36 = vadd.f32 %v10193_v30, %v8573_v29  ;;  %v4905_v28 = vadd.f32 %v4841_v27, %v4840_v12 }
 0x597   : > { %v4936_v51 = vadd.f32 %v4904_v48, %v4838_v2  ;;  %v4121_v50 = vunpack.c.h.bf16 %v4009_v25  ;;  %v4242_v55 = vadd.f32 %v6255_v57, %v4114_v46  ;;  %v4244_v15 = vadd.f32 %v6319_v4, %v4116_v1  ;;  %v4518_v46 = vpop.f32.mrb[222].mxu0  ;;  %v4711_v1 = vpop.f32.mrb[254].mxu1 }
 0x598   : > { %v4243_v5 = vadd.f32 %v6256_v13, %v4115_v40  ;;  %v4937_v18 = vadd.f32 %v4905_v28, %v4842_v47  ;;  %v4245_v56 = vadd.f32 %v6320_v6, %v4117_v11  ;;  %v4246_v0 = vadd.f32 %v6257_v41, %v4118_v60  ;;  %v4520_v11 = vpop.f32.mrb[223].mxu0  ;;  %v4713_v60 = vpop.f32.mrb[255].mxu1 }
 0x599   : > { %v9241_v22 = vadd.f32 %v4936_v51, %v4839_v9  ;;  %v4844_v58 = vmul.f32 %v4514_v7, %v4242_v55  ;;  %v4846_v43 = vmul.f32 %v4707_v23, %v4244_v15  ;;  %v4248_v30 = vadd.f32 %v6321_v31, %v4120_v34  ;;  %v4010_v31 = vld [vmem:[%s8534_s23 + $0x180] sm:$0xff]  ;;  %v4012_v34 = vld [vmem:[%s8534_s23 + $0x190] sm:$0xff]  ;;  %v9268_v51 = vld [vmem:[%s8534_s23 + $0x1a8] sm:$0xff] }
 0x59a   : > { %v4247_v2 = vadd.f32 %v6258_v24, %v4119_v39  ;;  %v9243_v12 = vadd.f32 %v4937_v18, %v4843_v44  ;;  %v4845_v25 = vmul.f32 %v4516_v42, %v4243_v5  ;;  %v4847_v32 = vmul.f32 %v4709_v54, %v4245_v56  ;;  %v6795_v44 = vld [vmem:[%s9827_s10] sm:$0xff]   ;;  %v4011_v24 = vld [vmem:[%s8534_s23 + $0x188] sm:$0xff]  ;;  %v4013_v39 = vld [vmem:[%s8534_s23 + $0x198] sm:$0xff] }
 0x59b   : > { %5020 = vrot.lane.b32.xlu0 %v9241_v22, %s7002_s15  ;;  %v4249_v40 = vadd.f32 %v6322_v36, %v4121_v50  ;;  %v4848_v57 = vmul.f32 %v4518_v46, %v4246_v0  ;;  %v4850_v4 = vmul.f32 %v4711_v1, %v4248_v30  ;;  %6159 = vmatprep.subr.bf16.mxu0 %v6795_v44  ;;  %v9265_v36 = vld [vmem:[%s8534_s23 + $0x1a0] sm:$0xff]  ;;  %v4122_v28 = vunpack.c.l.bf16 %v4010_v31  ;;  %v9271_v15 = vld [vmem:[%s8534_s23 + $0x1b0] sm:$0xff]  ;;  %v9274_v5 = vld [vmem:[%s8534_s23 + $0x1b8] sm:$0xff] }
 0x59c   : > { %10194 = vst [vmem:[#allocation19_spill] sm:$0xff] %v9243_v12  ;;  %v4906_v9 = vadd.f32 %v4845_v25, %v4844_v58  ;;  %v4849_v13 = vmul.f32 %v4520_v11, %v4247_v2  ;;  %5022 = vrot.lane.b32.xlu1 %v9243_v12, %s7002_s15  ;;  %6160 = vmatpush3.bf16.msra.mxu0 %v6795_v44  ;;  %v4124_v50 = vunpack.c.l.bf16 %v4011_v24  ;;  %v4123_v55 = vunpack.c.h.bf16 %v4010_v31  ;;  %v9284_v46 = vld [vmem:[%s8534_s23 + $0x1c0] sm:$0xff]  ;;  %v9287_v1 = vld [vmem:[%s8534_s23 + $0x1c8] sm:$0xff] }
 0x59d   : > { %v4851_v6 = vmul.f32 %v4713_v60, %v4249_v40  ;;  %v4125_v18 = vunpack.c.h.bf16 %v4011_v24  ;;  %v4126_v7 = vunpack.c.l.bf16 %v4012_v34  ;;  %v4128_v23 = vunpack.c.l.bf16 %v4013_v39  ;;  %v10197_v40 = vld [vmem:[#allocation96_spill] sm:$0xff]  ;;  %v10199_v60 = vld [vmem:[#allocation98_spill] sm:$0xff]  ;;  %v10202_v24 = vld [vmem:[#allocation101_spill] sm:$0xff] }
 0x59e   : > { %v4938_v54 = vadd.f32 %v4906_v9, %v4846_v43  ;;  %v4907_v47 = vadd.f32 %v4849_v13, %v4848_v57  ;;  %v4127_v56 = vunpack.c.h.bf16 %v4012_v34  ;;  %v4129_v0 = vunpack.c.h.bf16 %v4013_v39  ;;  %v10201_v44 = vld [vmem:[#allocation100_spill] sm:$0xff]  ;;  %v10203_v39 = vld [vmem:[#allocation102_spill] sm:$0xff] }
 0x59f   : > { %v6259_v57 = vadd.f32 %v10197_v40, %v8555_v53  ;;  %v6260_v9 = vadd.f32 %v10199_v60, %v8563_v45  ;;  %v6261_v31 = vadd.f32 %v10201_v44, %v8555_v53  ;;  %v6325_v34 = vadd.f32 %v10202_v24, %v8559_v52 }
 0x5a0   : > { %v9249_v41 = vadd.f32 %v4938_v54, %v4847_v32  ;;  %v4939_v48 = vadd.f32 %v4907_v47, %v4850_v4  ;;  %v10198_v4 = vld [vmem:[#allocation97_spill] sm:$0xff]  ;;  %v9300_v54 = vld [vmem:[%s8534_s23 + $0x1d8] sm:$0xff]  ;;  %v6262_v40 = vadd.f32 %v10203_v39, %v8563_v45 }
 0x5a1   : > { %v6323_v11 = vadd.f32 %v10198_v4, %v8559_v52  ;;  %v10200_v47 = vld [vmem:[#allocation99_spill] sm:$0xff]  ;;  %v4250_v30 = vadd.f32 %v6259_v57, %v4122_v28  ;;  %v4251_v39 = vadd.f32 %v6260_v9, %v4123_v55  ;;  %v4254_v32 = vadd.f32 %v6261_v31, %v4126_v7  ;;  %v10207_v57 = vld [vmem:[#allocation106_spill] sm:$0xff] }
 0x5a2   : > { %10195 = vst [vmem:[#allocation18_spill] sm:$0xff] %v9249_v41  ;;  %v9251_v27 = vadd.f32 %v4939_v48, %v4851_v6  ;;  %5024 = vrot.lane.b32.xlu0 %v9249_v41, %s7002_s15  ;;  %v9297_v6 = vld [vmem:[%s8534_s23 + $0x1d0] sm:$0xff]  ;;  %v6324_v48 = vadd.f32 %v10200_v47, %v8573_v29  ;;  %v10204_v4 = vld [vmem:[#allocation103_spill] sm:$0xff]  ;;  %v4256_v25 = vadd.f32 %v6325_v34, %v4128_v23  ;;  %v10205_v47 = vld [vmem:[#allocation104_spill] sm:$0xff] }
 0x5a3   : > { %v6326_v60 = vadd.f32 %v10204_v4, %v8573_v29  ;;  %v4252_v42 = vadd.f32 %v6323_v11, %v4124_v50  ;;  %v6263_v2 = vadd.f32 %v10205_v47, %v8555_v53  ;;  %v10206_v50 = vld [vmem:[#allocation105_spill] sm:$0xff]  ;;  %v6264_v11 = vadd.f32 %v10207_v57, %v8563_v45  ;;  %v9327_v23 = vld [vmem:[%s8534_s23 + $0x1e0] sm:$0xff] }
 0x5a4   : > { %10196 = vst [vmem:[#allocation21_spill] sm:$0xff] %v9251_v27  ;;  %5026 = vrot.lane.b32.xlu1 %v9251_v27, %s7002_s15  ;;  %v4253_v13 = vadd.f32 %v6324_v48, %v4125_v18  ;;  %v4255_v27 = vadd.f32 %v6262_v40, %v4127_v56  ;;  %v6327_v55 = vadd.f32 %v10206_v50, %v8559_v52  ;;  %v9330_v56 = vld [vmem:[%s8534_s23 + $0x1e8] sm:$0xff]  ;;  %v10212_v50 = vld [vmem:[#allocation111_spill] sm:$0xff] }
 0x5a5   : > { %v4257_v28 = vadd.f32 %v6326_v60, %v4129_v0  ;;  %v10210_v60 = vld [vmem:[#allocation109_spill] sm:$0xff]  ;;  %v6330_v57 = vadd.f32 %v10212_v50, %v8573_v29 }
 0x5a6   : > { %v6329_v47 = vadd.f32 %v10210_v60, %v8559_v52 }
 0x5d4   : > { %v4524_v4 = vpop.f32.mrb[224].mxu0  ;;  %v4717_v58 = vpop.f32.mrb[0].mxu1 }
 0x5d5   : > { %v4852_v41 = vmul.f32 %v4524_v4, %v4250_v30  ;;  %v4854_v44 = vmul.f32 %v4717_v58, %v4252_v42  ;;  %v4526_v12 = vpop.f32.mrb[225].mxu0  ;;  %v4719_v24 = vpop.f32.mrb[1].mxu1  ;;  %v10208_v30 = vld [vmem:[#allocation107_spill] sm:$0xff]  ;;  %v10209_v42 = vld [vmem:[#allocation108_spill] sm:$0xff] }
 0x5d6   : > { %v4853_v18 = vmul.f32 %v4526_v12, %v4251_v39  ;;  %v4855_v9 = vmul.f32 %v4719_v24, %v4253_v13  ;;  %v4528_v7 = vpop.f32.mrb[226].mxu0  ;;  %v4721_v48 = vpop.f32.mrb[2].mxu1  ;;  %v6328_v58 = vadd.f32 %v10208_v30, %v8573_v29  ;;  %v6265_v0 = vadd.f32 %v10209_v42, %v8555_v53  ;;  %v10211_v12 = vld [vmem:[#allocation110_spill] sm:$0xff] }
 0x5d7   : > { %v4856_v31 = vmul.f32 %v4528_v7, %v4254_v32  ;;  %v4858_v34 = vmul.f32 %v4721_v48, %v4256_v25  ;;  %v4530_v40 = vpop.f32.mrb[227].mxu0  ;;  %v6266_v13 = vadd.f32 %v10211_v12, %v8563_v45  ;;  %v4723_v4 = vpop.f32.mrb[3].mxu1  ;;  %v10213_v7 = vunpack.c.l.bf16 %v9265_v36 }
 0x5d8   : > { %v4908_v24 = vadd.f32 %v4853_v18, %v4852_v41  ;;  %v4857_v39 = vmul.f32 %v4530_v40, %v4255_v27  ;;  %v4859_v43 = vmul.f32 %v4723_v4, %v4257_v28  ;;  %v10214_v12 = vunpack.c.l.bf16 %v9268_v51 }
 0x5d9   : > { %v4258_v48 = vadd.f32 %v6263_v2, %v10213_v7  ;;  %v10215_v27 = vunpack.c.h.bf16 %v9265_v36  ;;  %v10216_v40 = vunpack.c.h.bf16 %v9268_v51  ;;  %v10217_v4 = vunpack.c.l.bf16 %v9271_v15  ;;  %v10221_v36 = vld [vmem:[#allocation112_spill] sm:$0xff] }
 0x5da   : > { %v4940_v32 = vadd.f32 %v4908_v24, %v4854_v44  ;;  %v4909_v25 = vadd.f32 %v4857_v39, %v4856_v31  ;;  %v4260_v41 = vadd.f32 %v6327_v55, %v10214_v12  ;;  %v10219_v2 = vunpack.c.l.bf16 %v9274_v5 }
 0x5db   : > { %v4259_v18 = vadd.f32 %v6264_v11, %v10215_v27  ;;  %v4261_v28 = vadd.f32 %v6328_v58, %v10216_v40  ;;  %v4262_v50 = vadd.f32 %v6265_v0, %v10217_v4  ;;  %v10220_v7 = vunpack.c.h.bf16 %v9271_v15  ;;  %v10226_v4 = vld [vmem:[#allocation115_spill] sm:$0xff] }
 0x5dc   : > { %v9355_v42 = vadd.f32 %v4940_v32, %v4855_v9  ;;  %v4941_v44 = vadd.f32 %v4909_v25, %v4858_v34  ;;  %v4534_v31 = vpop.f32.mrb[228].mxu0  ;;  %v4727_v24 = vpop.f32.mrb[4].mxu1  ;;  %v4264_v39 = vadd.f32 %v6329_v47, %v10219_v2  ;;  %v6267_v11 = vadd.f32 %v10221_v36, %v8555_v53  ;;  %v10223_v32 = vld [vmem:[#allocation113_spill] sm:$0xff]  ;;  %v9376_v2 = vld [vmem:[%s8534_s23 + $0x1f0] sm:$0xff] }
 0x5dd   : > { %v4263_v55 = vadd.f32 %v6266_v13, %v10220_v7  ;;  %v4860_v12 = vmul.f32 %v4534_v31, %v4258_v48  ;;  %v4862_v51 = vmul.f32 %v4727_v24, %v4260_v41  ;;  %v4536_v58 = vpop.f32.mrb[229].mxu0  ;;  %v4729_v0 = vpop.f32.mrb[5].mxu1  ;;  %v10222_v9 = vunpack.c.h.bf16 %v9274_v5  ;;  %v10225_v48 = vld [vmem:[#allocation114_spill] sm:$0xff] }
 0x5de   : > { %10218 = vst [vmem:[#allocation20_spill] sm:$0xff] %v9355_v42  ;;  %v6331_v25 = vadd.f32 %v10223_v32, %v8559_v52  ;;  %v9367_v27 = vadd.f32 %v4941_v44, %v4859_v43  ;;  %v4861_v47 = vmul.f32 %v4536_v58, %v4259_v18  ;;  %v4863_v15 = vmul.f32 %v4729_v0, %v4261_v28  ;;  %v4538_v13 = vpop.f32.mrb[230].mxu0  ;;  %v4731_v40 = vpop.f32.mrb[6].mxu1  ;;  %v9379_v43 = vld [vmem:[%s8534_s23 + $0x1f8] sm:$0xff]  ;;  %v10227_v18 = vld [vmem:[#allocation116_spill] sm:$0xff]  ;;  %v10228_v44 = vld [vmem:[#allocation117_spill] sm:$0xff]  ;;  %s9687_s23 = scalar_lea.vmem %s9829_s12, %s8098_s13 }
 0x5df   : > { %v4265_v34 = vadd.f32 %v6330_v57, %v10222_v9  ;;  %5028 = vrot.lane.b32.xlu0 %v9355_v42, %s7002_s15  ;;  %v6268_v41 = vadd.f32 %v10225_v48, %v8563_v45  ;;  %v6332_v31 = vadd.f32 %v10226_v4, %v8573_v29  ;;  %v4864_v5 = vmul.f32 %v4538_v13, %v4262_v50  ;;  %v4540_v24 = vpop.f32.mrb[231].mxu0  ;;  %v4733_v0 = vpop.f32.mrb[7].mxu1  ;;  %v10229_v50 = vld [vmem:[#allocation118_spill] sm:$0xff]  ;;  %v10230_v9 = vld [vmem:[#allocation119_spill] sm:$0xff] }
 0x5e0   : > { %10224 = vst [vmem:[#allocation22_spill] sm:$0xff] %v9367_v27  ;;  %v4866_v57 = vmul.f32 %v4731_v40, %v4264_v39  ;;  %v6269_v28 = vadd.f32 %v10227_v18, %v8555_v53  ;;  %v6333_v7 = vadd.f32 %v10228_v44, %v8559_v52  ;;  %v4910_v36 = vadd.f32 %v4861_v47, %v4860_v12 }
 0x5e1   : > { %v4865_v58 = vmul.f32 %v4540_v24, %v4263_v55  ;;  %5030 = vrot.lane.b32.xlu1 %v9367_v27, %s7002_s15  ;;  %v6270_v39 = vadd.f32 %v10229_v50, %v8563_v45  ;;  %v6334_v32 = vadd.f32 %v10230_v9, %v8573_v29  ;;  %v4867_v13 = vmul.f32 %v4733_v0, %v4265_v34 }
 0x5e2   : > { %v4149_v40 = vunpack.c.h.bf16 %v9330_v56  ;;  %v4942_v48 = vadd.f32 %v4910_v36, %v4862_v51  ;;  %v4150_v18 = vunpack.c.l.bf16 %v9376_v2  ;;  %v4152_v12 = vunpack.c.l.bf16 %v9379_v43 }
 0x5e3   : > { %v4911_v4 = vadd.f32 %v4865_v58, %v4864_v5  ;;  %v10231_v55 = vunpack.c.l.bf16 %v9284_v46  ;;  %v10232_v24 = vunpack.c.l.bf16 %v9287_v1  ;;  %v10233_v50 = vunpack.c.h.bf16 %v9284_v46 }
 0x5e4   : > { %v10234_v9 = vunpack.c.h.bf16 %v9287_v1  ;;  %v9402_v0 = vadd.f32 %v4942_v48, %v4863_v15  ;;  %v4544_v5 = vpop.f32.mrb[232].mxu0  ;;  %v4737_v36 = vpop.f32.mrb[8].mxu1  ;;  %v10235_v58 = vunpack.c.l.bf16 %v9297_v6  ;;  %v10236_v27 = vunpack.c.l.bf16 %v9300_v54 }
 0x5e5   : > { %v4266_v47 = vadd.f32 %v6267_v11, %v10231_v55  ;;  %v4268_v44 = vadd.f32 %v6331_v25, %v10232_v24  ;;  %v4267_v60 = vadd.f32 %v6268_v41, %v10233_v50  ;;  %v4943_v51 = vadd.f32 %v4911_v4, %v4866_v57  ;;  %v4546_v25 = vpop.f32.mrb[233].mxu0  ;;  %v4739_v24 = vpop.f32.mrb[9].mxu1 }
 0x5e6   : > { %v4269_v34 = vadd.f32 %v6332_v31, %v10234_v9  ;;  %v4270_v30 = vadd.f32 %v6269_v28, %v10235_v58  ;;  %v4272_v11 = vadd.f32 %v6333_v7, %v10236_v27  ;;  %v10237_v46 = vunpack.c.h.bf16 %v9297_v6  ;;  %v10239_v31 = vld [vmem:[#allocation120_spill] sm:$0xff]  ;;  %v4548_v50 = vpop.f32.mrb[234].mxu0  ;;  %v4741_v9 = vpop.f32.mrb[10].mxu1  ;;  %5032 = vrot.lane.b32.xlu0 %v9402_v0, %s7002_s15  ;;  %v10240_v27 = vld [vmem:[#allocation121_spill] sm:$0xff]  ;;  %v10241_v6 = vld [vmem:[#allocation122_spill] sm:$0xff] }
 0x5e7   : > { %v4868_v55 = vmul.f32 %v4544_v5, %v4266_v47  ;;  %v4870_v42 = vmul.f32 %v4737_v36, %v4268_v44  ;;  %v10238_v1 = vunpack.c.h.bf16 %v9300_v54  ;;  %v6271_v57 = vadd.f32 %v10239_v31, %v8555_v53  ;;  %v4550_v47 = vpop.f32.mrb[235].mxu0  ;;  %v10242_v44 = vld [vmem:[#allocation123_spill] sm:$0xff]  ;;  %v4743_v36 = vpop.f32.mrb[11].mxu1  ;;  %v10244_v58 = vld [vmem:[#allocation125_spill] sm:$0xff] }
 0x5e8   : > { %v4271_v41 = vadd.f32 %v6270_v39, %v10237_v46  ;;  %v9414_v48 = vadd.f32 %v4943_v51, %v4867_v13  ;;  %v4869_v4 = vmul.f32 %v4546_v25, %v4267_v60  ;;  %v4871_v28 = vmul.f32 %v4739_v24, %v4269_v34  ;;  %v10243_v60 = vld [vmem:[#allocation124_spill] sm:$0xff]  ;;  %v10245_v24 = vld [vmem:[#allocation126_spill] sm:$0xff] }
 0x5e9   : > { %v4273_v15 = vadd.f32 %v6334_v32, %v10238_v1  ;;  %v6335_v7 = vadd.f32 %v10240_v27, %v8559_v52  ;;  %v6272_v39 = vadd.f32 %v10241_v6, %v8563_v45  ;;  %v4872_v54 = vmul.f32 %v4548_v50, %v4270_v30 }
 0x5ea   : > { %v4874_v32 = vmul.f32 %v4741_v9, %v4272_v11  ;;  %v6336_v13 = vadd.f32 %v10242_v44, %v8573_v29  ;;  %v6273_v34 = vadd.f32 %v10243_v60, %v8555_v53  ;;  %v4912_v51 = vadd.f32 %v4869_v4, %v4868_v55  ;;  %5034 = vrot.lane.b32.xlu1 %v9414_v48, %s7002_s15  ;;  %v10246_v53 = vld [vmem:[#allocation127_spill] sm:$0xff]  ;;  %v4983_v4 = vpop.permute.xlu1 %4982 }
 0x5eb   : > { %v4873_v5 = vmul.f32 %v4550_v47, %v4271_v41  ;;  %v6337_v25 = vadd.f32 %v10244_v58, %v8559_v52  ;;  %v6274_v30 = vadd.f32 %v10245_v24, %v8563_v45  ;;  %v4875_v11 = vmul.f32 %v4743_v36, %v4273_v15  ;;  %v4981_v41 = vpop.permute.xlu0 %4980 }
 0x5ec   : > { %v4151_v46 = vunpack.c.h.bf16 %v9376_v2  ;;  %v4944_v1 = vadd.f32 %v4912_v51, %v4870_v42  ;;  %v4153_v50 = vunpack.c.h.bf16 %v9379_v43  ;;  %v6338_v55 = vadd.f32 %v10246_v53, %v8573_v29  ;;  %v6796_v42 = vld [vmem:[%s9827_s10 + $0x8] sm:$0xff]   ;;  %v4747_v29 = vpop.f32.mrb[12].mxu1 }
 0x5ed   : > { %v4913_v31 = vadd.f32 %v4873_v5, %v4872_v54  ;;  %v10247_v9 = vunpack.c.l.bf16 %v9327_v23  ;;  %v10248_v52 = vunpack.c.l.bf16 %v9330_v56  ;;  %v10249_v45 = vunpack.c.h.bf16 %v9327_v23  ;;  %v4554_v54 = vpop.f32.mrb[236].mxu0  ;;  %v4749_v5 = vpop.f32.mrb[13].mxu1  ;;  %6161 = vmatprep.subr.bf16.mxu0 %v6796_v42 }
 0x5ee   : > { %v9445_v2 = vadd.f32 %v4944_v1, %v4871_v28  ;;  %v4277_v47 = vadd.f32 %v6336_v13, %v4149_v40  ;;  %v4278_v44 = vadd.f32 %v6273_v34, %v4150_v18  ;;  %v4280_v56 = vadd.f32 %v6337_v25, %v4152_v12  ;;  %v4751_v24 = vpop.f32.mrb[14].mxu1  ;;  %6162 = vmatpush3.bf16.msra.mxu0 %v6796_v42 }
 0x5ef   : > { %v4274_v27 = vadd.f32 %v6271_v57, %v10247_v9  ;;  %v4276_v6 = vadd.f32 %v6335_v7, %v10248_v52  ;;  %v4275_v15 = vadd.f32 %v6272_v39, %v10249_v45  ;;  %v4945_v43 = vadd.f32 %v4913_v31, %v4874_v32  ;;  %v4556_v57 = vpop.f32.mrb[237].mxu0  ;;  %v4753_v25 = vpop.f32.mrb[15].mxu1 }
 0x5f0   : > { %v4279_v7 = vadd.f32 %v6274_v30, %v4151_v46  ;;  %v4879_v36 = vmul.f32 %v4749_v5, %v4277_v47  ;;  %v4558_v58 = vpop.f32.mrb[238].mxu0  ;;  %5036 = vrot.lane.b32.xlu0 %v9445_v2, %s7002_s15  ;;  %v4882_v40 = vmul.f32 %v4751_v24, %v4280_v56  ;;  %v4281_v32 = vadd.f32 %v6338_v55, %v4153_v50  ;;  %v4985_v30 = vpop.permute.xlu1 %4984 }
 0x5f1   : > { %v4876_v60 = vmul.f32 %v4554_v54, %v4274_v27  ;;  %v4878_v51 = vmul.f32 %v4747_v29, %v4276_v6  ;;  %v9447_v23 = vadd.f32 %v4945_v43, %v4875_v11  ;;  %v4877_v39 = vmul.f32 %v4556_v57, %v4275_v15  ;;  %v4560_v18 = vpop.f32.mrb[239].mxu0 }
 0x5f2   : > { %v4880_v28 = vmul.f32 %v4558_v58, %v4278_v44  ;;  %v9452_v13 = vadd.f32 %v4981_v41, %v8794_v62  ;;  %v4881_v34 = vmul.f32 %v4560_v18, %v4279_v7  ;;  %v4883_v11 = vmul.f32 %v4753_v25, %v4281_v32  ;;  %v4989_v41 = vpop.permute.xlu0 %4988  ;;  %v10253_v18 = vld [vmem:[#allocation21_spill] sm:$0xff] }
 0x5f3   : > { %v4914_v12 = vadd.f32 %v4877_v39, %v4876_v60  ;;  %5038 = vrot.lane.b32.xlu1 %v9447_v23, %s7002_s15  ;;  %v9457_v46 = vadd.f32 %v4983_v4, %v8810_v26  ;;  %v9470_v26 = vadd.f32 %v4985_v30, %v8851_v20  ;;  %v9480_v27 = vadd.f32 %v4989_v41, %v8896_v61  ;;  %v10255_v30 = vld [vmem:[#allocation22_spill] sm:$0xff] }
 0x5f4   : > { %v4915_v31 = vadd.f32 %v4881_v34, %v4880_v28  ;;  %5076 = vrot.lane.b32.xlu0 %v9452_v13, %s7003_s24  ;;  %v4987_v55 = vpop.permute.xlu1 %4986  ;;  %v10252_v28 = vld [vmem:[#allocation18_spill] sm:$0xff] }
 0x5f5   : > { %v4946_v1 = vadd.f32 %v4914_v12, %v4878_v51  ;;  %v9475_v4 = vadd.f32 %v4987_v55, %v8862_v17  ;;  %v10254_v12 = vld [vmem:[#allocation20_spill] sm:$0xff] }
 0x5f6   : > { %v4947_v62 = vadd.f32 %v4915_v31, %v4882_v40  ;;  %v4993_v52 = vpop.permute.xlu0 %4992 }
 0x5f7   : > { %v9461_v50 = vadd.f32 %v4946_v1, %v4879_v36  ;;  %5078 = vrot.lane.b32.xlu1 %v9457_v46, %s7003_s24  ;;  %v9490_v17 = vadd.f32 %v4993_v52, %v8941_v16 }
 0x5f8   : > { %v9465_v53 = vadd.f32 %v4947_v62, %v4883_v11  ;;  %v4991_v9 = vpop.permute.xlu1 %4990 }
 0x5f9   : > { %5040 = vrot.lane.b32.xlu0 %v9461_v50, %s7002_s15  ;;  %v9485_v20 = vadd.f32 %v4991_v9, %v8904_v21 }
 0x5fa   : > { %v4997_v45 = vpop.permute.xlu0 %4996 }
 0x5fb   : > { %5042 = vrot.lane.b32.xlu1 %v9465_v53, %s7002_s15  ;;  %v9500_v21 = vadd.f32 %v4997_v45, %v8986_v63 }
 0x5fc   : > { %v4995_v6 = vpop.permute.xlu1 %4994 }
 0x5fd   : > { %5080 = vrot.lane.b32.xlu0 %v9470_v26, %s7003_s24  ;;  %v9495_v61 = vadd.f32 %v4995_v6, %v8952_v59 }
 0x5fe   : > { %v5001_v42 = vpop.permute.xlu0 %5000 }
 0x5ff   : > { %5082 = vrot.lane.b32.xlu1 %v9475_v4, %s7003_s24  ;;  %v9510_v59 = vadd.f32 %v5001_v42, %v9031_v49 }
 0x600   : > { %v4999_v15 = vpop.permute.xlu1 %4998 }
 0x601   : > { %5084 = vrot.lane.b32.xlu0 %v9480_v27, %s7003_s24  ;;  %v9505_v16 = vadd.f32 %v4999_v15, %v8994_v3 }
 0x602   : > { %v5005_v54 = vpop.permute.xlu0 %5004 }
 0x603   : > { %5086 = vrot.lane.b32.xlu1 %v9485_v20, %s7003_s24  ;;  %v9520_v3 = vadd.f32 %v5005_v54, %v9076_v14 }
 0x604   : > { %v5003_v43 = vpop.permute.xlu1 %5002 }
 0x605   : > { %5088 = vrot.lane.b32.xlu0 %v9490_v17, %s7003_s24  ;;  %v9515_v63 = vadd.f32 %v5003_v43, %v9042_v38 }
 0x606   : > { %v5009_v47 = vpop.permute.xlu0 %5008 }
 0x607   : > { %5090 = vrot.lane.b32.xlu1 %v9495_v61, %s7003_s24  ;;  %v9530_v38 = vadd.f32 %v5009_v47, %v9123_v8 }
 0x608   : > { %v5007_v29 = vpop.permute.xlu1 %5006 }
 0x609   : > { %5092 = vrot.lane.b32.xlu0 %v9500_v21, %s7003_s24  ;;  %v9525_v49 = vadd.f32 %v5007_v29, %v9084_v10 }
 0x60a   : > { %v5013_v60 = vpop.permute.xlu0 %5012 }
 0x60b   : > { %5094 = vrot.lane.b32.xlu1 %v9505_v16, %s7003_s24  ;;  %v9540_v10 = vadd.f32 %v5013_v60, %v9165_v37  ;;  %v10250_v37 = vld [vmem:[#allocation17_spill] sm:$0xff] }
 0x60c   : > { %v5011_v44 = vpop.permute.xlu1 %5010 }
 0x60d   : > { %5096 = vrot.lane.b32.xlu0 %v9510_v59, %s7003_s24  ;;  %v9535_v14 = vadd.f32 %v5011_v44, %v9131_v19 }
 0x60e   : > { %v5017_v57 = vpop.permute.xlu0 %5016 }
 0x60f   : > { %5098 = vrot.lane.b32.xlu1 %v9515_v63, %s7003_s24  ;;  %v9550_v19 = vadd.f32 %v5017_v57, %v9209_v35  ;;  %v10251_v35 = vld [vmem:[#allocation19_spill] sm:$0xff] }
 0x610   : > { %v5015_v51 = vpop.permute.xlu1 %5014 }
 0x611   : > { %5100 = vrot.lane.b32.xlu0 %v9520_v3, %s7003_s24  ;;  %v9545_v8 = vadd.f32 %v5015_v51, %v9175_v33 }
 0x612   : > { %v5021_v56 = vpop.permute.xlu0 %5020 }
 0x613   : > { %5102 = vrot.lane.b32.xlu1 %v9525_v49, %s7003_s24  ;;  %v9560_v33 = vadd.f32 %v5021_v56, %v9241_v22 }
 0x614   : > { %v5019_v5 = vpop.permute.xlu1 %5018 }
 0x615   : > { %5104 = vrot.lane.b32.xlu0 %v9530_v38, %s7003_s24  ;;  %v9555_v7 = vadd.f32 %v5019_v5, %v10250_v37 }
 0x616   : > { %v5025_v36 = vpop.permute.xlu0 %5024 }
 0x617   : > { %5106 = vrot.lane.b32.xlu1 %v9535_v14, %s7003_s24  ;;  %v9570_v40 = vadd.f32 %v5025_v36, %v10252_v28 }
 0x618   : > { %v5023_v39 = vpop.permute.xlu1 %5022 }
 0x619   : > { %5108 = vrot.lane.b32.xlu0 %v9540_v10, %s7003_s24  ;;  %v9565_v58 = vadd.f32 %v5023_v39, %v10251_v35 }
 0x61b   : > { %5110 = vrot.lane.b32.xlu1 %v9545_v8, %s7003_s24 }
 0x61c   : > { %v5027_v24 = vpop.permute.xlu1 %5026 }
 0x61d   : > { %5112 = vrot.lane.b32.xlu0 %v9550_v19, %s7003_s24  ;;  %v9575_v22 = vadd.f32 %v5027_v24, %v10253_v18 }
 0x61f   : > { %5114 = vrot.lane.b32.xlu1 %v9555_v7, %s7003_s24 }
 0x621   : > { %5116 = vrot.lane.b32.xlu0 %v9560_v33, %s7003_s24 }
 0x623   : > { %5118 = vrot.lane.b32.xlu1 %v9565_v58, %s7003_s24 }
 0x625   : > { %5120 = vrot.lane.b32.xlu0 %v9570_v40, %s7003_s24 }
 0x627   : > { %5122 = vrot.lane.b32.xlu1 %v9575_v22, %s7003_s24 }
 0x651   : > { %v5029_v32 = vpop.permute.xlu0 %5028 }
 0x652   : > { %v9582_v34 = vadd.f32 %v5029_v32, %v10254_v12 }
 0x653   : > { %v5031_v25 = vpop.permute.xlu1 %5030 }
 0x654   : > { %v9585_v11 = vadd.f32 %v5031_v25, %v10255_v30  ;;  %5124 = vrot.lane.b32.xlu0 %v9582_v34, %s7003_s24 }
 0x656   : > { %5126 = vrot.lane.b32.xlu1 %v9585_v11, %s7003_s24 }
 0x658   : > { %v5033_v1 = vpop.permute.xlu0 %5032 }
 0x659   : > { %v9592_v31 = vadd.f32 %v5033_v1, %v9402_v0 }
 0x65b   : > { %5128 = vrot.lane.b32.xlu0 %v9592_v31, %s7003_s24 }
 0x65c   : > { %v5035_v62 = vpop.permute.xlu1 %5034 }
 0x65d   : > { %v9595_v55 = vadd.f32 %v5035_v62, %v9414_v48 }
 0x65f   : > { %5130 = vrot.lane.b32.xlu1 %v9595_v55, %s7003_s24 }
 0x662   : > { %v5037_v41 = vpop.permute.xlu0 %5036 }
 0x663   : > { %v9602_v9 = vadd.f32 %v5037_v41, %v9445_v2 }
 0x665   : > { %v5039_v52 = vpop.permute.xlu1 %5038  ;;  %5132 = vrot.lane.b32.xlu0 %v9602_v9, %s7003_s24 }
 0x666   : > { %v9605_v6 = vadd.f32 %v5039_v52, %v9447_v23  ;;  %v5077_v0 = vpop.permute.xlu0 %5076 }
 0x667   : > { %v5140_v45 = vadd.f32 %v5077_v0, %v9452_v13 }
 0x668   : > { %5134 = vrot.lane.b32.xlu1 %v9605_v6, %s7003_s24 }
 0x669   : > { %v5079_v48 = vpop.permute.xlu1 %5078 }
 0x66a   : > { %v5141_v15 = vadd.f32 %v5079_v48, %v9457_v46 }
 0x66b   : > { %v5041_v42 = vpop.permute.xlu0 %5040 }
 0x66c   : > { %v5172_v2 = vpack.c.bf16 %v5141_v15, %v5140_v45  ;;  %v9614_v43 = vadd.f32 %v5041_v42, %v9461_v50 }
 0x66d   : > { %v5043_v23 = vpop.permute.xlu1 %5042 }
 0x66e   : > { %v9617_v54 = vadd.f32 %v5043_v23, %v9465_v53  ;;  %6163 = vmatprep.mubr.msk.bf16.mxu0 %vm5211_vm1, %v5172_v2  ;;  %5136 = vrot.lane.b32.xlu0 %v9614_v43, %s7003_s24 }
 0x66f   : > { %v5081_v29 = vpop.permute.xlu0 %5080 }
 0x670   : > { %5138 = vrot.lane.b32.xlu1 %v9617_v54, %s7003_s24  ;;  %v5142_v46 = vadd.f32 %v5081_v29, %v9470_v26 }
 0x671   : > { %v5083_v13 = vpop.permute.xlu1 %5082 }
 0x672   : > { %v5143_v47 = vadd.f32 %v5083_v13, %v9475_v4 }
 0x673   : > { %v5085_v50 = vpop.permute.xlu0 %5084 }
 0x674   : > { %v5173_v44 = vpack.c.bf16 %v5143_v47, %v5142_v46  ;;  %v5144_v53 = vadd.f32 %v5085_v50, %v9480_v27 }
 0x675   : > { %v5087_v60 = vpop.permute.xlu1 %5086 }
 0x676   : > { %v5145_v51 = vadd.f32 %v5087_v60, %v9485_v20  ;;  %6164 = vmatmul.mubr.msk.bf16.vlgmr.msra.gmra.mrb[240].mxu0 %vm5211_vm1, %v5173_v44 }
 0x677   : > { %v5089_v57 = vpop.permute.xlu0 %5088 }
 0x678   : > { %v5174_v5 = vpack.c.bf16 %v5145_v51, %v5144_v53  ;;  %v5146_v37 = vadd.f32 %v5089_v57, %v9490_v17 }
 0x679   : > { %v5091_v56 = vpop.permute.xlu1 %5090 }
 0x67a   : > { %v5147_v39 = vadd.f32 %v5091_v56, %v9495_v61  ;;  %6167 = vmatprep.mubr.msk.bf16.mxu0 %vm5211_vm1, %v5174_v5 }
 0x67b   : > { %v5093_v26 = vpop.permute.xlu0 %5092 }
 0x67c   : > { %v5175_v4 = vpack.c.bf16 %v5147_v39, %v5146_v37  ;;  %v5148_v35 = vadd.f32 %v5093_v26, %v9500_v21 }
 0x67d   : > { %v5095_v36 = vpop.permute.xlu1 %5094 }
 0x67e   : > { %v5149_v27 = vadd.f32 %v5095_v36, %v9505_v16  ;;  %6168 = vmatmul.mubr.msk.bf16.gmra.mrb[244].mxu0 %vm5211_vm1, %v5175_v4  ;;  %v5421_v36 = vld [vmem:[%s9673_s26] sm:$0xff] }
 0x67f   : > { %v5097_v20 = vpop.permute.xlu0 %5096 }
 0x680   : > { %v5176_v24 = vpack.c.bf16 %v5149_v27, %v5148_v35  ;;  %v5150_v18 = vadd.f32 %v5097_v20, %v9510_v59  ;;  %v5424_v20 = vld [vmem:[%s9673_s26 + $0x18] sm:$0xff] }
 0x681   : > { %v5099_v28 = vpop.permute.xlu1 %5098 }
 0x682   : > { %v5151_v17 = vadd.f32 %v5099_v28, %v9515_v63  ;;  %6171 = vmatprep.mubr.msk.bf16.mxu0 %vm5211_vm1, %v5176_v24 }
 0x683   : > { %v5101_v61 = vpop.permute.xlu0 %5100 }
 0x684   : > { %v5177_v32 = vpack.c.bf16 %v5151_v17, %v5150_v18  ;;  %v5152_v25 = vadd.f32 %v5101_v61, %v9520_v3  ;;  %v5422_v17 = vld [vmem:[%s9673_s26 + $0x8] sm:$0xff] }
 0x685   : > { %v5103_v12 = vpop.permute.xlu1 %5102 }
 0x686   : > { %v5153_v21 = vadd.f32 %v5103_v12, %v9525_v49  ;;  %6172 = vmatmul.mubr.msk.bf16.gmra.mrb[248].mxu0 %vm5211_vm1, %v5177_v32 }
 0x687   : > { %v5105_v16 = vpop.permute.xlu0 %5104 }
 0x688   : > { %v5178_v30 = vpack.c.bf16 %v5153_v21, %v5152_v25  ;;  %v5154_v62 = vadd.f32 %v5105_v16, %v9530_v38  ;;  %v5427_v16 = vld [vmem:[%s9673_s26 + $0x30] sm:$0xff] }
 0x689   : > { %v5107_v1 = vpop.permute.xlu1 %5106 }
 0x68a   : > { %v5155_v59 = vadd.f32 %v5107_v1, %v9535_v14  ;;  %6175 = vmatprep.mubr.msk.bf16.mxu0 %vm5211_vm1, %v5178_v30 }
 0x68b   : > { %v5109_v63 = vpop.permute.xlu0 %5108 }
 0x68c   : > { %v5179_v41 = vpack.c.bf16 %v5155_v59, %v5154_v62  ;;  %v5156_v0 = vadd.f32 %v5109_v63, %v9540_v10  ;;  %v5425_v62 = vld [vmem:[%s9673_s26 + $0x20] sm:$0xff] }
 0x68d   : > { %v5111_v52 = vpop.permute.xlu1 %5110 }
 0x68e   : > { %v5157_v3 = vadd.f32 %v5111_v52, %v9545_v8  ;;  %6176 = vmatmul.mubr.msk.bf16.gmra.mrb[252].mxu0 %vm5211_vm1, %v5179_v41  ;;  %v5428_v41 = vld [vmem:[%s9673_s26 + $0x38] sm:$0xff] }
 0x68f   : > { %v5113_v49 = vpop.permute.xlu0 %5112 }
 0x690   : > { %v5180_v48 = vpack.c.bf16 %v5157_v3, %v5156_v0  ;;  %v5158_v15 = vadd.f32 %v5113_v49, %v9550_v19  ;;  %v5426_v49 = vld [vmem:[%s9673_s26 + $0x28] sm:$0xff] }
 0x691   : > { %v5115_v45 = vpop.permute.xlu1 %5114 }
 0x692   : > { %v5159_v38 = vadd.f32 %v5115_v45, %v9555_v7  ;;  %6179 = vmatprep.mubr.msk.bf16.mxu0 %vm5211_vm1, %v5180_v48 }
 0x693   : > { %v5117_v14 = vpop.permute.xlu0 %5116 }
 0x694   : > { %v5181_v42 = vpack.c.bf16 %v5159_v38, %v5158_v15  ;;  %v5160_v23 = vadd.f32 %v5117_v14, %v9560_v33 }
 0x695   : > { %v5119_v2 = vpop.permute.xlu1 %5118 }
 0x696   : > { %v5161_v10 = vadd.f32 %v5119_v2, %v9565_v58  ;;  %6180 = vmatmul.mubr.msk.bf16.gmra.mrb[0].mxu0 %vm5211_vm1, %v5181_v42  ;;  %v5431_v42 = vld [vmem:[%s9673_s26 + $0x50] sm:$0xff] }
 0x697   : > { %v5121_v8 = vpop.permute.xlu0 %5120 }
 0x698   : > { %v5182_v29 = vpack.c.bf16 %v5161_v10, %v5160_v23  ;;  %v5162_v46 = vadd.f32 %v5121_v8, %v9570_v40  ;;  %v5429_v10 = vld [vmem:[%s9673_s26 + $0x40] sm:$0xff] }
 0x699   : > { %v5123_v13 = vpop.permute.xlu1 %5122 }
 0x69a   : > { %v5163_v19 = vadd.f32 %v5123_v13, %v9575_v22  ;;  %6183 = vmatprep.mubr.msk.bf16.mxu0 %vm5211_vm1, %v5182_v29  ;;  %v5432_v13 = vld [vmem:[%s9673_s26 + $0x58] sm:$0xff] }
 0x69c   : > { %v5183_v7 = vpack.c.bf16 %v5163_v19, %v5162_v46 }
 0x69e   : > { %6184 = vmatmul.mubr.msk.bf16.gmra.mrb[4].mxu0 %vm5211_vm1, %v5183_v7 }
 0x6c6   : > { %v5125_v47 = vpop.permute.xlu0 %5124 }
 0x6c7   : > { %v5164_v33 = vadd.f32 %v5125_v47, %v9582_v34  ;;  %v5430_v47 = vld [vmem:[%s9673_s26 + $0x48] sm:$0xff] }
 0x6c8   : > { %v5127_v50 = vpop.permute.xlu1 %5126 }
 0x6c9   : > { %v5165_v58 = vadd.f32 %v5127_v50, %v9585_v11 }
 0x6cb   : > { %v5184_v44 = vpack.c.bf16 %v5165_v58, %v5164_v33 }
 0x6cd   : > { %6187 = vmatprep.mubr.msk.bf16.mxu0 %vm5211_vm1, %v5184_v44  ;;  %v5129_v60 = vpop.permute.xlu0 %5128 }
 0x6ce   : > { %v5166_v40 = vadd.f32 %v5129_v60, %v9592_v31 }
 0x6d1   : > { %v5131_v53 = vpop.permute.xlu1 %5130 }
 0x6d2   : > { %v5167_v22 = vadd.f32 %v5131_v53, %v9595_v55  ;;  %v5435_v53 = vld [vmem:[%s9673_s26 + $0x70] sm:$0xff] }
 0x6d4   : > { %v5185_v51 = vpack.c.bf16 %v5167_v22, %v5166_v40 }
 0x6d6   : > { %6188 = vmatmul.mubr.msk.bf16.gmra.mrb[8].mxu0 %vm5211_vm1, %v5185_v51  ;;  %v5433_v51 = vld [vmem:[%s9673_s26 + $0x60] sm:$0xff] }
 0x6d7   : > { %v5133_v57 = vpop.permute.xlu0 %5132 }
 0x6d8   : > { %v5168_v56 = vadd.f32 %v5133_v57, %v9602_v9  ;;  %v9678_v9 = vld [vmem:[%s9828_s11] ss:$0 sm:$0xff] }
 0x6da   : > { %v5135_v5 = vpop.permute.xlu1 %5134 }
 0x6db   : > { %v5169_v34 = vadd.f32 %v5135_v5, %v9605_v6 }
 0x6dd   : > { %v5186_v11 = vpack.c.bf16 %v5169_v34, %v5168_v56  ;;  %v5436_v56 = vld [vmem:[%s9673_s26 + $0x78] sm:$0xff] }
 0x6df   : > { %6191 = vmatprep.mubr.msk.bf16.mxu0 %vm5211_vm1, %v5186_v11 }
 0x6e0   : > { %v5137_v37 = vpop.permute.xlu0 %5136 }
 0x6e1   : > { %v5170_v31 = vadd.f32 %v5137_v37, %v9614_v43  ;;  %v5423_v43 = vld [vmem:[%s9673_s26 + $0x10] sm:$0xff] }
 0x6e2   : > { %v5139_v39 = vpop.permute.xlu1 %5138 }
 0x6e3   : > { %v5171_v26 = vadd.f32 %v5139_v39, %v9617_v54  ;;  %v5434_v39 = vld [vmem:[%s9673_s26 + $0x68] sm:$0xff] }
 0x6e5   : > { %v5187_v55 = vpack.c.bf16 %v5171_v26, %v5170_v31 }
 0x6e7   : > { %6192 = vmatmul.mubr.msk.bf16.gmra.mrb[12].mxu0 %vm5211_vm1, %v5187_v55 }
 0x749   : > { %v6165_v6 = vpop.f32.mrb[240].mxu0 }
 0x74a   : > { %v5303_v54 = vadd.f32 %v6165_v6, %v9678_v9  ;;  %v5294_v4 = vpop.f32.mrb[241].mxu0 }
 0x74b   : > { %v5295_v35 = vadd.f32 %v9678_v9, %v5294_v4  ;;  %v6166_v27 = vpop.f32.mrb[242].mxu0 }
 0x74c   : > { %v5455_v24 = vadd.f32 %v5423_v43, %v5303_v54  ;;  %v5306_v28 = vadd.f32 %v6166_v27, %v9678_v9  ;;  %v5297_v18 = vpop.f32.mrb[243].mxu0  ;;  %v5439_v54 = vld [vmem:[%s9673_s26 + $0x90] sm:$0xff] }
 0x74d   : > { %v5453_v61 = vadd.f32 %v5421_v36, %v5295_v35  ;;  %v5298_v32 = vadd.f32 %v9678_v9, %v5297_v18  ;;  %v5437_v35 = vld [vmem:[%s9673_s26 + $0x80] sm:$0xff] }
 0x74e   : > { %5487 = vst.msk [vmem:[%s9687_s23 + $0x10] sm:$0xff] %vm5211_vm1, %v5455_v24  ;;  %v5456_v12 = vadd.f32 %v5424_v20, %v5306_v28  ;;  %v5440_v24 = vld [vmem:[%s9673_s26 + $0x98] sm:$0xff] }
 0x74f   : > { %5485 = vst.msk [vmem:[%s9687_s23] sm:$0xff] %vm5211_vm1, %v5453_v61  ;;  %v5454_v25 = vadd.f32 %v5422_v17, %v5298_v32  ;;  %v5438_v61 = vld [vmem:[%s9673_s26 + $0x88] sm:$0xff] }
 0x750   : > { %5488 = vst.msk [vmem:[%s9687_s23 + $0x18] sm:$0xff] %vm5211_vm1, %v5456_v12 }
 0x751   : > { %5486 = vst.msk [vmem:[%s9687_s23 + $0x8] sm:$0xff] %vm5211_vm1, %v5454_v25  ;;  %v6169_v21 = vpop.f32.mrb[244].mxu0 }
 0x752   : > { %v5319_v30 = vadd.f32 %v6169_v21, %v9678_v9  ;;  %v5310_v1 = vpop.f32.mrb[245].mxu0 }
 0x753   : > { %v5311_v59 = vadd.f32 %v9678_v9, %v5310_v1  ;;  %v6170_v63 = vpop.f32.mrb[246].mxu0 }
 0x754   : > { %v5459_v52 = vadd.f32 %v5427_v16, %v5319_v30  ;;  %v5322_v0 = vadd.f32 %v6170_v63, %v9678_v9  ;;  %v5313_v3 = vpop.f32.mrb[247].mxu0  ;;  %v5443_v30 = vld [vmem:[%s9673_s26 + $0xb0] sm:$0xff] }
 0x755   : > { %v5457_v48 = vadd.f32 %v5425_v62, %v5311_v59  ;;  %v5314_v45 = vadd.f32 %v9678_v9, %v5313_v3  ;;  %v5441_v59 = vld [vmem:[%s9673_s26 + $0xa0] sm:$0xff] }
 0x756   : > { %5491 = vst.msk [vmem:[%s9687_s23 + $0x30] sm:$0xff] %vm5211_vm1, %v5459_v52  ;;  %v5460_v15 = vadd.f32 %v5428_v41, %v5322_v0  ;;  %v5444_v52 = vld [vmem:[%s9673_s26 + $0xb8] sm:$0xff] }
 0x757   : > { %5489 = vst.msk [vmem:[%s9687_s23 + $0x20] sm:$0xff] %vm5211_vm1, %v5457_v48  ;;  %v5458_v38 = vadd.f32 %v5426_v49, %v5314_v45  ;;  %v5442_v48 = vld [vmem:[%s9673_s26 + $0xa8] sm:$0xff] }
 0x758   : > { %5492 = vst.msk [vmem:[%s9687_s23 + $0x38] sm:$0xff] %vm5211_vm1, %v5460_v15 }
 0x759   : > { %5490 = vst.msk [vmem:[%s9687_s23 + $0x28] sm:$0xff] %vm5211_vm1, %v5458_v38  ;;  %v6173_v14 = vpop.f32.mrb[248].mxu0 }
 0x75a   : > { %v5335_v2 = vadd.f32 %v6173_v14, %v9678_v9  ;;  %v5326_v23 = vpop.f32.mrb[249].mxu0 }
 0x75b   : > { %v5327_v8 = vadd.f32 %v9678_v9, %v5326_v23  ;;  %v6174_v29 = vpop.f32.mrb[250].mxu0 }
 0x75c   : > { %v5463_v46 = vadd.f32 %v5431_v42, %v5335_v2  ;;  %v5338_v19 = vadd.f32 %v6174_v29, %v9678_v9  ;;  %v5329_v7 = vpop.f32.mrb[251].mxu0  ;;  %v5447_v2 = vld [vmem:[%s9673_s26 + $0xd0] sm:$0xff] }
 0x75d   : > { %v5461_v50 = vadd.f32 %v5429_v10, %v5327_v8  ;;  %v5330_v33 = vadd.f32 %v9678_v9, %v5329_v7  ;;  %v5445_v8 = vld [vmem:[%s9673_s26 + $0xc0] sm:$0xff] }
 0x75e   : > { %5495 = vst.msk [vmem:[%s9687_s23 + $0x50] sm:$0xff] %vm5211_vm1, %v5463_v46  ;;  %v5464_v58 = vadd.f32 %v5432_v13, %v5338_v19  ;;  %v5448_v46 = vld [vmem:[%s9673_s26 + $0xd8] sm:$0xff] }
 0x75f   : > { %5493 = vst.msk [vmem:[%s9687_s23 + $0x40] sm:$0xff] %vm5211_vm1, %v5461_v50  ;;  %v5462_v44 = vadd.f32 %v5430_v47, %v5330_v33  ;;  %v5446_v50 = vld [vmem:[%s9673_s26 + $0xc8] sm:$0xff] }
 0x760   : > { %5496 = vst.msk [vmem:[%s9687_s23 + $0x58] sm:$0xff] %vm5211_vm1, %v5464_v58 }
 0x761   : > { %5494 = vst.msk [vmem:[%s9687_s23 + $0x48] sm:$0xff] %vm5211_vm1, %v5462_v44  ;;  %v6177_v60 = vpop.f32.mrb[252].mxu0 }
 0x762   : > { %v5351_v40 = vadd.f32 %v6177_v60, %v9678_v9  ;;  %v5342_v22 = vpop.f32.mrb[253].mxu0 }
 0x763   : > { %v5343_v57 = vadd.f32 %v9678_v9, %v5342_v22  ;;  %v6178_v5 = vpop.f32.mrb[254].mxu0 }
 0x764   : > { %v5467_v34 = vadd.f32 %v5435_v53, %v5351_v40  ;;  %v5354_v11 = vadd.f32 %v6178_v5, %v9678_v9  ;;  %v5345_v37 = vpop.f32.mrb[255].mxu0  ;;  %v5451_v40 = vld [vmem:[%s9673_s26 + $0xf0] sm:$0xff] }
 0x765   : > { %v5465_v31 = vadd.f32 %v5433_v51, %v5343_v57  ;;  %v5346_v26 = vadd.f32 %v9678_v9, %v5345_v37  ;;  %v5449_v57 = vld [vmem:[%s9673_s26 + $0xe0] sm:$0xff] }
 0x766   : > { %5499 = vst.msk [vmem:[%s9687_s23 + $0x70] sm:$0xff] %vm5211_vm1, %v5467_v34  ;;  %v5468_v55 = vadd.f32 %v5436_v56, %v5354_v11  ;;  %v5452_v34 = vld [vmem:[%s9673_s26 + $0xf8] sm:$0xff] }
 0x767   : > { %5497 = vst.msk [vmem:[%s9687_s23 + $0x60] sm:$0xff] %vm5211_vm1, %v5465_v31  ;;  %v5466_v6 = vadd.f32 %v5434_v39, %v5346_v26  ;;  %v5450_v31 = vld [vmem:[%s9673_s26 + $0xe8] sm:$0xff] }
 0x768   : > { %5500 = vst.msk [vmem:[%s9687_s23 + $0x78] sm:$0xff] %vm5211_vm1, %v5468_v55 }
 0x769   : > { %5498 = vst.msk [vmem:[%s9687_s23 + $0x68] sm:$0xff] %vm5211_vm1, %v5466_v6  ;;  %v6181_v43 = vpop.f32.mrb[0].mxu0 }
 0x76a   : > { %v5367_v4 = vadd.f32 %v6181_v43, %v9678_v9  ;;  %v5358_v36 = vpop.f32.mrb[1].mxu0 }
 0x76b   : > { %v5359_v27 = vadd.f32 %v9678_v9, %v5358_v36  ;;  %v6182_v20 = vpop.f32.mrb[2].mxu0 }
 0x76c   : > { %v5471_v28 = vadd.f32 %v5439_v54, %v5367_v4  ;;  %v5370_v18 = vadd.f32 %v6182_v20, %v9678_v9  ;;  %v5361_v17 = vpop.f32.mrb[3].mxu0 }
 0x76d   : > { %v5469_v32 = vadd.f32 %v5437_v35, %v5359_v27  ;;  %v5362_v12 = vadd.f32 %v9678_v9, %v5361_v17 }
 0x76e   : > { %5503 = vst.msk [vmem:[%s9687_s23 + $0x90] sm:$0xff] %vm5211_vm1, %v5471_v28  ;;  %v5472_v25 = vadd.f32 %v5440_v24, %v5370_v18 }
 0x76f   : > { %5501 = vst.msk [vmem:[%s9687_s23 + $0x80] sm:$0xff] %vm5211_vm1, %v5469_v32  ;;  %v5470_v21 = vadd.f32 %v5438_v61, %v5362_v12 }
 0x770   : > { %5504 = vst.msk [vmem:[%s9687_s23 + $0x98] sm:$0xff] %vm5211_vm1, %v5472_v25 }
 0x771   : > { %5502 = vst.msk [vmem:[%s9687_s23 + $0x88] sm:$0xff] %vm5211_vm1, %v5470_v21  ;;  %v6185_v16 = vpop.f32.mrb[4].mxu0 }
 0x772   : > { %v5383_v1 = vadd.f32 %v6185_v16, %v9678_v9  ;;  %v5374_v62 = vpop.f32.mrb[5].mxu0 }
 0x773   : > { %v5375_v63 = vadd.f32 %v9678_v9, %v5374_v62  ;;  %v6186_v41 = vpop.f32.mrb[6].mxu0 }
 0x774   : > { %v5475_v0 = vadd.f32 %v5443_v30, %v5383_v1  ;;  %v5386_v3 = vadd.f32 %v6186_v41, %v9678_v9  ;;  %v5377_v49 = vpop.f32.mrb[7].mxu0 }
 0x775   : > { %v5473_v45 = vadd.f32 %v5441_v59, %v5375_v63  ;;  %v5378_v15 = vadd.f32 %v9678_v9, %v5377_v49 }
 0x776   : > { %5507 = vst.msk [vmem:[%s9687_s23 + $0xb0] sm:$0xff] %vm5211_vm1, %v5475_v0  ;;  %v5476_v38 = vadd.f32 %v5444_v52, %v5386_v3 }
 0x777   : > { %5505 = vst.msk [vmem:[%s9687_s23 + $0xa0] sm:$0xff] %vm5211_vm1, %v5473_v45  ;;  %v5474_v14 = vadd.f32 %v5442_v48, %v5378_v15 }
 0x778   : > { %5508 = vst.msk [vmem:[%s9687_s23 + $0xb8] sm:$0xff] %vm5211_vm1, %v5476_v38 }
 0x779   : > { %5506 = vst.msk [vmem:[%s9687_s23 + $0xa8] sm:$0xff] %vm5211_vm1, %v5474_v14 }
 0x7a9   : > { %v6189_v42 = vpop.f32.mrb[8].mxu0 }
 0x7aa   : > { %v5399_v23 = vadd.f32 %v6189_v42, %v9678_v9  ;;  %v5390_v10 = vpop.f32.mrb[9].mxu0 }
 0x7ab   : > { %v5391_v29 = vadd.f32 %v9678_v9, %v5390_v10  ;;  %v6190_v13 = vpop.f32.mrb[10].mxu0 }
 0x7ac   : > { %v5479_v19 = vadd.f32 %v5447_v2, %v5399_v23  ;;  %v5402_v7 = vadd.f32 %v6190_v13, %v9678_v9  ;;  %v5393_v47 = vpop.f32.mrb[11].mxu0 }
 0x7ad   : > { %v5477_v33 = vadd.f32 %v5445_v8, %v5391_v29  ;;  %v5394_v58 = vadd.f32 %v9678_v9, %v5393_v47 }
 0x7ae   : > { %5511 = vst.msk [vmem:[%s9687_s23 + $0xd0] sm:$0xff] %vm5211_vm1, %v5479_v19  ;;  %v5480_v44 = vadd.f32 %v5448_v46, %v5402_v7 }
 0x7af   : > { %5509 = vst.msk [vmem:[%s9687_s23 + $0xc0] sm:$0xff] %vm5211_vm1, %v5477_v33  ;;  %v5478_v60 = vadd.f32 %v5446_v50, %v5394_v58 }
 0x7b0   : > { %5512 = vst.msk [vmem:[%s9687_s23 + $0xd8] sm:$0xff] %vm5211_vm1, %v5480_v44 }
 0x7b1   : > { %5510 = vst.msk [vmem:[%s9687_s23 + $0xc8] sm:$0xff] %vm5211_vm1, %v5478_v60 }
 0x7ba   : > { %v6193_v53 = vpop.f32.mrb[12].mxu0 }
 0x7bb   : > { %v5415_v22 = vadd.f32 %v6193_v53, %v9678_v9  ;;  %v5406_v51 = vpop.f32.mrb[13].mxu0 }
 0x7bc   : > { %v5407_v5 = vadd.f32 %v9678_v9, %v5406_v51  ;;  %v6194_v56 = vpop.f32.mrb[14].mxu0 }
 0x7bd   : > { %v5483_v11 = vadd.f32 %v5451_v40, %v5415_v22  ;;  %v5418_v37 = vadd.f32 %v6194_v56, %v9678_v9  ;;  %v5409_v39 = vpop.f32.mrb[15].mxu0 }
 0x7be   : > { %v5481_v26 = vadd.f32 %v5449_v57, %v5407_v5  ;;  %v5410_v55 = vadd.f32 %v9678_v9, %v5409_v39 }
 0x7bf   : > { %5515 = vst.msk [vmem:[%s9687_s23 + $0xf0] sm:$0xff] %vm5211_vm1, %v5483_v11  ;;  %v5484_v6 = vadd.f32 %v5452_v34, %v5418_v37 }
 0x7c0   : > { %5513 = vst.msk [vmem:[%s9687_s23 + $0xe0] sm:$0xff] %vm5211_vm1, %v5481_v26  ;;  %v5482_v43 = vadd.f32 %v5450_v31, %v5410_v55 }
 0x7c1   : > { %5516 = vst.msk [vmem:[%s9687_s23 + $0xf8] sm:$0xff] %vm5211_vm1, %v5484_v6 }
 0x7c2   : > { %5514 = vst.msk [vmem:[%s9687_s23 + $0xe8] sm:$0xff] %vm5211_vm1, %v5482_v43 }
 0x7c3 PF: > { %s24_s21 = sadd.s32 1, %s6995_s21  }
 0x7c4   : > { %p21_p7 = scmp.ge.s32.totalorder %s24_s21, 4  }
 0x7c6   :  { %23 = sbr.rel (!%p21_p7) target bundleno = 2 (0x2), region = 116 }
 0x7cd   :  { %5539 = vsyncpa [#allocation3], 1 }
 0x7ce   :  { %5541 = vsyncpa [#allocation3 + $0x1], 1 }
 0x7cf   :  { %5542 = vsyncpa [#allocation5], 1 }

</bundles_post_ra>
